<compile_context>
chip_gen: v7x
topology: tpu7x:2x2x1
jax: 0.10.0
libtpu: 0.0.40
codegen_flags: <defaults>
</compile_context>

<pallas_src>
import math
import numpy as np
import jax
import jax.numpy as jnp
from jax.experimental import pallas as pl
from jax.experimental.pallas import tpu as pltpu


def compute_cc_quadrature(nb_steps, align=8):
    """Clenshaw-Curtis weights and [0,1]-mapped nodes (exact port of the UMNN
    helper), padded with zero-weight nodes to a sublane-aligned count.
    Returns (cc_w, t) as float32 numpy arrays of shape (S, 1)."""
    lam = np.arange(0, nb_steps + 1, 1).reshape(-1, 1).astype(np.float64)
    lam = np.cos((lam @ lam.T) * math.pi / nb_steps)
    lam[:, 0] = .5
    lam[:, -1] = .5 * lam[:, -1]
    lam = lam * 2.0 / nb_steps
    W = np.arange(0, nb_steps + 1, 1).reshape(-1, 1).astype(np.float64)
    W[np.arange(1, nb_steps + 1, 2)] = 0
    W = 2.0 / (1.0 - W ** 2)
    W[0] = 1
    W[np.arange(1, nb_steps + 1, 2)] = 0
    cc_w = (lam.T @ W).astype(np.float32)                       # (S0, 1)
    steps = np.cos(np.arange(0, nb_steps + 1, 1).reshape(-1, 1)
                   * math.pi / nb_steps).astype(np.float32)     # (S0, 1)
    t = (steps + 1.0) * 0.5                                     # nodes in [0,1]

    s0 = nb_steps + 1
    s_pad = ((s0 + align - 1) // align) * align
    ccw_p = np.zeros((s_pad, 1), np.float32)
    t_p = np.zeros((s_pad, 1), np.float32)
    ccw_p[:s0] = cc_w
    t_p[:s0] = t
    return ccw_p, t_p                                           # numpy (S, 1)


def monotonic_kernel(x_ref, t_ref, ccw_ref,
                     w0_ref, b0_ref, w1_ref, b1_ref, w2_ref, b2_ref,
                     out_ref):
    x = x_ref[...]                                   # (TB, D) batch tile
    TB = x.shape[0]
    S = t_ref.shape[0]                               # padded node count (static)

    # --- Layer 0, fused with the quadrature-point construction -------------
    # x0 == 0, so X[b,s,:] = t[s]*x[b,:] and (t[s]*x[b]) @ w0 = t[s]*(x[b]@w0):
    # one (TB,D)@(D,H1) matmul instead of an (S*TB,D) materialization + matmul.
    xw0 = jnp.dot(x.astype(w0_ref.dtype), w0_ref[...],
                  preferred_element_type=jnp.float32)            # (TB, H1)

    # Layer-1 pre-activations for every quadrature node, batch-major rows
    # (row = b*S + s): scale the (TB,H1) slab by t over the node axis.  S is
    # sublane-aligned, so the 3D -> 2D collapse is layout-preserving.
    txw0 = xw0[:, None, :] * t_ref[...][None, :, :]              # (TB, S, H1)
    h1 = jnp.maximum(txw0.reshape(TB * S, -1) + b0_ref[...], 0.0)  # (TB*S, H1)

    # --- Layer 1: the one matmul that actually needs the MXU ---------------
    h2 = jnp.maximum(
        jnp.dot(h1.astype(w1_ref.dtype), w1_ref[...],
                preferred_element_type=jnp.float32)
        + b1_ref[...], 0.0)                                      # (TB*S, H2)

    # --- Width-1 projection + ELU + CC reduction, all lane-dense -----------
    # Reduce on the (TB, S, H2) view so the per-node scalars come out as a
    # dense (TB, S) slab (batch on sublanes, nodes on lanes) instead of a
    # (TB*S, 1) column at 1/128 lane utilisation.
    proj = h2 * w2_ref[...]                                      # (TB*S, H2)
    o = jnp.sum(proj.reshape(TB, S, -1), axis=-1) + b2_ref[0, 0]  # (TB, S)
    # ELU + 1 fused into one select (exact; avoids the exp(o)-1+1 cancellation).
    o = jnp.where(o > 0.0, o + 1.0, jnp.exp(o))                  # (TB, S)

    # Clenshaw-Curtis weighted node reduction: ccw already carries the final
    # 0.5 factor and zeros on the padded nodes; one cross-lane reduce.
    z = jnp.sum(o * ccw_ref[...], axis=-1, keepdims=True)        # (TB, 1)

    # out[b,:] = z[b] * x[b,:]   (the /2 lives in ccw).
    # NOTE: with D=4 this store is lane-masked; only worth a transposed output
    # layout if B/D scale up.
    out_ref[...] = (z * x).astype(out_ref.dtype)


def monotonic_nn_forward(x, params, nb_steps=50, batch_tile=None,
                         parallel_cores=False, matmul_dtype=None,
                         vmem_limit_bytes=None):
    """Pallas TPU forward for MonotonicNN.

    x: (B, in_d) float32; params: (w0, b0, w1, b1, w2, b2) of IntegrandNN.
    batch_tile=None -> a single tile / grid=(1,) (best on single-TC v5e/v6e at
    small B).  On v7x pass batch_tile ~ ceil(B/2) with parallel_cores=True so
    both TensorCores get tiles; keep the per-tile activation slabs
    (~2 * TB * S * max(H1,H2) * 4B, lane-padded to 128) under the scoped VMEM
    limit (32 MiB default; 64 MiB physical on v7x) or raise vmem_limit_bytes.
    matmul_dtype=jnp.bfloat16 runs the MXU matmuls in bf16 with f32
    accumulation (v6e/v7x); default keeps everything f32.
    """
    B, D = x.shape
    w0, b0, w1, b1, w2, b2 = params
    H1, H2 = w0.shape[1], w1.shape[1]

    if matmul_dtype is not None:
        w0 = w0.astype(matmul_dtype)
        w1 = w1.astype(matmul_dtype)

    # --- tiling (pad the batch instead of silently collapsing to one tile) --
    TB = B if batch_tile is None else int(batch_tile)
    if TB != B:
        TB = max(8, ((TB + 7) // 8) * 8)          # (8,128) block-shape rule
    Bp = ((B + TB - 1) // TB) * TB
    x_in = x if Bp == B else jnp.concatenate(
        [x, jnp.zeros((Bp - B, D), x.dtype)], axis=0)
    n_tiles = Bp // TB

    # --- quadrature constants: compact, broadcast in-kernel ------------------
    ccw_np, t_np = compute_cc_quadrature(nb_steps)        # (S,1) each
    S = t_np.shape[0]
    t_col = jnp.asarray(t_np)                              # (S, 1)
    ccw_row = jnp.asarray(0.5 * ccw_np.T)                  # (1, S), final /2 folded

    w2_row = w2.reshape(1, H2)                             # (1, H2) VPU row
    b2_s = b2.reshape(1, 1)                                # scalar -> SMEM

    sem = (pltpu.CORE_PARALLEL,) if parallel_cores else ("arbitrary",)

    out = pl.pallas_call(
        monotonic_kernel,
        out_shape=jax.ShapeDtypeStruct((Bp, D), jnp.float32),
        grid_spec=pltpu.PrefetchScalarGridSpec(
            num_scalar_prefetch=0,
            grid=(n_tiles,),
            in_specs=[
                pl.BlockSpec((TB, D), lambda i: (i, 0)),         # x tile
                pl.BlockSpec((S, 1), lambda i: (0, 0)),          # t nodes
                pl.BlockSpec((1, S), lambda i: (0, 0)),          # 0.5 * CC weights
                pl.BlockSpec((D, H1), lambda i: (0, 0)),         # w0
                pl.BlockSpec((1, H1), lambda i: (0, 0)),         # b0
                pl.BlockSpec((H1, H2), lambda i: (0, 0)),        # w1
                pl.BlockSpec((1, H2), lambda i: (0, 0)),         # b1
                pl.BlockSpec((1, H2), lambda i: (0, 0)),         # w2 (row)
                pl.BlockSpec(memory_space=pltpu.MemorySpace.SMEM),  # b2 scalar
            ],
            out_specs=pl.BlockSpec((TB, D), lambda i: (i, 0)),
        ),
        compiler_params=pltpu.CompilerParams(
            dimension_semantics=sem,
            vmem_limit_bytes=vmem_limit_bytes),
    )(x_in, t_col, ccw_row, w0, b0, w1, b1, w2_row, b2_s)
    return out[:B]


def reference(x, params, nb_steps):
    """Pure-JAX replica of the torch forward, for validation."""
    w0, b0, w1, b1, w2, b2 = params
    ccw_np, t_np = compute_cc_quadrature(nb_steps)
    ccw = jnp.asarray(ccw_np)                                    # (S, 1), 0 on pad
    t = jnp.asarray(t_np)                                        # (S, 1)
    x0 = jnp.zeros_like(x)
    step_sizes = (x - x0) / nb_steps
    xT = x0 + nb_steps * step_sizes
    X = x0[:, None, :] + (xT - x0)[:, None, :] * t[None, :, :]   # (B, S, D)
    Xf = X.reshape(-1, x.shape[1])
    h = jnp.maximum(Xf @ w0 + b0, 0.0)
    h = jnp.maximum(h @ w1 + b1, 0.0)
    o = h @ w2 + b2
    o = jnp.where(o > 0.0, o, jnp.expm1(o)) + 1.0                # ELU + 1
    o = o.reshape(x.shape[0], -1, 1)
    z = jnp.sum(o * ccw[None, :, :], axis=1)                     # (B, 1)
    return z * (xT - x0) / 2.0


def init_params(key, in_d, hidden_layers):
    """Deterministic synthetic init for IntegrandNN (Linear chain -> 1)."""
    hs = [in_d] + hidden_layers + [1]
    keys = jax.random.split(key, 2 * (len(hs) - 1))
    params = []
    for i, (h0, h1) in enumerate(zip(hs, hs[1:])):
        bound = 1.0 / np.sqrt(h0)
        w = jax.random.uniform(keys[2 * i], (h0, h1), jnp.float32, -bound, bound)
        b = jax.random.uniform(keys[2 * i + 1], (1, h1), jnp.float32, -bound, bound)
        params += [w, b]
    return params


if __name__ == "__main__":
    in_d, hidden_layers, nb_steps = 4, [32, 32], 50
    B = 16

    key = jax.random.PRNGKey(0)
    kx, kp = jax.random.split(key)
    x = jax.random.normal(kx, (B, in_d), dtype=jnp.float32)
    params = init_params(kp, in_d, hidden_layers)

    y = monotonic_nn_forward(x, params, nb_steps)   # single tile, grid=(1,)
    y = jax.block_until_ready(y)

    y_ref = reference(x, params, nb_steps)
    np.testing.assert_allclose(np.asarray(y), np.asarray(y_ref),
                               rtol=2e-3, atol=2e-3)
    print("KERNEL_OK")
</pallas_src>

<mosaic_0001>
module attributes {stable_mosaic.version = 11 : i64} {
  func.func @monotonic_kernel(%arg0: i32, %arg1: memref<16x4xf32, #tpu.memory_space<vmem>>, %arg2: memref<56x1xf32, #tpu.memory_space<vmem>>, %arg3: memref<1x56xf32, #tpu.memory_space<vmem>>, %arg4: memref<4x32xf32, #tpu.memory_space<vmem>>, %arg5: memref<1x32xf32, #tpu.memory_space<vmem>>, %arg6: memref<32x32xf32, #tpu.memory_space<vmem>>, %arg7: memref<1x32xf32, #tpu.memory_space<vmem>>, %arg8: memref<1x32xf32, #tpu.memory_space<vmem>>, %arg9: memref<1x1xf32, #tpu.memory_space<smem>>, %arg10: memref<16x4xf32, #tpu.memory_space<vmem>>) attributes {dimension_semantics = [#tpu.dimension_semantics<arbitrary>], iteration_bounds = array<i64: 1>, scalar_prefetch = 0 : i64, scratch_operands = 0 : i64, tpu.core_type = #tpu.core_type<tc>, window_params = [{transform_indices = @transform_0, window_bounds = array<i64: 16, 4>}, {pipeline_mode = #tpu.pipeline_mode<synchronous>, transform_indices = @transform_1, window_bounds = array<i64: 56, 1>}, {pipeline_mode = #tpu.pipeline_mode<synchronous>, transform_indices = @transform_2, window_bounds = array<i64: 1, 56>}, {pipeline_mode = #tpu.pipeline_mode<synchronous>, transform_indices = @transform_3, window_bounds = array<i64: 4, 32>}, {pipeline_mode = #tpu.pipeline_mode<synchronous>, transform_indices = @transform_4, window_bounds = array<i64: 1, 32>}, {pipeline_mode = #tpu.pipeline_mode<synchronous>, transform_indices = @transform_5, window_bounds = array<i64: 32, 32>}, {pipeline_mode = #tpu.pipeline_mode<synchronous>, transform_indices = @transform_6, window_bounds = array<i64: 1, 32>}, {pipeline_mode = #tpu.pipeline_mode<synchronous>, transform_indices = @transform_7, window_bounds = array<i64: 1, 32>}, {transform_indices = @transform_8, window_bounds = array<i64: 1, 1>}, {transform_indices = @transform_9, window_bounds = array<i64: 16, 4>}]} {
    %c0 = arith.constant 0 : index
    %c0_0 = arith.constant 0 : index
    %0 = vector.load %arg1[%c0, %c0_0] : memref<16x4xf32, #tpu.memory_space<vmem>>, vector<16x4xf32>
    %c0_1 = arith.constant 0 : index
    %c0_2 = arith.constant 0 : index
    %1 = vector.load %arg4[%c0_1, %c0_2] : memref<4x32xf32, #tpu.memory_space<vmem>>, vector<4x32xf32>
    %cst = arith.constant dense<0.000000e+00> : vector<16x32xf32>
    %2 = tpu.matmul %0, %1, %cst {dimension_numbers = #tpu.dot_dimension_numbers<[1], [0], [0], [1], [0, 0, 1, 1], [], []>} : vector<16x4xf32>, vector<4x32xf32>, vector<16x32xf32> -> vector<16x32xf32>
    %3 = vector.shape_cast %2 : vector<16x32xf32> to vector<16x1x32xf32>
    %c0_3 = arith.constant 0 : index
    %c0_4 = arith.constant 0 : index
    %4 = vector.load %arg2[%c0_3, %c0_4] : memref<56x1xf32, #tpu.memory_space<vmem>>, vector<56x1xf32>
    %5 = vector.shape_cast %4 : vector<56x1xf32> to vector<1x56x1xf32>
    %6 = vector.broadcast %3 : vector<16x1x32xf32> to vector<16x56x32xf32>
    %7 = vector.broadcast %5 : vector<1x56x1xf32> to vector<16x56x32xf32>
    %8 = arith.mulf %6, %7 : vector<16x56x32xf32>
    %9 = vector.shape_cast %8 : vector<16x56x32xf32> to vector<896x32xf32>
    %c0_5 = arith.constant 0 : index
    %c0_6 = arith.constant 0 : index
    %10 = vector.load %arg5[%c0_5, %c0_6] : memref<1x32xf32, #tpu.memory_space<vmem>>, vector<1x32xf32>
    %11 = vector.broadcast %10 : vector<1x32xf32> to vector<896x32xf32>
    %12 = arith.addf %9, %11 : vector<896x32xf32>
    %cst_7 = arith.constant 0.000000e+00 : f32
    %13 = vector.broadcast %cst_7 : f32 to vector<896x32xf32>
    %14 = arith.maximumf %12, %13 : vector<896x32xf32>
    %c0_8 = arith.constant 0 : index
    %c0_9 = arith.constant 0 : index
    %15 = vector.load %arg6[%c0_8, %c0_9] : memref<32x32xf32, #tpu.memory_space<vmem>>, vector<32x32xf32>
    %cst_10 = arith.constant dense<0.000000e+00> : vector<896x32xf32>
    %16 = tpu.matmul %14, %15, %cst_10 {dimension_numbers = #tpu.dot_dimension_numbers<[1], [0], [0], [1], [0, 0, 1, 1], [], []>} : vector<896x32xf32>, vector<32x32xf32>, vector<896x32xf32> -> vector<896x32xf32>
    %c0_11 = arith.constant 0 : index
    %c0_12 = arith.constant 0 : index
    %17 = vector.load %arg7[%c0_11, %c0_12] : memref<1x32xf32, #tpu.memory_space<vmem>>, vector<1x32xf32>
    %18 = vector.broadcast %17 : vector<1x32xf32> to vector<896x32xf32>
    %19 = arith.addf %16, %18 : vector<896x32xf32>
    %cst_13 = arith.constant 0.000000e+00 : f32
    %20 = vector.broadcast %cst_13 : f32 to vector<896x32xf32>
    %21 = arith.maximumf %19, %20 : vector<896x32xf32>
    %c0_14 = arith.constant 0 : index
    %c0_15 = arith.constant 0 : index
    %22 = vector.load %arg8[%c0_14, %c0_15] : memref<1x32xf32, #tpu.memory_space<vmem>>, vector<1x32xf32>
    %23 = vector.broadcast %22 : vector<1x32xf32> to vector<896x32xf32>
    %24 = arith.mulf %21, %23 : vector<896x32xf32>
    %25 = vector.shape_cast %24 : vector<896x32xf32> to vector<16x56x32xf32>
    %cst_16 = arith.constant dense<0.000000e+00> : vector<16x56xf32>
    %26 = vector.multi_reduction <add>, %25, %cst_16 [2] : vector<16x56x32xf32> to vector<16x56xf32>
    %c0_17 = arith.constant 0 : index
    %c0_18 = arith.constant 0 : index
    %27 = memref.load %arg9[%c0_17, %c0_18] : memref<1x1xf32, #tpu.memory_space<smem>>
    %28 = vector.broadcast %27 : f32 to vector<16x56xf32>
    %29 = arith.addf %26, %28 : vector<16x56xf32>
    %cst_19 = arith.constant 0.000000e+00 : f32
    %30 = vector.broadcast %cst_19 : f32 to vector<16x56xf32>
    %31 = arith.cmpf ogt, %29, %30 : vector<16x56xf32>
    %cst_20 = arith.constant 1.000000e+00 : f32
    %32 = vector.broadcast %cst_20 : f32 to vector<16x56xf32>
    %33 = arith.addf %29, %32 : vector<16x56xf32>
    %34 = math.exp %29 : vector<16x56xf32>
    %35 = arith.select %31, %33, %34 : vector<16x56xi1>, vector<16x56xf32>
    %c0_21 = arith.constant 0 : index
    %c0_22 = arith.constant 0 : index
    %36 = vector.load %arg3[%c0_21, %c0_22] : memref<1x56xf32, #tpu.memory_space<vmem>>, vector<1x56xf32>
    %37 = vector.broadcast %36 : vector<1x56xf32> to vector<16x56xf32>
    %38 = arith.mulf %35, %37 : vector<16x56xf32>
    %cst_23 = arith.constant dense<0.000000e+00> : vector<16xf32>
    %39 = vector.multi_reduction <add>, %38, %cst_23 [1] : vector<16x56xf32> to vector<16xf32>
    %40 = vector.shape_cast %39 : vector<16xf32> to vector<16x1xf32>
    %41 = vector.broadcast %40 : vector<16x1xf32> to vector<16x4xf32>
    %42 = arith.mulf %41, %0 : vector<16x4xf32>
    %c0_24 = arith.constant 0 : index
    %c0_25 = arith.constant 0 : index
    %43 = vector.load %arg10[%c0_24, %c0_25] : memref<16x4xf32, #tpu.memory_space<vmem>>, vector<16x4xf32>
    tpu.vector_store %arg10[%c0_24, %c0_25], %42 {strides = array<i32>} : memref<16x4xf32, #tpu.memory_space<vmem>>, vector<16x4xf32>,
    return
  }
  func.func @transform_0(%arg0: i32) -> (i32, i32) {
    %c0_i32 = arith.constant 0 : i32
    %c0_i32_0 = arith.constant 0 : i32
    return %arg0, %c0_i32 : i32, i32
  }
  func.func @transform_1(%arg0: i32) -> (i32, i32) {
    %c0_i32 = arith.constant 0 : i32
    %c0_i32_0 = arith.constant 0 : i32
    %c0_i32_1 = arith.constant 0 : i32
    return %c0_i32, %c0_i32_0 : i32, i32
  }
  func.func @transform_2(%arg0: i32) -> (i32, i32) {
    %c0_i32 = arith.constant 0 : i32
    %c0_i32_0 = arith.constant 0 : i32
    %c0_i32_1 = arith.constant 0 : i32
    return %c0_i32, %c0_i32_0 : i32, i32
  }
  func.func @transform_3(%arg0: i32) -> (i32, i32) {
    %c0_i32 = arith.constant 0 : i32
    %c0_i32_0 = arith.constant 0 : i32
    %c0_i32_1 = arith.constant 0 : i32
    return %c0_i32, %c0_i32_0 : i32, i32
  }
  func.func @transform_4(%arg0: i32) -> (i32, i32) {
    %c0_i32 = arith.constant 0 : i32
    %c0_i32_0 = arith.constant 0 : i32
    %c0_i32_1 = arith.constant 0 : i32
    return %c0_i32, %c0_i32_0 : i32, i32
  }
  func.func @transform_5(%arg0: i32) -> (i32, i32) {
    %c0_i32 = arith.constant 0 : i32
    %c0_i32_0 = arith.constant 0 : i32
    %c0_i32_1 = arith.constant 0 : i32
    return %c0_i32, %c0_i32_0 : i32, i32
  }
  func.func @transform_6(%arg0: i32) -> (i32, i32) {
    %c0_i32 = arith.constant 0 : i32
    %c0_i32_0 = arith.constant 0 : i32
    %c0_i32_1 = arith.constant 0 : i32
    return %c0_i32, %c0_i32_0 : i32, i32
  }
  func.func @transform_7(%arg0: i32) -> (i32, i32) {
    %c0_i32 = arith.constant 0 : i32
    %c0_i32_0 = arith.constant 0 : i32
    %c0_i32_1 = arith.constant 0 : i32
    return %c0_i32, %c0_i32_0 : i32, i32
  }
  func.func @transform_8(%arg0: i32) -> (i32, i32) {
    %c0_i32 = arith.constant 0 : i32
    %c0_i32_0 = arith.constant 0 : i32
    %c0_i32_1 = arith.constant 0 : i32
    return %c0_i32, %c0_i32_0 : i32, i32
  }
  func.func @transform_9(%arg0: i32) -> (i32, i32) {
    %c0_i32 = arith.constant 0 : i32
    %c0_i32_0 = arith.constant 0 : i32
    return %arg0, %c0_i32 : i32, i32
  }
}

</mosaic_0001>

<bundles_post_ra>
// kernel: tpu_custom_call.1
= control target key start
LH: loop header
LB: loop body
LE: loop exit
PB: predicated region body
PF: predicated region fallthrough
CT: control target
= control target key end

     0   :  { %vm43_vm0 = vcmask 1043456   ;;  %vm36_vm1 = vcmask 31744   ;;  %v4760_v3 = vmov 0   ;;  %v4761_v17 = vmov 1966171168   ;;  %s7667_s3 = inlined_call_operand.vmem [shape: f32[4,32], index: 3, kind: input, shape index: {}]   ;;  %s7668_s0 = inlined_call_operand.vmem [shape: f32[16,4], index: 0, kind: input, shape index: {}]   ;;  %s7669_s1 = inlined_call_operand.vmem [shape: f32[56,1], index: 1, kind: input, shape index: {}]   ;;  %s7670_s5 = inlined_call_operand.vmem [shape: f32[32,32], index: 5, kind: input, shape index: {}]   ;;  %s7671_s2 = inlined_call_operand.vmem [shape: f32[1,56], index: 2, kind: input, shape index: {}]   ;;  %s7672_s4 = inlined_call_operand.vmem [shape: f32[1,32], index: 4, kind: input, shape index: {}]   ;;  %s7673_s6 = inlined_call_operand.vmem [shape: f32[1,32], index: 6, kind: input, shape index: {}]   ;;  %s7674_s7 = inlined_call_operand.vmem [shape: f32[1,32], index: 7, kind: input, shape index: {}]   ;;  %s7675_s8 = inlined_call_operand.<no memory space> [shape: f32[1,1], index: 8, kind: input, shape index: {}]   ;;  %s7676_s9 = inlined_call_operand.vmem [shape: f32[16,4], index: 9, kind: output, shape index: {}]  }
   0x1   :  { %v35_v0 = vld [vmem:[%s7667_s3] sm:$0xf]  ;;  %v34_v2 = vld [vmem:[%s7668_s0 + $0x8] sm:$0xff]  ;;  %4530 = vset.pattern.permute.xlu0 %v4760_v3  ;;  %4531 = vset.pattern.permute.xlu1 %v4760_v3  ;;  %v224_v5 = vld [vmem:[%s7669_s1 + $0x10] sm:$0xff]  ;;  %v126_v18 = vunpack.c.l.s4 %v4761_v17  ;;  %v7677_v19 = vlaneseq  ;;  %vm698_vm2 = vcmask 261120  }
   0x2   :  { %v33_v1 = vld [vmem:[%s7668_s0] sm:$0xff]  ;;  %4335 = vmatprep.subr.msk.mxu0 %vm43_vm0, %v35_v0  ;;  %v223_v6 = vld [vmem:[%s7669_s1 + $0x8] sm:$0xff]  ;;  %321 = vperm.xlu1 %4531, %v224_v5   ;;  %v225_v7 = vld [vmem:[%s7669_s1 + $0x18] sm:$0xff] }
   0x3   :  { %4337 = vmatprep.mubr.msk.f32.mxu0 %vm36_vm1, %v33_v1  ;;  %v222_v4 = vld [vmem:[%s7669_s1] sm:$0xff]  ;;  %4336 = vmatpush3.msk.msra.mxu0 %vm43_vm0, %v35_v0  ;;  %v227_v9 = vld [vmem:[%s7669_s1 + $0x28] sm:$0xff]  ;;  %v228_v10 = vld [vmem:[%s7669_s1 + $0x30] sm:$0xff]  ;;  %v127_v20 = vunpack.c.0.s8 %v126_v18  ;;  %v4857_v21 = vshrl.u32 %v7677_v19, 7 }
   0x4   :  { %311 = vperm.xlu0 %4530, %v222_v4   ;;  %4338 = vmatmul.mubr.msk.f32.vlgmr.msra.gmra.mrb[0].mxu0 %vm36_vm1, %v34_v2  ;;  %v226_v8 = vld [vmem:[%s7669_s1 + $0x20] sm:$0xff]  ;;  %v688_v12 = vld [vmem:[%s7670_s5 + $0x8] sm:$0xff]  ;;  %v689_v14 = vld [vmem:[%s7670_s5 + $0x10] sm:$0xff] }
   0x5   :  { %v687_v11 = vld [vmem:[%s7670_s5] sm:$0xff]  ;;  %v690_v15 = vld [vmem:[%s7670_s5 + $0x18] sm:$0xff]  ;;  %7685 = vst [vmem:[#allocation3_spill] sm:$0xff] %v4857_v21  ;;  %v130_v23 = vsub.s32 %v127_v20, %v4857_v21  ;;  %v4869_v36 = vsub.s32 0, %v4857_v21 }
   0x6   :  { %326 = vperm.xlu1 %4531, %v225_v7   ;;  %v4516_v13 = vpack.c.bf16 %v688_v12, %v687_v11  ;;  %v4520_v16 = vpack.c.bf16 %v690_v15, %v689_v14  ;;  %v4880_v41 = vld [vmem:[%s7671_s2] ss:$0 sm:$0xff] }
   0x7   :  { %v4922_v61 = vld [vmem:[%s7672_s4] ss:$0 sm:$0xff] }
   0x8   :  { %316 = vperm.xlu0 %4530, %v223_v6   ;;  %4517 = vmatprep.subr.bf16.mxu0 %v4516_v13 }
   0x9   :  { %4524 = vmatprep.subr.bf16.mxu1 %v4516_v13  ;;  %4519 = vmatpush3.bf16.msra.mxu0 %v4516_v13 }
   0xa   :  { %336 = vperm.xlu1 %4531, %v227_v9   ;;  %4526 = vmatpush3.bf16.msra.mxu1 %v4516_v13 }
   0xb   :  { %4521 = vmatprep.subr.bf16.mxu0 %v4520_v16  ;;  %4525 = vmatprep.subr.bf16.mxu1 %v4520_v16 }
   0xc   :  { %331 = vperm.xlu0 %4530, %v226_v8  }
   0xd   :  { %4523 = vmatpush3.bf16.msra.mxu0 %v4520_v16 }
   0xe   :  { %4527 = vmatpush3.bf16.msra.mxu1 %v4520_v16  ;;  %2912 = vbcast.lane.b32.xlu1 %v4880_v41, 264 }
  0x10   :  { %341 = vperm.xlu0 %4530, %v228_v10  }
  0x12   :  { %2916 = vbcast.lane.b32.xlu1 %v4880_v41, 272 }
  0x14   :  { %2908 = vbcast.lane.b32.xlu0 %v4880_v41, 256 }
  0x16   :  { %2924 = vbcast.lane.b32.xlu1 %v4880_v41, 288 }
  0x18   :  { %2920 = vbcast.lane.b32.xlu0 %v4880_v41, 280 }
  0x1a   :  { %2932 = vbcast.lane.b32.xlu1 %v4880_v41, 304 }
  0x1c   :  { %2928 = vbcast.lane.b32.xlu0 %v4880_v41, 296 }
  0x81   :  { %v4862_v24 = vpop.permute.xlu1 %321 }
  0x83   :  { %v4859_v22 = vpop.permute.xlu0 %311 }
  0x85   :  { %v4886_v45 = vpop.permute.xlu1 %326 }
  0x87   :  { %v4864_v26 = vpop.permute.xlu0 %316 }
  0x89   :  { %v4927_v63 = vpop.permute.xlu1 %336 }
  0x8b   :  { %v4882_v42 = vpop.permute.xlu0 %331 }
  0x8f   :  { %v4925_v62 = vpop.permute.xlu0 %341 }
  0xd7   :  { %v4339_v25 = vpop.f32.mrb[0].mxu0 }
  0xd8   :  { %v173_v27 = vcombine.high %v4339_v25, %v4339_v25  ;;  %v113_v28 = vpop.f32.mrb[1].mxu0  ;;  %v180_v29 = vrot.slane %v4339_v25, %v130_v23 }
  0xd9   :  { %v124_v30 = vcombine.high %v113_v28, %v113_v28  ;;  %v131_v31 = vrot.slane %v113_v28, %v130_v23 }
  0xda   :  { %v187_v32 = vrot.slane %v173_v27, %v130_v23  ;;  %v4871_v37 = vrot.slane %v180_v29, %v130_v23  ;;  %v188_v55 = vcombine.high %v180_v29, %v180_v29 }
  0xdb   :  { %v138_v33 = vrot.slane %v124_v30, %v130_v23  ;;  %v4873_v39 = vrot.slane %v131_v31, %v130_v23  ;;  %v139_v46 = vcombine.high %v131_v31, %v131_v31 }
  0xdc   :  { %v189_v34 = vcombine.high %v187_v32, %v187_v32  ;;  %v4866_v35 = vrot.slane %v187_v32, %v130_v23  ;;  %v4898_v51 = vrot.slane %v4871_v37, %v4869_v36  ;;  %v4944_v11 = vrot.slane %v188_v55, %v130_v23 }
  0xdd   :  { %v140_v38 = vcombine.high %v138_v33, %v138_v33  ;;  %v4875_v40 = vrot.slane %v138_v33, %v130_v23  ;;  %v232_v54 = vrot.slane %v4873_v39, %v4869_v36  ;;  %v4908_v57 = vrot.slane %v139_v46, %v130_v23 }
  0xde   :  { %v217_v43 = vrot.slane %v189_v34, %v130_v23  ;;  %v219_v44 = vcombine.high %v4866_v35, %v4866_v35  ;;  %v400_v7 = vmul.f32 %v4859_v22, %v4898_v51  ;;  %v401_v30 = vmul.f32 %v4864_v26, %v4898_v51 }
  0xdf   :  { %v168_v47 = vrot.slane %v140_v38, %v130_v23  ;;  %v170_v52 = vcombine.high %v4875_v40, %v4875_v40  ;;  %v344_v0 = vmul.f32 %v4859_v22, %v232_v54  ;;  %v345_v1 = vmul.f32 %v4864_v26, %v232_v54 }
  0xe0   :  { %v221_v48 = vcombine.high %v217_v43, %v217_v43  ;;  %v4891_v49 = vrot.slane %v217_v43, %v4869_v36  ;;  %v4894_v50 = vrot.slane %v219_v44, %v4869_v36  ;;  %v346_v2 = vmul.f32 %v4862_v24, %v232_v54 }
  0xe1   :  { %v172_v53 = vcombine.high %v168_v47, %v168_v47  ;;  %v4911_v58 = vrot.slane %v168_v47, %v4869_v36  ;;  %v4914_v59 = vrot.slane %v170_v52, %v4869_v36  ;;  %v347_v3 = vmul.f32 %v4886_v45, %v232_v54 }
  0xe2   :  { %v4905_v56 = vrot.slane %v221_v48, %v4869_v36  ;;  %v348_v4 = vmul.f32 %v4882_v42, %v232_v54  ;;  %v463_v8 = vadd.f32 %v4922_v61, %v344_v0  ;;  %v464_v9 = vadd.f32 %v4922_v61, %v345_v1 }
  0xe3   :  { %v4917_v60 = vrot.slane %v172_v53, %v4869_v36  ;;  %v465_v10 = vadd.f32 %v4922_v61, %v346_v2  ;;  %v519_v14 = vadd.f32 %v4922_v61, %v400_v7  ;;  %v4952_v15 = vrot.slane %v4908_v57, %v4869_v36 }
  0xe4   :  { %v575_v16 = vmax.f32 %v463_v8, 0.0  ;;  %v576_v17 = vmax.f32 %v464_v9, 0.0  ;;  %v466_v18 = vadd.f32 %v4922_v61, %v347_v3  ;;  %v467_v23 = vadd.f32 %v4922_v61, %v348_v4 }
  0xe5   :  { %v398_v5 = vmul.f32 %v4927_v63, %v4917_v60  ;;  %v399_v6 = vmul.f32 %v4925_v62, %v4917_v60  ;;  %v577_v20 = vmax.f32 %v465_v10, 0.0  ;;  %v349_v28 = vmul.f32 %v4927_v63, %v232_v54 }
  0xe6   :  { %4348 = vmatprep.mubr.msk.f32.mxu0 %vm698_vm2, %v575_v16  ;;  %v350_v29 = vmul.f32 %v4925_v62, %v232_v54  ;;  %v402_v31 = vmul.f32 %v4862_v24, %v4898_v51  ;;  %v4965_v32 = vrot.slane %v4944_v11, %v4869_v36  ;;  %v631_v33 = vmax.f32 %v519_v14, 0.0 }
  0xe7   :  { %v517_v12 = vadd.f32 %v4922_v61, %v398_v5  ;;  %v518_v13 = vadd.f32 %v4922_v61, %v399_v6  ;;  %4349 = vmatmul.mubr.msk.f32.vlgmr.msra.gmra.mrb[2].mxu0 %vm698_vm2, %v576_v17  ;;  %v403_v34 = vmul.f32 %v4886_v45, %v4898_v51  ;;  %v520_v38 = vadd.f32 %v4922_v61, %v401_v30 }
  0xe8   :  { %4351 = vmatprep.mubr.msk.f32.mxu0 %vm698_vm2, %v577_v20  ;;  %v351_v43 = vmul.f32 %v4859_v22, %v4952_v15  ;;  %v352_v44 = vmul.f32 %v4864_v26, %v4952_v15  ;;  %v578_v46 = vmax.f32 %v466_v18, 0.0  ;;  %v579_v47 = vmax.f32 %v467_v23, 0.0 }
  0xe9   :  { %v629_v25 = vmax.f32 %v517_v12, 0.0  ;;  %v630_v27 = vmax.f32 %v518_v13, 0.0  ;;  %v468_v48 = vadd.f32 %v4922_v61, %v349_v28  ;;  %v521_v52 = vadd.f32 %v4922_v61, %v402_v31 }
  0xea   :  { %v469_v53 = vadd.f32 %v4922_v61, %v350_v29  ;;  %v632_v54 = vmax.f32 %v520_v38, 0.0  ;;  %v522_v55 = vadd.f32 %v4922_v61, %v403_v34  ;;  %v404_v0 = vmul.f32 %v4882_v42, %v4898_v51 }
  0xeb   :  { %4429 = vmatprep.mubr.msk.f32.mxu1 %vm698_vm2, %v629_v25  ;;  %v169_v1 = vcombine.high %v4873_v39, %v4873_v39  ;;  %4352 = vmatmul.mubr.msk.f32.gmra.mrb[4].mxu0 %vm698_vm2, %v578_v46  ;;  %v633_v2 = vmax.f32 %v521_v52, 0.0  ;;  %v470_v3 = vadd.f32 %v4922_v61, %v351_v43  ;;  %v471_v4 = vadd.f32 %v4922_v61, %v352_v44 }
  0xec   :  { %4430 = vmatmul.mubr.msk.f32.vlgmr.msra.gmra.mrb[0].mxu1 %vm698_vm2, %v630_v27  ;;  %4354 = vmatprep.mubr.msk.f32.mxu0 %vm698_vm2, %v579_v47  ;;  %v523_v5 = vadd.f32 %v4922_v61, %v404_v0  ;;  %v580_v6 = vmax.f32 %v468_v48, 0.0  ;;  %v353_v41 = vmul.f32 %v4862_v24, %v4952_v15  ;;  %v405_v39 = vmul.f32 %v4927_v63, %v4898_v51 }
  0xed   :  { %4432 = vmatprep.mubr.msk.f32.mxu1 %vm698_vm2, %v631_v33  ;;  %v406_v7 = vmul.f32 %v4925_v62, %v4898_v51  ;;  %v581_v8 = vmax.f32 %v469_v53, 0.0  ;;  %v634_v9 = vmax.f32 %v522_v55, 0.0  ;;  %v354_v10 = vmul.f32 %v4886_v45, %v4952_v15 }
  0xee   :  { %v407_v12 = vmul.f32 %v4859_v22, %v4965_v32  ;;  %v635_v13 = vmax.f32 %v523_v5, 0.0  ;;  %v524_v14 = vadd.f32 %v4922_v61, %v405_v39  ;;  %v218_v17 = vcombine.high %v4871_v37, %v4871_v37 }
  0xef   :  { %4355 = vmatmul.mubr.msk.f32.gmra.mrb[6].mxu0 %vm698_vm2, %v580_v6  ;;  %v525_v16 = vadd.f32 %v4922_v61, %v406_v7  ;;  %v355_v51 = vmul.f32 %v4882_v42, %v4952_v15  ;;  %v408_v18 = vmul.f32 %v4864_v26, %v4965_v32  ;;  %v5017_v20 = vrot.slane %v169_v1, %v4869_v36 }
  0xf0   :  { %4433 = vmatmul.mubr.msk.f32.gmra.mrb[2].mxu1 %vm698_vm2, %v632_v54  ;;  %4357 = vmatprep.mubr.msk.f32.mxu0 %vm698_vm2, %v581_v8  ;;  %v582_v23 = vmax.f32 %v470_v3, 0.0  ;;  %v472_v25 = vadd.f32 %v4922_v61, %v353_v41  ;;  %v356_v37 = vmul.f32 %v4927_v63, %v4952_v15  ;;  %v583_v27 = vmax.f32 %v471_v4, 0.0 }
  0xf1   :  { %4435 = vmatprep.mubr.msk.f32.mxu1 %vm698_vm2, %v633_v2  ;;  %v473_v28 = vadd.f32 %v4922_v61, %v354_v10  ;;  %v636_v29 = vmax.f32 %v524_v14, 0.0  ;;  %v526_v30 = vadd.f32 %v4922_v61, %v407_v12  ;;  %v637_v31 = vmax.f32 %v525_v16, 0.0 }
  0xf2   :  { %v527_v33 = vadd.f32 %v4922_v61, %v408_v18  ;;  %v409_v34 = vmul.f32 %v4862_v24, %v4965_v32  ;;  %v410_v38 = vmul.f32 %v4886_v45, %v4965_v32  ;;  %v474_v43 = vadd.f32 %v4922_v61, %v355_v51 }
  0xf3   :  { %4358 = vmatmul.mubr.msk.f32.gmra.mrb[8].mxu0 %vm698_vm2, %v582_v23  ;;  %v584_v44 = vmax.f32 %v472_v25, 0.0  ;;  %v475_v46 = vadd.f32 %v4922_v61, %v356_v37  ;;  %v357_v47 = vmul.f32 %v4925_v62, %v4952_v15  ;;  %v358_v48 = vmul.f32 %v4859_v22, %v5017_v20 }
  0xf4   :  { %4436 = vmatmul.mubr.msk.f32.gmra.mrb[4].mxu1 %vm698_vm2, %v634_v9  ;;  %4360 = vmatprep.mubr.msk.f32.mxu0 %vm698_vm2, %v583_v27  ;;  %v585_v52 = vmax.f32 %v473_v28, 0.0  ;;  %v638_v53 = vmax.f32 %v526_v30, 0.0  ;;  %v528_v54 = vadd.f32 %v4922_v61, %v409_v34  ;;  %v411_v55 = vmul.f32 %v4882_v42, %v4965_v32 }
  0xf5   :  { %4438 = vmatprep.mubr.msk.f32.mxu1 %vm698_vm2, %v635_v13  ;;  %v5044_v0 = vrot.slane %v218_v17, %v4869_v36  ;;  %v639_v1 = vmax.f32 %v527_v33, 0.0  ;;  %v529_v2 = vadd.f32 %v4922_v61, %v410_v38  ;;  %v412_v15 = vmul.f32 %v4927_v63, %v4965_v32 }
  0xf6   :  { %v359_v3 = vmul.f32 %v4864_v26, %v5017_v20  ;;  %v586_v4 = vmax.f32 %v474_v43, 0.0  ;;  %v476_v5 = vadd.f32 %v4922_v61, %v357_v47  ;;  %v477_v6 = vadd.f32 %v4922_v61, %v358_v48 }
  0xf7   :  { %4361 = vmatmul.mubr.msk.f32.gmra.mrb[10].mxu0 %vm698_vm2, %v584_v44  ;;  %v360_v41 = vmul.f32 %v4862_v24, %v5017_v20  ;;  %v587_v39 = vmax.f32 %v475_v46, 0.0  ;;  %v640_v7 = vmax.f32 %v528_v54, 0.0  ;;  %v530_v8 = vadd.f32 %v4922_v61, %v411_v55 }
  0xf8   :  { %4439 = vmatmul.mubr.msk.f32.gmra.mrb[6].mxu1 %vm698_vm2, %v636_v29  ;;  %4363 = vmatprep.mubr.msk.f32.mxu0 %vm698_vm2, %v585_v52  ;;  %v413_v9 = vmul.f32 %v4925_v62, %v4965_v32  ;;  %v641_v10 = vmax.f32 %v529_v2, 0.0  ;;  %v531_v12 = vadd.f32 %v4922_v61, %v412_v15  ;;  %v414_v13 = vmul.f32 %v4859_v22, %v5044_v0 }
  0xf9   :  { %4441 = vmatprep.mubr.msk.f32.mxu1 %vm698_vm2, %v637_v31  ;;  %v171_v14 = vcombine.high %v4908_v57, %v4908_v57  ;;  %v478_v16 = vadd.f32 %v4922_v61, %v359_v3  ;;  %v588_v17 = vmax.f32 %v476_v5, 0.0  ;;  %v589_v51 = vmax.f32 %v477_v6, 0.0 }
  0xfa   :  { %v479_v32 = vadd.f32 %v4922_v61, %v360_v41  ;;  %v361_v18 = vmul.f32 %v4886_v45, %v5017_v20  ;;  %v642_v23 = vmax.f32 %v530_v8, 0.0  ;;  %v362_v25 = vmul.f32 %v4882_v42, %v5017_v20 }
  0xfb   :  { %4364 = vmatmul.mubr.msk.f32.gmra.mrb[12].mxu0 %vm698_vm2, %v586_v4  ;;  %v532_v57 = vadd.f32 %v4922_v61, %v413_v9  ;;  %v415_v37 = vmul.f32 %v4864_v26, %v5044_v0  ;;  %v643_v27 = vmax.f32 %v531_v12, 0.0  ;;  %v533_v28 = vadd.f32 %v4922_v61, %v414_v13 }
  0xfc   :  { %4442 = vmatmul.mubr.msk.f32.gmra.mrb[8].mxu1 %vm698_vm2, %v638_v53  ;;  %4366 = vmatprep.mubr.msk.f32.mxu0 %vm698_vm2, %v587_v39  ;;  %v416_v29 = vmul.f32 %v4862_v24, %v5044_v0  ;;  %v220_v30 = vcombine.high %v4944_v11, %v4944_v11  ;;  %v5087_v31 = vrot.slane %v171_v14, %v4869_v36  ;;  %v590_v34 = vmax.f32 %v478_v16, 0.0 }
  0xfd   :  { %4444 = vmatprep.mubr.msk.f32.mxu1 %vm698_vm2, %v639_v1  ;;  %v363_v33 = vmul.f32 %v4927_v63, %v5017_v20  ;;  %v591_v38 = vmax.f32 %v479_v32, 0.0  ;;  %v480_v43 = vadd.f32 %v4922_v61, %v361_v18  ;;  %v364_v44 = vmul.f32 %v4925_v62, %v5017_v20 }
  0xfe   :  { %v481_v11 = vadd.f32 %v4922_v61, %v362_v25  ;;  %v644_v46 = vmax.f32 %v532_v57, 0.0  ;;  %v534_v47 = vadd.f32 %v4922_v61, %v415_v37  ;;  %v417_v48 = vmul.f32 %v4886_v45, %v5044_v0 }
  0xff   :  { %4367 = vmatmul.mubr.msk.f32.gmra.mrb[14].mxu0 %vm698_vm2, %v588_v17  ;;  %v645_v52 = vmax.f32 %v533_v28, 0.0  ;;  %v535_v53 = vadd.f32 %v4922_v61, %v416_v29  ;;  %v418_v54 = vmul.f32 %v4882_v42, %v5044_v0  ;;  %v5106_v55 = vrot.slane %v220_v30, %v4869_v36 }
 0x100   :  { %4445 = vmatmul.mubr.msk.f32.gmra.mrb[10].mxu1 %vm698_vm2, %v640_v7  ;;  %4369 = vmatprep.mubr.msk.f32.mxu0 %vm698_vm2, %v589_v51  ;;  %v482_v20 = vadd.f32 %v4922_v61, %v363_v33  ;;  %v592_v1 = vmax.f32 %v480_v43, 0.0  ;;  %v483_v2 = vadd.f32 %v4922_v61, %v364_v44  ;;  %v365_v15 = vmul.f32 %v4859_v22, %v5087_v31 }
 0x101   :  { %4447 = vmatprep.mubr.msk.f32.mxu1 %vm698_vm2, %v641_v10  ;;  %v366_v3 = vmul.f32 %v4864_v26, %v5087_v31  ;;  %v593_v4 = vmax.f32 %v481_v11, 0.0  ;;  %v646_v5 = vmax.f32 %v534_v47, 0.0  ;;  %v536_v6 = vadd.f32 %v4922_v61, %v417_v48 }
 0x102   :  { %v419_v41 = vmul.f32 %v4927_v63, %v5044_v0  ;;  %v647_v39 = vmax.f32 %v535_v53, 0.0  ;;  %v537_v7 = vadd.f32 %v4922_v61, %v418_v54  ;;  %v420_v8 = vmul.f32 %v4925_v62, %v5044_v0 }
 0x103   :  { %4370 = vmatmul.mubr.msk.f32.gmra.mrb[16].mxu0 %vm698_vm2, %v590_v34  ;;  %v367_v9 = vmul.f32 %v4862_v24, %v5087_v31  ;;  %v594_v10 = vmax.f32 %v482_v20, 0.0  ;;  %v484_v12 = vadd.f32 %v4922_v61, %v365_v15  ;;  %v485_v13 = vadd.f32 %v4922_v61, %v366_v3 }
 0x104   :  { %4448 = vmatmul.mubr.msk.f32.gmra.mrb[12].mxu1 %vm698_vm2, %v642_v23  ;;  %4372 = vmatprep.mubr.msk.f32.mxu0 %vm698_vm2, %v591_v38  ;;  %v368_v14 = vmul.f32 %v4886_v45, %v5087_v31  ;;  %v595_v16 = vmax.f32 %v483_v2, 0.0  ;;  %v648_v17 = vmax.f32 %v536_v6, 0.0  ;;  %v538_v0 = vadd.f32 %v4922_v61, %v419_v41 }
 0x105   :  { %4450 = vmatprep.mubr.msk.f32.mxu1 %vm698_vm2, %v643_v27  ;;  %v421_v51 = vmul.f32 %v4859_v22, %v5106_v55  ;;  %v649_v32 = vmax.f32 %v537_v7, 0.0  ;;  %v539_v18 = vadd.f32 %v4922_v61, %v420_v8  ;;  %v422_v23 = vmul.f32 %v4864_v26, %v5106_v55 }
 0x106   :  { %v5142_v25 = vrot.slane %v4875_v40, %v4869_v36  ;;  %v486_v57 = vadd.f32 %v4922_v61, %v367_v9  ;;  %v596_v37 = vmax.f32 %v484_v12, 0.0  ;;  %v597_v27 = vmax.f32 %v485_v13, 0.0 }
 0x107   :  { %4373 = vmatmul.mubr.msk.f32.gmra.mrb[18].mxu0 %vm698_vm2, %v592_v1  ;;  %v487_v28 = vadd.f32 %v4922_v61, %v368_v14  ;;  %v369_v29 = vmul.f32 %v4882_v42, %v5087_v31  ;;  %v650_v30 = vmax.f32 %v538_v0, 0.0  ;;  %v370_v40 = vmul.f32 %v4927_v63, %v5087_v31 }
 0x108   :  { %4451 = vmatmul.mubr.msk.f32.gmra.mrb[14].mxu1 %vm698_vm2, %v644_v46  ;;  %4375 = vmatprep.mubr.msk.f32.mxu0 %vm698_vm2, %v593_v4  ;;  %v540_v33 = vadd.f32 %v4922_v61, %v421_v51  ;;  %v423_v34 = vmul.f32 %v4862_v24, %v5106_v55  ;;  %v651_v38 = vmax.f32 %v539_v18, 0.0  ;;  %v541_v43 = vadd.f32 %v4922_v61, %v422_v23 }
 0x109   :  { %4453 = vmatprep.mubr.msk.f32.mxu1 %vm698_vm2, %v645_v52  ;;  %v424_v44 = vmul.f32 %v4886_v45, %v5106_v55  ;;  %v371_v11 = vmul.f32 %v4925_v62, %v5087_v31  ;;  %v598_v46 = vmax.f32 %v486_v57, 0.0  ;;  %v599_v47 = vmax.f32 %v487_v28, 0.0 }
 0x10a   :  { %v488_v48 = vadd.f32 %v4922_v61, %v369_v29  ;;  %v372_v52 = vmul.f32 %v4859_v22, %v5142_v25  ;;  %v489_v53 = vadd.f32 %v4922_v61, %v370_v40  ;;  %v652_v54 = vmax.f32 %v540_v33, 0.0 }
 0x10b   :  { %4376 = vmatmul.mubr.msk.f32.gmra.mrb[20].mxu0 %vm698_vm2, %v594_v10  ;;  %v542_v20 = vadd.f32 %v4922_v61, %v423_v34  ;;  %v425_v1 = vmul.f32 %v4882_v42, %v5106_v55  ;;  %v5174_v31 = vrot.slane %v4866_v35, %v4869_v36  ;;  %v653_v2 = vmax.f32 %v541_v43, 0.0 }
 0x10c   :  { %4454 = vmatmul.mubr.msk.f32.gmra.mrb[16].mxu1 %vm698_vm2, %v646_v5  ;;  %4378 = vmatprep.mubr.msk.f32.mxu0 %vm698_vm2, %v595_v16  ;;  %v543_v15 = vadd.f32 %v4922_v61, %v424_v44  ;;  %v426_v3 = vmul.f32 %v4927_v63, %v5106_v55  ;;  %v490_v4 = vadd.f32 %v4922_v61, %v371_v11  ;;  %v600_v5 = vmax.f32 %v488_v48, 0.0 }
 0x10d   :  { %4456 = vmatprep.mubr.msk.f32.mxu1 %vm698_vm2, %v647_v39  ;;  %v491_v35 = vadd.f32 %v4922_v61, %v372_v52  ;;  %v373_v36 = vmul.f32 %v4864_v26, %v5142_v25  ;;  %v374_v6 = vmul.f32 %v4862_v24, %v5142_v25  ;;  %v601_v41 = vmax.f32 %v489_v53, 0.0 }
 0x10e   :  { %v654_v39 = vmax.f32 %v542_v20, 0.0  ;;  %v544_v7 = vadd.f32 %v4922_v61, %v425_v1  ;;  %v427_v8 = vmul.f32 %v4925_v62, %v5106_v55  ;;  %v655_v9 = vmax.f32 %v543_v15, 0.0 }
 0x10f   :  { %4379 = vmatmul.mubr.msk.f32.gmra.mrb[22].mxu0 %vm698_vm2, %v596_v37  ;;  %v545_v10 = vadd.f32 %v4922_v61, %v426_v3  ;;  %v428_v12 = vmul.f32 %v4859_v22, %v5174_v31  ;;  %v375_v13 = vmul.f32 %v4886_v45, %v5142_v25  ;;  %v602_v14 = vmax.f32 %v490_v4, 0.0 }
 0x110   :  { %4457 = vmatmul.mubr.msk.f32.gmra.mrb[18].mxu1 %vm698_vm2, %v648_v17  ;;  %4381 = vmatprep.mubr.msk.f32.mxu0 %vm698_vm2, %v597_v27  ;;  %v492_v55 = vadd.f32 %v4922_v61, %v373_v36  ;;  %v493_v16 = vadd.f32 %v4922_v61, %v374_v6  ;;  %v376_v17 = vmul.f32 %v4882_v42, %v5142_v25  ;;  %v603_v0 = vmax.f32 %v491_v35, 0.0 }
 0x111   :  { %4459 = vmatprep.mubr.msk.f32.mxu1 %vm698_vm2, %v649_v32  ;;  %v656_v51 = vmax.f32 %v544_v7, 0.0  ;;  %v546_v32 = vadd.f32 %v4922_v61, %v427_v8  ;;  %v429_v18 = vmul.f32 %v4864_v26, %v5174_v31  ;;  %v657_v23 = vmax.f32 %v545_v10, 0.0 }
 0x112   :  { %v547_v57 = vadd.f32 %v4922_v61, %v428_v12  ;;  %v430_v37 = vmul.f32 %v4862_v24, %v5174_v31  ;;  %v494_v27 = vadd.f32 %v4922_v61, %v375_v13  ;;  %v604_v28 = vmax.f32 %v492_v55, 0.0 }
 0x113   :  { %4382 = vmatmul.mubr.msk.f32.gmra.mrb[24].mxu0 %vm698_vm2, %v598_v46  ;;  %v605_v29 = vmax.f32 %v493_v16, 0.0  ;;  %v377_v40 = vmul.f32 %v4927_v63, %v5142_v25  ;;  %v658_v33 = vmax.f32 %v546_v32, 0.0  ;;  %v378_v34 = vmul.f32 %v4925_v62, %v5142_v25 }
 0x114   :  { %4460 = vmatmul.mubr.msk.f32.gmra.mrb[20].mxu1 %vm698_vm2, %v650_v30  ;;  %4384 = vmatprep.mubr.msk.f32.mxu0 %vm698_vm2, %v599_v47  ;;  %v495_v30 = vadd.f32 %v4922_v61, %v376_v17  ;;  %v431_v43 = vmul.f32 %v4886_v45, %v5174_v31  ;;  %v659_v44 = vmax.f32 %v547_v57, 0.0  ;;  %v549_v11 = vadd.f32 %v4922_v61, %v430_v37 }
 0x115   :  { %4462 = vmatprep.mubr.msk.f32.mxu1 %vm698_vm2, %v651_v38  ;;  %v548_v38 = vadd.f32 %v4922_v61, %v429_v18  ;;  %v432_v46 = vmul.f32 %v4882_v42, %v5174_v31  ;;  %v379_v25 = vmul.f32 %v4859_v22, %v4911_v58  ;;  %v606_v47 = vmax.f32 %v494_v27, 0.0 }
 0x116   :  { %v607_v48 = vmax.f32 %v495_v30, 0.0  ;;  %v496_v52 = vadd.f32 %v4922_v61, %v377_v40  ;;  %v380_v53 = vmul.f32 %v4864_v26, %v4911_v58  ;;  %v550_v1 = vadd.f32 %v4922_v61, %v431_v43 }
 0x117   :  { %4385 = vmatmul.mubr.msk.f32.gmra.mrb[26].mxu0 %vm698_vm2, %v600_v5  ;;  %v660_v20 = vmax.f32 %v548_v38, 0.0  ;;  %v661_v15 = vmax.f32 %v549_v11, 0.0  ;;  %v551_v3 = vadd.f32 %v4922_v61, %v432_v46  ;;  %v434_v4 = vmul.f32 %v4925_v62, %v5174_v31 }
 0x118   :  { %4463 = vmatmul.mubr.msk.f32.gmra.mrb[22].mxu1 %vm698_vm2, %v652_v54  ;;  %4387 = vmatprep.mubr.msk.f32.mxu0 %vm698_vm2, %v601_v41  ;;  %v497_v54 = vadd.f32 %v4922_v61, %v378_v34  ;;  %v498_v5 = vadd.f32 %v4922_v61, %v379_v25  ;;  %v608_v35 = vmax.f32 %v496_v52, 0.0  ;;  %v499_v36 = vadd.f32 %v4922_v61, %v380_v53 }
 0x119   :  { %4465 = vmatprep.mubr.msk.f32.mxu1 %vm698_vm2, %v653_v2  ;;  %v433_v2 = vmul.f32 %v4927_v63, %v5174_v31  ;;  %v381_v6 = vmul.f32 %v4862_v24, %v4911_v58  ;;  %v382_v41 = vmul.f32 %v4886_v45, %v4911_v58  ;;  %v662_v7 = vmax.f32 %v550_v1, 0.0 }
 0x11a   :  { %v435_v8 = vmul.f32 %v4859_v22, %v4891_v49  ;;  %v553_v10 = vadd.f32 %v4922_v61, %v434_v4  ;;  %v436_v12 = vmul.f32 %v4864_v26, %v4891_v49  ;;  %v383_v13 = vmul.f32 %v4882_v42, %v4911_v58 }
 0x11b   :  { %4388 = vmatmul.mubr.msk.f32.gmra.mrb[28].mxu0 %vm698_vm2, %v602_v14  ;;  %v552_v31 = vadd.f32 %v4922_v61, %v433_v2  ;;  %v610_v14 = vmax.f32 %v498_v5, 0.0  ;;  %v500_v55 = vadd.f32 %v4922_v61, %v381_v6  ;;  %v501_v16 = vadd.f32 %v4922_v61, %v382_v41 }
 0x11c   :  { %4466 = vmatmul.mubr.msk.f32.gmra.mrb[24].mxu1 %vm698_vm2, %v654_v39  ;;  %4390 = vmatprep.mubr.msk.f32.mxu0 %vm698_vm2, %v603_v0  ;;  %v609_v39 = vmax.f32 %v497_v54, 0.0  ;;  %v384_v17 = vmul.f32 %v4927_v63, %v4911_v58  ;;  %v611_v0 = vmax.f32 %v499_v36, 0.0  ;;  %v554_v32 = vadd.f32 %v4922_v61, %v435_v8 }
 0x11d   :  { %4468 = vmatprep.mubr.msk.f32.mxu1 %vm698_vm2, %v655_v9  ;;  %v663_v9 = vmax.f32 %v551_v3, 0.0  ;;  %v437_v18 = vmul.f32 %v4862_v24, %v4891_v49  ;;  %v555_v57 = vadd.f32 %v4922_v61, %v436_v12  ;;  %v438_v37 = vmul.f32 %v4886_v45, %v4891_v49 }
 0x11e   :  { %v502_v27 = vadd.f32 %v4922_v61, %v383_v13  ;;  %v503_v30 = vadd.f32 %v4922_v61, %v384_v17  ;;  %v385_v40 = vmul.f32 %v4925_v62, %v4911_v58  ;;  %v386_v34 = vmul.f32 %v4859_v22, %v4914_v59 }
 0x11f   :  { %4391 = vmatmul.mubr.msk.f32.gmra.mrb[30].mxu0 %vm698_vm2, %v604_v28  ;;  %v612_v28 = vmax.f32 %v500_v55, 0.0  ;;  %v556_v38 = vadd.f32 %v4922_v61, %v437_v18  ;;  %v439_v43 = vmul.f32 %v4882_v42, %v4891_v49  ;;  %v557_v11 = vadd.f32 %v4922_v61, %v438_v37 }
 0x120   :  { %4469 = vmatmul.mubr.msk.f32.gmra.mrb[26].mxu1 %vm698_vm2, %v656_v51  ;;  %4393 = vmatprep.mubr.msk.f32.mxu0 %vm698_vm2, %v605_v29  ;;  %v664_v51 = vmax.f32 %v552_v31, 0.0  ;;  %v613_v29 = vmax.f32 %v501_v16, 0.0  ;;  %v440_v46 = vmul.f32 %v4927_v63, %v4891_v49  ;;  %v387_v58 = vmul.f32 %v4864_v26, %v4914_v59 }
 0x121   :  { %4471 = vmatprep.mubr.msk.f32.mxu1 %vm698_vm2, %v657_v23  ;;  %v665_v23 = vmax.f32 %v553_v10, 0.0  ;;  %v614_v25 = vmax.f32 %v502_v27, 0.0  ;;  %v388_v52 = vmul.f32 %v4862_v24, %v4914_v59  ;;  %v505_v53 = vadd.f32 %v4922_v61, %v386_v34 }
 0x122   :  { %v668_v54 = vmax.f32 %v556_v38, 0.0  ;;  %v441_v1 = vmul.f32 %v4925_v62, %v4891_v49  ;;  %v669_v2 = vmax.f32 %v557_v11, 0.0  ;;  %v442_v3 = vmul.f32 %v4859_v22, %v4894_v50 }
 0x123   :  { %4394 = vmatmul.mubr.msk.f32.gmra.mrb[32].mxu0 %vm698_vm2, %v606_v47  ;;  %v615_v47 = vmax.f32 %v503_v30, 0.0  ;;  %v506_v4 = vadd.f32 %v4922_v61, %v387_v58  ;;  %v389_v49 = vmul.f32 %v4886_v45, %v4914_v59  ;;  %v390_v36 = vmul.f32 %v4882_v42, %v4914_v59 }
 0x124   :  { %4472 = vmatmul.mubr.msk.f32.gmra.mrb[28].mxu1 %vm698_vm2, %v658_v33  ;;  %4396 = vmatprep.mubr.msk.f32.mxu0 %vm698_vm2, %v607_v48  ;;  %v666_v33 = vmax.f32 %v554_v32, 0.0  ;;  %v504_v48 = vadd.f32 %v4922_v61, %v385_v40  ;;  %v617_v6 = vmax.f32 %v505_v53, 0.0  ;;  %v561_v8 = vadd.f32 %v4922_v61, %v442_v3 }
 0x125   :  { %4474 = vmatprep.mubr.msk.f32.mxu1 %vm698_vm2, %v659_v44  ;;  %v667_v44 = vmax.f32 %v555_v57, 0.0  ;;  %v391_v10 = vmul.f32 %v4927_v63, %v4914_v59  ;;  %v618_v12 = vmax.f32 %v506_v4, 0.0  ;;  %v508_v13 = vadd.f32 %v4922_v61, %v389_v49 }
 0x126   :  { %v616_v5 = vmax.f32 %v504_v48, 0.0  ;;  %v392_v55 = vmul.f32 %v4925_v62, %v4914_v59  ;;  %v673_v32 = vmax.f32 %v561_v8, 0.0  ;;  %v394_v30 = vmul.f32 %v4864_v26, %v4917_v60 }
 0x127   :  { %4397 = vmatmul.mubr.msk.f32.gmra.mrb[34].mxu0 %vm698_vm2, %v608_v35  ;;  %v507_v35 = vadd.f32 %v4922_v61, %v388_v52  ;;  %v510_v59 = vadd.f32 %v4922_v61, %v391_v10  ;;  %v620_v57 = vmax.f32 %v508_v13, 0.0  ;;  %v395_v58 = vmul.f32 %v4862_v24, %v4917_v60 }
 0x128   :  { %4475 = vmatmul.mubr.msk.f32.gmra.mrb[30].mxu1 %vm698_vm2, %v660_v20  ;;  %4399 = vmatprep.mubr.msk.f32.mxu0 %vm698_vm2, %v609_v39  ;;  %v558_v20 = vadd.f32 %v4922_v61, %v439_v43  ;;  %v560_v39 = vadd.f32 %v4922_v61, %v441_v1  ;;  %v511_v27 = vadd.f32 %v4922_v61, %v392_v55 }
 0x129   :  { %4477 = vmatprep.mubr.msk.f32.mxu1 %vm698_vm2, %v661_v15  ;;  %v559_v15 = vadd.f32 %v4922_v61, %v440_v46  ;;  %v619_v16 = vmax.f32 %v507_v35, 0.0  ;;  %v448_v43 = vmul.f32 %v4925_v62, %v4894_v50  ;;  %v449_v52 = vmul.f32 %v4859_v22, %v4905_v56 }
 0x12a   :  { %v670_v41 = vmax.f32 %v558_v20, 0.0  ;;  %v672_v17 = vmax.f32 %v560_v39, 0.0  ;;  %v623_v11 = vmax.f32 %v511_v27, 0.0  ;;  %v450_v20 = vmul.f32 %v4864_v26, %v4905_v56 }
 0x12b   :  { %4400 = vmatmul.mubr.msk.f32.gmra.mrb[36].mxu0 %vm698_vm2, %v610_v14  ;;  %v671_v31 = vmax.f32 %v559_v15, 0.0  ;;  %v509_v14 = vadd.f32 %v4922_v61, %v390_v36  ;;  %v452_v36 = vmul.f32 %v4886_v45, %v4905_v56  ;;  %v454_v8 = vmul.f32 %v4927_v63, %v4905_v56 }
 0x12c   :  { %4478 = vmatmul.mubr.msk.f32.gmra.mrb[32].mxu1 %vm698_vm2, %v662_v7  ;;  %4402 = vmatprep.mubr.msk.f32.mxu0 %vm698_vm2, %v611_v0  ;;  %v443_v7 = vmul.f32 %v4864_v26, %v4894_v50  ;;  %v451_v26 = vmul.f32 %v4862_v24, %v4905_v56  ;;  %v569_v49 = vadd.f32 %v4922_v61, %v450_v20 }
 0x12d   :  { %4480 = vmatprep.mubr.msk.f32.mxu1 %vm698_vm2, %v663_v9  ;;  %v444_v9 = vmul.f32 %v4862_v24, %v4894_v50  ;;  %v621_v37 = vmax.f32 %v509_v14, 0.0  ;;  %v573_v14 = vadd.f32 %v4922_v61, %v454_v8 }
 0x12e   :  { %v562_v0 = vadd.f32 %v4922_v61, %v443_v7  ;;  %v570_v24 = vadd.f32 %v4922_v61, %v451_v26  ;;  %v453_v7 = vmul.f32 %v4882_v42, %v4905_v56 }
 0x12f   :  { %4403 = vmatmul.mubr.msk.f32.gmra.mrb[38].mxu0 %vm698_vm2, %v612_v28  ;;  %v563_v18 = vadd.f32 %v4922_v61, %v444_v9  ;;  %v393_v28 = vmul.f32 %v4859_v22, %v4917_v60  ;;  %v397_v22 = vmul.f32 %v4882_v42, %v4917_v60 }
 0x130   :  { %4481 = vmatmul.mubr.msk.f32.gmra.mrb[34].mxu1 %vm698_vm2, %v664_v51  ;;  %4405 = vmatprep.mubr.msk.f32.mxu0 %vm698_vm2, %v613_v29  ;;  %v445_v51 = vmul.f32 %v4886_v45, %v4894_v50  ;;  %v674_v29 = vmax.f32 %v562_v0, 0.0  ;;  %v682_v10 = vmax.f32 %v570_v24, 0.0 }
 0x131   :  { %4483 = vmatprep.mubr.msk.f32.mxu1 %vm698_vm2, %v665_v23  ;;  %v446_v23 = vmul.f32 %v4882_v42, %v4894_v50  ;;  %v675_v34 = vmax.f32 %v563_v18, 0.0  ;;  %v512_v46 = vadd.f32 %v4922_v61, %v393_v28  ;;  %v455_v42 = vmul.f32 %v4925_v62, %v4905_v56  ;;  %v5414_v56 = vld [vmem:[%s7673_s6] ss:$0 sm:$0xff] }
 0x132   :  { %v564_v40 = vadd.f32 %v4922_v61, %v445_v51 }
 0x133   :  { %4406 = vmatmul.mubr.msk.f32.gmra.mrb[40].mxu0 %vm698_vm2, %v614_v25  ;;  %v565_v38 = vadd.f32 %v4922_v61, %v446_v23  ;;  %v396_v25 = vmul.f32 %v4886_v45, %v4917_v60  ;;  %v624_v1 = vmax.f32 %v512_v46, 0.0  ;;  %v571_v45 = vadd.f32 %v4922_v61, %v452_v36  ;;  %v5421_v23 = vld [vmem:[%s7674_s7] ss:$0 sm:$0xff] }
 0x134   :  { %4484 = vmatmul.mubr.msk.f32.gmra.mrb[36].mxu1 %vm698_vm2, %v666_v33  ;;  %4408 = vmatprep.mubr.msk.f32.mxu0 %vm698_vm2, %v615_v47  ;;  %v447_v33 = vmul.f32 %v4927_v63, %v4894_v50  ;;  %v513_v47 = vadd.f32 %v4922_v61, %v394_v30  ;;  %v676_v48 = vmax.f32 %v564_v40, 0.0  ;;  %v574_v55 = vadd.f32 %v4922_v61, %v455_v42 }
 0x135   :  { %4486 = vmatprep.mubr.msk.f32.mxu1 %vm698_vm2, %v667_v44  ;;  %v622_v44 = vmax.f32 %v510_v59, 0.0  ;;  %v677_v53 = vmax.f32 %v565_v38, 0.0  ;;  %v515_v15 = vadd.f32 %v4922_v61, %v396_v25  ;;  %v683_v13 = vmax.f32 %v571_v45, 0.0 }
 0x136   :  { %v566_v50 = vadd.f32 %v4922_v61, %v447_v33  ;;  %v625_v3 = vmax.f32 %v513_v47, 0.0 }
 0x137   :  { %4409 = vmatmul.mubr.msk.f32.gmra.mrb[42].mxu0 %vm698_vm2, %v616_v5  ;;  %v568_v5 = vadd.f32 %v4922_v61, %v449_v52 }
 0x138   :  { %4487 = vmatmul.mubr.msk.f32.gmra.mrb[38].mxu1 %vm698_vm2, %v668_v54  ;;  %4411 = vmatprep.mubr.msk.f32.mxu0 %vm698_vm2, %v617_v6  ;;  %v567_v54 = vadd.f32 %v4922_v61, %v448_v43  ;;  %v678_v4 = vmax.f32 %v566_v50, 0.0  ;;  %v516_v6 = vadd.f32 %v4922_v61, %v397_v22 }
 0x139   :  { %4489 = vmatprep.mubr.msk.f32.mxu1 %vm698_vm2, %v669_v2  ;;  %v514_v2 = vadd.f32 %v4922_v61, %v395_v58  ;;  %v680_v39 = vmax.f32 %v568_v5, 0.0 }
 0x13a   :  { %v679_v35 = vmax.f32 %v567_v54, 0.0  ;;  %v628_v9 = vmax.f32 %v516_v6, 0.0 }
 0x13b   :  { %4412 = vmatmul.mubr.msk.f32.gmra.mrb[44].mxu0 %vm698_vm2, %v618_v12  ;;  %v626_v60 = vmax.f32 %v514_v2, 0.0  ;;  %v572_v12 = vadd.f32 %v4922_v61, %v453_v7 }
 0x13c   :  { %4490 = vmatmul.mubr.msk.f32.gmra.mrb[40].mxu1 %vm698_vm2, %v670_v41  ;;  %4414 = vmatprep.mubr.msk.f32.mxu0 %vm698_vm2, %v619_v16  ;;  %v627_v41 = vmax.f32 %v515_v15, 0.0  ;;  %v685_v16 = vmax.f32 %v573_v14, 0.0 }
 0x13d   :  { %4492 = vmatprep.mubr.msk.f32.mxu1 %vm698_vm2, %v671_v31  ;;  %v681_v31 = vmax.f32 %v569_v49, 0.0  ;;  %v684_v63 = vmax.f32 %v572_v12, 0.0 }
 0x13f   :  { %4415 = vmatmul.mubr.msk.f32.gmra.mrb[46].mxu0 %vm698_vm2, %v620_v57 }
 0x140   :  { %4493 = vmatmul.mubr.msk.f32.gmra.mrb[42].mxu1 %vm698_vm2, %v672_v17  ;;  %4417 = vmatprep.mubr.msk.f32.mxu0 %vm698_vm2, %v621_v37  ;;  %v686_v17 = vmax.f32 %v574_v55, 0.0 }
 0x141   :  { %4495 = vmatprep.mubr.msk.f32.mxu1 %vm698_vm2, %v673_v32 }
 0x143   :  { %4418 = vmatmul.mubr.msk.f32.gmra.mrb[48].mxu0 %vm698_vm2, %v622_v44 }
 0x144   :  { %4496 = vmatmul.mubr.msk.f32.gmra.mrb[44].mxu1 %vm698_vm2, %v674_v29  ;;  %4420 = vmatprep.mubr.msk.f32.mxu0 %vm698_vm2, %v623_v11 }
 0x145   :  { %4498 = vmatprep.mubr.msk.f32.mxu1 %vm698_vm2, %v675_v34 }
 0x147   :  { %4421 = vmatmul.mubr.msk.f32.gmra.mrb[50].mxu0 %vm698_vm2, %v624_v1 }
 0x148   :  { %4499 = vmatmul.mubr.msk.f32.gmra.mrb[46].mxu1 %vm698_vm2, %v676_v48  ;;  %4423 = vmatprep.mubr.msk.f32.mxu0 %vm698_vm2, %v625_v3 }
 0x149   :  { %4501 = vmatprep.mubr.msk.f32.mxu1 %vm698_vm2, %v677_v53 }
 0x14b   :  { %4424 = vmatmul.mubr.msk.f32.gmra.mrb[52].mxu0 %vm698_vm2, %v626_v60 }
 0x14c   :  { %4502 = vmatmul.mubr.msk.f32.gmra.mrb[48].mxu1 %vm698_vm2, %v678_v4  ;;  %4426 = vmatprep.mubr.msk.f32.mxu0 %vm698_vm2, %v627_v41 }
 0x14d   :  { %4504 = vmatprep.mubr.msk.f32.mxu1 %vm698_vm2, %v679_v35 }
 0x14f   :  { %4427 = vmatmul.mubr.msk.f32.gmra.mrb[54].mxu0 %vm698_vm2, %v628_v9 }
 0x150   :  { %4505 = vmatmul.mubr.msk.f32.gmra.mrb[50].mxu1 %vm698_vm2, %v680_v39 }
 0x151   :  { %4507 = vmatprep.mubr.msk.f32.mxu1 %vm698_vm2, %v681_v31 }
 0x154   :  { %4508 = vmatmul.mubr.msk.f32.gmra.mrb[52].mxu1 %vm698_vm2, %v682_v10 }
 0x155   :  { %4510 = vmatprep.mubr.msk.f32.mxu1 %vm698_vm2, %v683_v13 }
 0x158   :  { %4511 = vmatmul.mubr.msk.f32.gmra.mrb[54].mxu1 %vm698_vm2, %v684_v63 }
 0x159   :  { %4513 = vmatprep.mubr.msk.f32.mxu1 %vm698_vm2, %v685_v16 }
 0x15c   :  { %4514 = vmatmul.mubr.msk.f32.gmra.mrb[56].mxu1 %vm698_vm2, %v686_v17 }
 0x1ba   :  { %v4350_v62 = vpop.f32.mrb[2].mxu0 }
 0x1bb   :  { %v1107_v0 = vadd.f32 %v4350_v62, %v5414_v56  ;;  %v1101_v51 = vpop.f32.mrb[3].mxu0 }
 0x1bc   :  { %v1102_v61 = vadd.f32 %v5414_v56, %v1101_v51 }
 0x1bd   :  { %v1661_v59 = vmax.f32 %v1107_v0, 0.0 }
 0x1be   :  { %v1660_v27 = vmax.f32 %v1102_v61, 0.0  ;;  %v4353_v28 = vpop.f32.mrb[4].mxu0 }
 0x1bf   :  { %v4431_v32 = vpop.f32.mrb[0].mxu1  ;;  %v1117_v29 = vadd.f32 %v4353_v28, %v5414_v56  ;;  %v1111_v30 = vpop.f32.mrb[5].mxu0  ;;  %v1780_v40 = vmul.f32 %v5421_v23, %v1661_v59 }
 0x1c0   :  { %v1371_v18 = vpop.f32.mrb[1].mxu1  ;;  %v1377_v57 = vadd.f32 %v4431_v32, %v5414_v56  ;;  %v1112_v34 = vadd.f32 %v5414_v56, %v1111_v30  ;;  %v1779_v38 = vmul.f32 %v5421_v23, %v1660_v27 }
 0x1c1   :  { %v1372_v37 = vadd.f32 %v5414_v56, %v1371_v18  ;;  %v1663_v44 = vmax.f32 %v1117_v29, 0.0  ;;  %v1894_v58 = vsel %vm698_vm2, %v1780_v40, 0.0 }
 0x1c2   :  { %v1715_v11 = vmax.f32 %v1377_v57, 0.0  ;;  %v1662_v25 = vmax.f32 %v1112_v34, 0.0  ;;  %1895 = vadd.xlane.f32.xlu0 %v1894_v58  ;;  %v4356_v47 = vpop.f32.mrb[6].mxu0  ;;  %v1891_v48 = vsel %vm698_vm2, %v1779_v38, 0.0 }
 0x1c3   :  { %v4434_v33 = vpop.f32.mrb[2].mxu1  ;;  %v1714_v46 = vmax.f32 %v1372_v37, 0.0  ;;  %v1127_v50 = vadd.f32 %v4356_v47, %v5414_v56  ;;  %v1121_v52 = vpop.f32.mrb[7].mxu0  ;;  %1892 = vadd.xlane.f32.xlu1 %v1891_v48  ;;  %v1782_v53 = vmul.f32 %v5421_v23, %v1663_v44 }
 0x1c4   :  { %v1381_v43 = vpop.f32.mrb[3].mxu1  ;;  %v1122_v20 = vadd.f32 %v5414_v56, %v1121_v52  ;;  %v1387_v1 = vadd.f32 %v4434_v33, %v5414_v56  ;;  %v1781_v2 = vmul.f32 %v5421_v23, %v1662_v25  ;;  %v1834_v4 = vmul.f32 %v5421_v23, %v1715_v11 }
 0x1c5   :  { %v1382_v22 = vadd.f32 %v5414_v56, %v1381_v43  ;;  %v1900_v3 = vsel %vm698_vm2, %v1782_v53, 0.0  ;;  %v1833_v5 = vmul.f32 %v5421_v23, %v1714_v46  ;;  %v1665_v26 = vmax.f32 %v1127_v50, 0.0 }
 0x1c6   :  { %v1664_v35 = vmax.f32 %v1122_v20, 0.0  ;;  %v4359_v49 = vpop.f32.mrb[8].mxu0  ;;  %v1897_v36 = vsel %vm698_vm2, %v1781_v2, 0.0  ;;  %v1717_v39 = vmax.f32 %v1387_v1, 0.0  ;;  %v2056_v7 = vsel %vm698_vm2, %v1834_v4, 0.0 }
 0x1c7   :  { %v4437_v54 = vpop.f32.mrb[4].mxu1  ;;  %1898 = vadd.xlane.f32.xlu0 %v1897_v36  ;;  %1901 = vadd.xlane.f32.xlu1 %v1900_v3  ;;  %v1131_v60 = vpop.f32.mrb[9].mxu0  ;;  %v1716_v24 = vmax.f32 %v1382_v22, 0.0  ;;  %v2053_v31 = vsel %vm698_vm2, %v1833_v5, 0.0  ;;  %v1137_v45 = vadd.f32 %v4359_v49, %v5414_v56  ;;  %v1784_v10 = vmul.f32 %v5421_v23, %v1665_v26 }
 0x1c8   :  { %v1391_v15 = vpop.f32.mrb[5].mxu1  ;;  %v1132_v8 = vadd.f32 %v5414_v56, %v1131_v60  ;;  %v1783_v12 = vmul.f32 %v5421_v23, %v1664_v35  ;;  %v1397_v63 = vadd.f32 %v4437_v54, %v5414_v56  ;;  %v1836_v16 = vmul.f32 %v5421_v23, %v1717_v39 }
 0x1c9   :  { %v1392_v55 = vadd.f32 %v5414_v56, %v1391_v15  ;;  %v1835_v17 = vmul.f32 %v5421_v23, %v1716_v24  ;;  %v1667_v62 = vmax.f32 %v1137_v45, 0.0  ;;  %v1906_v32 = vsel %vm698_vm2, %v1784_v10, 0.0 }
 0x1ca   :  { %v4362_v9 = vpop.f32.mrb[10].mxu0  ;;  %v1666_v0 = vmax.f32 %v1132_v8, 0.0  ;;  %v1903_v61 = vsel %vm698_vm2, %v1783_v12, 0.0  ;;  %v1719_v37 = vmax.f32 %v1397_v63, 0.0  ;;  %v2062_v28 = vsel %vm698_vm2, %v1836_v16, 0.0 }
 0x1cb   :  { %v4440_v6 = vpop.f32.mrb[6].mxu1  ;;  %v1141_v42 = vpop.f32.mrb[11].mxu0  ;;  %2057 = vadd.xlane.f32.xlu1 %v2056_v7  ;;  %2054 = vadd.xlane.f32.xlu0 %v2053_v31  ;;  %v1718_v27 = vmax.f32 %v1392_v55, 0.0  ;;  %v2059_v29 = vsel %vm698_vm2, %v1835_v17, 0.0  ;;  %v1147_v30 = vadd.f32 %v4362_v9, %v5414_v56  ;;  %v1786_v34 = vmul.f32 %v5421_v23, %v1667_v62 }
 0x1cc   :  { %v1401_v41 = vpop.f32.mrb[7].mxu1  ;;  %v1142_v40 = vadd.f32 %v5414_v56, %v1141_v42  ;;  %v1785_v38 = vmul.f32 %v5421_v23, %v1666_v0  ;;  %v1407_v46 = vadd.f32 %v4440_v6, %v5414_v56  ;;  %v1838_v25 = vmul.f32 %v5421_v23, %v1719_v37 }
 0x1cd   :  { %v1402_v58 = vadd.f32 %v5414_v56, %v1401_v41  ;;  %v1837_v47 = vmul.f32 %v5421_v23, %v1718_v27  ;;  %v1669_v48 = vmax.f32 %v1147_v30, 0.0  ;;  %v1912_v53 = vsel %vm698_vm2, %v1786_v34, 0.0 }
 0x1ce   :  { %v4365_v51 = vpop.f32.mrb[12].mxu0  ;;  %v1668_v50 = vmax.f32 %v1142_v40, 0.0  ;;  %v1909_v54 = vsel %vm698_vm2, %v1785_v38, 0.0  ;;  %v1721_v15 = vmax.f32 %v1407_v46, 0.0  ;;  %v2068_v3 = vsel %vm698_vm2, %v1838_v25, 0.0 }
 0x1cf   :  { %v4443_v13 = vpop.f32.mrb[8].mxu1  ;;  %v1151_v18 = vpop.f32.mrb[13].mxu0  ;;  %1907 = vadd.xlane.f32.xlu1 %v1906_v32  ;;  %1904 = vadd.xlane.f32.xlu0 %v1903_v61  ;;  %v1720_v22 = vmax.f32 %v1402_v58, 0.0  ;;  %v2065_v4 = vsel %vm698_vm2, %v1837_v47, 0.0  ;;  %v1157_v5 = vadd.f32 %v4365_v51, %v5414_v56  ;;  %v1788_v49 = vmul.f32 %v5421_v23, %v1669_v48 }
 0x1d0   :  { %v1411_v14 = vpop.f32.mrb[9].mxu1  ;;  %v1152_v26 = vadd.f32 %v5414_v56, %v1151_v18  ;;  %v1787_v36 = vmul.f32 %v5421_v23, %v1668_v50  ;;  %v1417_v39 = vadd.f32 %v4443_v13, %v5414_v56  ;;  %v1840_v7 = vmul.f32 %v5421_v23, %v1721_v15 }
 0x1d1   :  { %v1412_v24 = vadd.f32 %v5414_v56, %v1411_v14  ;;  %v1839_v31 = vmul.f32 %v5421_v23, %v1720_v22  ;;  %v1671_v45 = vmax.f32 %v1157_v5, 0.0  ;;  %v1918_v10 = vsel %vm698_vm2, %v1788_v49, 0.0 }
 0x1d2   :  { %v4368_v33 = vpop.f32.mrb[14].mxu0  ;;  %v1670_v8 = vmax.f32 %v1152_v26, 0.0  ;;  %v1915_v12 = vsel %vm698_vm2, %v1787_v36, 0.0  ;;  %v1723_v14 = vmax.f32 %v1417_v39, 0.0  ;;  %v2074_v16 = vsel %vm698_vm2, %v1840_v7, 0.0 }
 0x1d3   :  { %v5453_v59 = vpop.f32.mrb[10].mxu1  ;;  %v1161_v43 = vpop.f32.mrb[15].mxu0  ;;  %2063 = vadd.xlane.f32.xlu1 %v2062_v28  ;;  %2060 = vadd.xlane.f32.xlu0 %v2059_v29  ;;  %v1722_v55 = vmax.f32 %v1412_v24, 0.0  ;;  %v2071_v17 = vsel %vm698_vm2, %v1839_v31, 0.0  ;;  %v1167_v62 = vadd.f32 %v4368_v33, %v5414_v56  ;;  %v1790_v32 = vmul.f32 %v5421_v23, %v1671_v45 }
 0x1d4   :  { %v5455_v57 = vpop.f32.mrb[11].mxu1  ;;  %v1162_v0 = vadd.f32 %v5414_v56, %v1161_v43  ;;  %v1789_v61 = vmul.f32 %v5421_v23, %v1670_v8  ;;  %v1427_v28 = vadd.f32 %v5453_v59, %v5414_v56  ;;  %v1842_v30 = vmul.f32 %v5421_v23, %v1723_v14 }
 0x1d5   :  { %v1422_v29 = vadd.f32 %v5414_v56, %v5455_v57  ;;  %v1841_v40 = vmul.f32 %v5421_v23, %v1722_v55  ;;  %v1673_v33 = vmax.f32 %v1167_v62, 0.0  ;;  %v1924_v43 = vsel %vm698_vm2, %v1790_v32, 0.0 }
 0x1d6   :  { %v5471_v52 = vpop.f32.mrb[16].mxu0  ;;  %v1672_v34 = vmax.f32 %v1162_v0, 0.0  ;;  %v1921_v46 = vsel %vm698_vm2, %v1789_v61, 0.0  ;;  %v1725_v57 = vmax.f32 %v1427_v28, 0.0  ;;  %v2080_v48 = vsel %vm698_vm2, %v1842_v30, 0.0 }
 0x1d7   :  { %v5463_v44 = vpop.f32.mrb[12].mxu1  ;;  %v5475_v20 = vpop.f32.mrb[17].mxu0  ;;  %1913 = vadd.xlane.f32.xlu1 %v1912_v53  ;;  %1910 = vadd.xlane.f32.xlu0 %v1909_v54  ;;  %v1724_v47 = vmax.f32 %v1422_v29, 0.0  ;;  %v2077_v50 = vsel %vm698_vm2, %v1841_v40, 0.0  ;;  %v1177_v53 = vadd.f32 %v5471_v52, %v5414_v56  ;;  %v1792_v22 = vmul.f32 %v5421_v23, %v1673_v33 }
 0x1d8   :  { %v5465_v11 = vpop.f32.mrb[13].mxu1  ;;  %v1172_v54 = vadd.f32 %v5414_v56, %v5475_v20  ;;  %v1437_v52 = vadd.f32 %v5463_v44, %v5414_v56  ;;  %v1844_v49 = vmul.f32 %v5421_v23, %v1725_v57 }
 0x1d9   :  { %v1432_v20 = vadd.f32 %v5414_v56, %v5465_v11  ;;  %v1843_v36 = vmul.f32 %v5421_v23, %v1724_v47  ;;  %v1675_v39 = vmax.f32 %v1177_v53, 0.0  ;;  %v1930_v31 = vsel %vm698_vm2, %v1792_v22, 0.0 }
 0x1da   :  { %v5485_v35 = vpop.f32.mrb[18].mxu0  ;;  %v1674_v24 = vmax.f32 %v1172_v54, 0.0  ;;  %v1727_v11 = vmax.f32 %v1437_v52, 0.0  ;;  %v2086_v14 = vsel %vm698_vm2, %v1844_v49, 0.0 }
 0x1db   :  { %v5477_v1 = vpop.f32.mrb[14].mxu1  ;;  %v5489_v60 = vpop.f32.mrb[19].mxu0  ;;  %2069 = vadd.xlane.f32.xlu1 %v2068_v3  ;;  %2066 = vadd.xlane.f32.xlu0 %v2065_v4  ;;  %v1791_v3 = vmul.f32 %v5421_v23, %v1672_v34  ;;  %v2083_v55 = vsel %vm698_vm2, %v1843_v36, 0.0  ;;  %v1794_v0 = vmul.f32 %v5421_v23, %v1675_v39 }
 0x1dc   :  { %v5479_v2 = vpop.f32.mrb[15].mxu1  ;;  %v1793_v32 = vmul.f32 %v5421_v23, %v1674_v24  ;;  %v1846_v30 = vmul.f32 %v5421_v23, %v1727_v11 }
 0x1dd   :  { %v1927_v45 = vsel %vm698_vm2, %v1791_v3, 0.0 }
 0x1de   :  { %v5499_v9 = vpop.f32.mrb[20].mxu0  ;;  %v1933_v57 = vsel %vm698_vm2, %v1793_v32, 0.0  ;;  %v2092_v53 = vsel %vm698_vm2, %v1846_v30, 0.0 }
 0x1df   :  { %v5491_v6 = vpop.f32.mrb[16].mxu1  ;;  %v5503_v42 = vpop.f32.mrb[21].mxu0  ;;  %1919 = vadd.xlane.f32.xlu1 %v1918_v10  ;;  %1916 = vadd.xlane.f32.xlu0 %v1915_v12  ;;  %v1726_v12 = vmax.f32 %v1432_v20, 0.0  ;;  %v1197_v22 = vadd.f32 %v5499_v9, %v5414_v56 }
 0x1e0   :  { %v5493_v41 = vpop.f32.mrb[17].mxu1  ;;  %v1192_v3 = vadd.f32 %v5414_v56, %v5503_v42  ;;  %v1457_v9 = vadd.f32 %v5491_v6, %v5414_v56 }
 0x1e1   :  { %v1845_v40 = vmul.f32 %v5421_v23, %v1726_v12  ;;  %v1452_v42 = vadd.f32 %v5414_v56, %v5493_v41  ;;  %v1679_v11 = vmax.f32 %v1197_v22, 0.0 }
 0x1e2   :  { %v5513_v51 = vpop.f32.mrb[22].mxu0  ;;  %v1678_v12 = vmax.f32 %v1192_v3, 0.0  ;;  %v1731_v41 = vmax.f32 %v1457_v9, 0.0 }
 0x1e3   :  { %v5505_v63 = vpop.f32.mrb[18].mxu1  ;;  %v5517_v18 = vpop.f32.mrb[23].mxu0  ;;  %2075 = vadd.xlane.f32.xlu1 %v2074_v16  ;;  %2072 = vadd.xlane.f32.xlu0 %v2071_v17  ;;  %v1187_v16 = vadd.f32 %v5485_v35, %v5414_v56  ;;  %v1182_v17 = vadd.f32 %v5414_v56, %v5489_v60  ;;  %v1447_v35 = vadd.f32 %v5477_v1, %v5414_v56  ;;  %v2089_v54 = vsel %vm698_vm2, %v1845_v40, 0.0 }
 0x1e4   :  { %v5507_v13 = vpop.f32.mrb[19].mxu1  ;;  %v1442_v60 = vadd.f32 %v5414_v56, %v5479_v2  ;;  %v1730_v32 = vmax.f32 %v1452_v42, 0.0  ;;  %v1207_v30 = vadd.f32 %v5513_v51, %v5414_v56  ;;  %v1202_v40 = vadd.f32 %v5414_v56, %v5517_v18 }
 0x1e5   :  { %v1677_v33 = vmax.f32 %v1187_v16, 0.0  ;;  %v1676_v34 = vmax.f32 %v1182_v17, 0.0  ;;  %v1729_v2 = vmax.f32 %v1447_v35, 0.0  ;;  %v1467_v51 = vadd.f32 %v5505_v63, %v5414_v56 }
 0x1e6   :  { %v5529_v38 = vpop.f32.mrb[24].mxu0  ;;  %v1462_v18 = vadd.f32 %v5414_v56, %v5507_v13  ;;  %v1681_v22 = vmax.f32 %v1207_v30, 0.0  ;;  %v1680_v3 = vmax.f32 %v1202_v40, 0.0 }
 0x1e7   :  { %v5519_v37 = vpop.f32.mrb[20].mxu1  ;;  %v5533_v58 = vpop.f32.mrb[25].mxu0  ;;  %1925 = vadd.xlane.f32.xlu1 %v1924_v43  ;;  %1922 = vadd.xlane.f32.xlu0 %v1921_v46  ;;  %v1936_v46 = vsel %vm698_vm2, %v1794_v0, 0.0  ;;  %v1796_v20 = vmul.f32 %v5421_v23, %v1677_v33  ;;  %v1795_v49 = vmul.f32 %v5421_v23, %v1676_v34  ;;  %v1798_v34 = vmul.f32 %v5421_v23, %v1679_v11 }
 0x1e8   :  { %v5521_v27 = vpop.f32.mrb[21].mxu1  ;;  %v1733_v13 = vmax.f32 %v1467_v51, 0.0 }
 0x1e9   :  { %v1939_v16 = vsel %vm698_vm2, %v1795_v49, 0.0  ;;  %v1948_v49 = vsel %vm698_vm2, %v1798_v34, 0.0 }
 0x1ea   :  { %v5545_v15 = vpop.f32.mrb[26].mxu0  ;;  %v1852_v34 = vmul.f32 %v5421_v23, %v1733_v13 }
 0x1eb   :  { %v5535_v59 = vpop.f32.mrb[22].mxu1  ;;  %v5549_v4 = vpop.f32.mrb[27].mxu0  ;;  %2081 = vadd.xlane.f32.xlu1 %v2080_v48  ;;  %2078 = vadd.xlane.f32.xlu0 %v2077_v50  ;;  %v1728_v50 = vmax.f32 %v1442_v60, 0.0 }
 0x1ec   :  { %v5537_v25 = vpop.f32.mrb[23].mxu1  ;;  %v2110_v13 = vsel %vm698_vm2, %v1852_v34, 0.0 }
 0x1ee   :  { %v5561_v7 = vpop.f32.mrb[28].mxu0 }
 0x1ef   :  { %v5551_v5 = vpop.f32.mrb[24].mxu1  ;;  %v5565_v8 = vpop.f32.mrb[29].mxu0  ;;  %1931 = vadd.xlane.f32.xlu1 %v1930_v31  ;;  %1928 = vadd.xlane.f32.xlu0 %v1927_v45  ;;  %v1848_v31 = vmul.f32 %v5421_v23, %v1729_v2  ;;  %v1847_v45 = vmul.f32 %v5421_v23, %v1728_v50 }
 0x1f0   :  { %v5553_v26 = vpop.f32.mrb[25].mxu1 }
 0x1f1   :  { %v2098_v35 = vsel %vm698_vm2, %v1848_v31, 0.0  ;;  %v2095_v60 = vsel %vm698_vm2, %v1847_v45, 0.0  ;;  %v1732_v45 = vmax.f32 %v1462_v18, 0.0 }
 0x1f2   :  { %v5577_v62 = vpop.f32.mrb[30].mxu0 }
 0x1f3   :  { %v5567_v44 = vpop.f32.mrb[26].mxu1  ;;  %v5581_v61 = vpop.f32.mrb[31].mxu0  ;;  %2087 = vadd.xlane.f32.xlu1 %v2086_v14  ;;  %2084 = vadd.xlane.f32.xlu0 %v2083_v55  ;;  %v1942_v55 = vsel %vm698_vm2, %v1796_v20, 0.0 }
 0x1f4   :  { %v5569_v10 = vpop.f32.mrb[27].mxu1 }
 0x1f6   :  { %v5593_v43 = vpop.f32.mrb[32].mxu0 }
 0x1f7   :  { %v5583_v28 = vpop.f32.mrb[28].mxu1  ;;  %v5597_v47 = vpop.f32.mrb[33].mxu0  ;;  %1937 = vadd.xlane.f32.xlu1 %v1936_v46  ;;  %1934 = vadd.xlane.f32.xlu0 %v1933_v57  ;;  %v1797_v46 = vmul.f32 %v5421_v23, %v1678_v12 }
 0x1f8   :  { %v5585_v29 = vpop.f32.mrb[29].mxu1 }
 0x1f9   :  { %v1945_v9 = vsel %vm698_vm2, %v1797_v46, 0.0  ;;  %v1851_v46 = vmul.f32 %v5421_v23, %v1732_v45 }
 0x1fa   :  { %v5609_v52 = vpop.f32.mrb[34].mxu0 }
 0x1fb   :  { %v5599_v1 = vpop.f32.mrb[30].mxu1  ;;  %v5613_v36 = vpop.f32.mrb[35].mxu0  ;;  %2093 = vadd.xlane.f32.xlu1 %v2092_v53  ;;  %2090 = vadd.xlane.f32.xlu0 %v2089_v54  ;;  %v1850_v53 = vmul.f32 %v5421_v23, %v1731_v41  ;;  %v1849_v54 = vmul.f32 %v5421_v23, %v1730_v32  ;;  %v1800_v32 = vmul.f32 %v5421_v23, %v1681_v22  ;;  %v2107_v45 = vsel %vm698_vm2, %v1851_v46, 0.0 }
 0x1fc   :  { %v5601_v48 = vpop.f32.mrb[31].mxu1 }
 0x1fd   :  { %v2104_v11 = vsel %vm698_vm2, %v1850_v53, 0.0  ;;  %v2101_v12 = vsel %vm698_vm2, %v1849_v54, 0.0  ;;  %v1954_v54 = vsel %vm698_vm2, %v1800_v32, 0.0 }
 0x1fe   :  { %v5625_v14 = vpop.f32.mrb[36].mxu0 }
 0x1ff   :  { %v5615_v39 = vpop.f32.mrb[32].mxu1  ;;  %v5629_v17 = vpop.f32.mrb[37].mxu0  ;;  %1943 = vadd.xlane.f32.xlu1 %v1942_v55  ;;  %1940 = vadd.xlane.f32.xlu0 %v1939_v16  ;;  %v1217_v55 = vadd.f32 %v5529_v38, %v5414_v56  ;;  %v1212_v16 = vadd.f32 %v5414_v56, %v5533_v58  ;;  %v1477_v38 = vadd.f32 %v5519_v37, %v5414_v56 }
 0x200   :  { %v5617_v24 = vpop.f32.mrb[33].mxu1  ;;  %v1472_v58 = vadd.f32 %v5414_v56, %v5521_v27 }
 0x201   :  { %v1683_v51 = vmax.f32 %v1217_v55, 0.0  ;;  %v1682_v18 = vmax.f32 %v1212_v16, 0.0  ;;  %v1735_v27 = vmax.f32 %v1477_v38, 0.0 }
 0x202   :  { %v5641_v33 = vpop.f32.mrb[38].mxu0 }
 0x203   :  { %v5631_v6 = vpop.f32.mrb[34].mxu1  ;;  %v5645_v57 = vpop.f32.mrb[39].mxu0  ;;  %2099 = vadd.xlane.f32.xlu1 %v2098_v35  ;;  %2096 = vadd.xlane.f32.xlu0 %v2095_v60  ;;  %v1799_v35 = vmul.f32 %v5421_v23, %v1680_v3  ;;  %v1802_v16 = vmul.f32 %v5421_v23, %v1683_v51  ;;  %v1801_v32 = vmul.f32 %v5421_v23, %v1682_v18 }
 0x204   :  { %v5633_v0 = vpop.f32.mrb[35].mxu1  ;;  %v1854_v34 = vmul.f32 %v5421_v23, %v1735_v27 }
 0x205   :  { %v1951_v22 = vsel %vm698_vm2, %v1799_v35, 0.0 }
 0x206   :  { %v5657_v20 = vpop.f32.mrb[40].mxu0 }
 0x207   :  { %v5647_v2 = vpop.f32.mrb[36].mxu1  ;;  %v5661_v42 = vpop.f32.mrb[41].mxu0  ;;  %1949 = vadd.xlane.f32.xlu1 %v1948_v49  ;;  %1946 = vadd.xlane.f32.xlu0 %v1945_v9  ;;  %v1734_v9 = vmax.f32 %v1472_v58, 0.0 }
 0x208   :  { %v5649_v50 = vpop.f32.mrb[37].mxu1 }
 0x209   :  { %v1853_v46 = vmul.f32 %v5421_v23, %v1734_v9  ;;  %v2116_v9 = vsel %vm698_vm2, %v1854_v34, 0.0 }
 0x20a   :  { %v5673_v41 = vpop.f32.mrb[42].mxu0 }
 0x20b   :  { %v5663_v63 = vpop.f32.mrb[38].mxu1  ;;  %v5677_v60 = vpop.f32.mrb[43].mxu0  ;;  %2105 = vadd.xlane.f32.xlu1 %v2104_v11  ;;  %2102 = vadd.xlane.f32.xlu0 %v2101_v12  ;;  %v1227_v11 = vadd.f32 %v5545_v15, %v5414_v56  ;;  %v1222_v12 = vadd.f32 %v5414_v56, %v5549_v4  ;;  %v1487_v15 = vadd.f32 %v5535_v59, %v5414_v56 }
 0x20c   :  { %v5665_v31 = vpop.f32.mrb[39].mxu1  ;;  %v1482_v4 = vadd.f32 %v5414_v56, %v5537_v25 }
 0x20d   :  { %v1685_v51 = vmax.f32 %v1227_v11, 0.0  ;;  %v1684_v18 = vmax.f32 %v1222_v12, 0.0  ;;  %v1737_v25 = vmax.f32 %v1487_v15, 0.0  ;;  %v2113_v11 = vsel %vm698_vm2, %v1853_v46, 0.0 }
 0x20e   :  { %v5689_v53 = vpop.f32.mrb[44].mxu0  ;;  %v1736_v27 = vmax.f32 %v1482_v4, 0.0  ;;  %v1237_v12 = vadd.f32 %v5561_v7, %v5414_v56  ;;  %v1497_v7 = vadd.f32 %v5551_v5, %v5414_v56 }
 0x20f   :  { %v5679_v30 = vpop.f32.mrb[40].mxu1  ;;  %v5693_v3 = vpop.f32.mrb[45].mxu0  ;;  %1955 = vadd.xlane.f32.xlu1 %v1954_v54  ;;  %1952 = vadd.xlane.f32.xlu0 %v1951_v22  ;;  %v1960_v22 = vsel %vm698_vm2, %v1802_v16, 0.0  ;;  %v1232_v16 = vadd.f32 %v5414_v56, %v5565_v8  ;;  %v1492_v8 = vadd.f32 %v5414_v56, %v5553_v26  ;;  %v1856_v46 = vmul.f32 %v5421_v23, %v1737_v25 }
 0x210   :  { %v5681_v40 = vpop.f32.mrb[41].mxu1  ;;  %v1687_v21 = vmax.f32 %v1237_v12, 0.0  ;;  %v1739_v26 = vmax.f32 %v1497_v7, 0.0 }
 0x211   :  { %v1738_v25 = vmax.f32 %v1492_v8, 0.0 }
 0x212   :  { %v5705_v55 = vpop.f32.mrb[46].mxu0 }
 0x213   :  { %v5695_v37 = vpop.f32.mrb[42].mxu1  ;;  %v5709_v35 = vpop.f32.mrb[47].mxu0  ;;  %2111 = vadd.xlane.f32.xlu1 %v2110_v13  ;;  %2108 = vadd.xlane.f32.xlu0 %v2107_v45  ;;  %v1957_v13 = vsel %vm698_vm2, %v1801_v32, 0.0 }
 0x214   :  { %v5697_v49 = vpop.f32.mrb[43].mxu1 }
 0x216   :  { %v5721_v54 = vpop.f32.mrb[48].mxu0 }
 0x217   :  { %v5711_v38 = vpop.f32.mrb[44].mxu1  ;;  %v5725_v45 = vpop.f32.mrb[49].mxu0  ;;  %1961 = vadd.xlane.f32.xlu1 %v1960_v22  ;;  %1958 = vadd.xlane.f32.xlu0 %v1957_v13  ;;  %v1804_v22 = vmul.f32 %v5421_v23, %v1685_v51  ;;  %v1803_v13 = vmul.f32 %v5421_v23, %v1684_v18  ;;  %v1855_v51 = vmul.f32 %v5421_v23, %v1736_v27  ;;  %v1686_v18 = vmax.f32 %v1232_v16, 0.0 }
 0x218   :  { %v5713_v58 = vpop.f32.mrb[45].mxu1  ;;  %v2122_v27 = vsel %vm698_vm2, %v1856_v46, 0.0  ;;  %v1247_v16 = vadd.f32 %v5577_v62, %v5414_v56  ;;  %v1507_v62 = vadd.f32 %v5567_v44, %v5414_v56 }
 0x219   :  { %v2119_v12 = vsel %vm698_vm2, %v1855_v51, 0.0  ;;  %v1858_v51 = vmul.f32 %v5421_v23, %v1739_v26 }
 0x21a   :  { %v5737_v32 = vpop.f32.mrb[50].mxu0  ;;  %v1741_v44 = vmax.f32 %v1507_v62, 0.0 }
 0x21b   :  { %v5727_v59 = vpop.f32.mrb[46].mxu1  ;;  %2117 = vadd.xlane.f32.xlu1 %v2116_v9  ;;  %2114 = vadd.xlane.f32.xlu0 %v2113_v11  ;;  %v5741_v15 = vpop.f32.mrb[51].mxu0  ;;  %v1966_v11 = vsel %vm698_vm2, %v1804_v22, 0.0  ;;  %v1242_v22 = vadd.f32 %v5414_v56, %v5581_v61  ;;  %v1502_v61 = vadd.f32 %v5414_v56, %v5569_v10  ;;  %v2128_v10 = vsel %vm698_vm2, %v1858_v51, 0.0 }
 0x21c   :  { %v5729_v19 = vpop.f32.mrb[47].mxu1  ;;  %v1512_v51 = vadd.f32 %v5414_v56, %v5585_v29  ;;  %v1267_v29 = vadd.f32 %v5609_v52, %v5414_v56 }
 0x21d   :  { %7686 = vst [vmem:[#allocation4_spill] sm:$0xff] %v5729_v19 }
 0x21e   :  { %v5753_v9 = vpop.f32.mrb[52].mxu0  ;;  %v1693_v52 = vmax.f32 %v1267_v29, 0.0 }
 0x21f   :  { %v5743_v4 = vpop.f32.mrb[48].mxu1  ;;  %1967 = vadd.xlane.f32.xlu1 %v1966_v11  ;;  %v1805_v11 = vmul.f32 %v5421_v23, %v1686_v18  ;;  %v1688_v18 = vmax.f32 %v1242_v22, 0.0 }
 0x220   :  { %7687 = vst [vmem:[#allocation5_spill] sm:$0xff] %v5743_v4  ;;  %v5745_v34 = vpop.f32.mrb[49].mxu1  ;;  %v1963_v4 = vsel %vm698_vm2, %v1803_v13, 0.0 }
 0x221   :  { %7688 = vst [vmem:[#allocation6_spill] sm:$0xff] %v5745_v34  ;;  %1964 = vadd.xlane.f32.xlu0 %v1963_v4  ;;  %v5757_v34 = vpop.f32.mrb[53].mxu0  ;;  %v1806_v4 = vmul.f32 %v5421_v23, %v1687_v21  ;;  %v1857_v21 = vmul.f32 %v5421_v23, %v1738_v25  ;;  %v1257_v25 = vadd.f32 %v5593_v43, %v5414_v56 }
 0x222   :  { %v5769_v13 = vpop.f32.mrb[54].mxu0  ;;  %v1860_v43 = vmul.f32 %v5421_v23, %v1741_v44 }
 0x223   :  { %v5759_v5 = vpop.f32.mrb[50].mxu1  ;;  %2123 = vadd.xlane.f32.xlu1 %v2122_v27  ;;  %v5773_v7 = vpop.f32.mrb[55].mxu0  ;;  %v1972_v27 = vsel %vm698_vm2, %v1806_v4, 0.0  ;;  %v2125_v26 = vsel %vm698_vm2, %v1857_v21, 0.0  ;;  %v1807_v4 = vmul.f32 %v5421_v23, %v1688_v18  ;;  %v1691_v21 = vmax.f32 %v1257_v25, 0.0 }
 0x224   :  { %7689 = vst [vmem:[#allocation7_spill] sm:$0xff] %v5759_v5  ;;  %v5761_v19 = vpop.f32.mrb[51].mxu1  ;;  %v1740_v5 = vmax.f32 %v1502_v61, 0.0  ;;  %v1517_v61 = vadd.f32 %v5583_v28, %v5414_v56 }
 0x225   :  { %7690 = vst [vmem:[#allocation8_spill] sm:$0xff] %v5761_v19  ;;  %2120 = vadd.xlane.f32.xlu0 %v2119_v12  ;;  %v1689_v19 = vmax.f32 %v1247_v16, 0.0  ;;  %v1969_v12 = vsel %vm698_vm2, %v1805_v11, 0.0  ;;  %v1252_v16 = vadd.f32 %v5414_v56, %v5597_v47  ;;  %v1810_v44 = vmul.f32 %v5421_v23, %v1691_v21 }
 0x226   :  { %v1859_v47 = vmul.f32 %v5421_v23, %v1740_v5  ;;  %v1262_v5 = vadd.f32 %v5414_v56, %v5613_v36 }
 0x227   :  { %v5775_v8 = vpop.f32.mrb[52].mxu1  ;;  %1973 = vadd.xlane.f32.xlu1 %v1972_v27  ;;  %v1808_v22 = vmul.f32 %v5421_v23, %v1689_v19  ;;  %v1690_v19 = vmax.f32 %v1252_v16, 0.0  ;;  %v1975_v27 = vsel %vm698_vm2, %v1807_v4, 0.0  ;;  %v1527_v16 = vadd.f32 %v5599_v1, %v5414_v56 }
 0x228   :  { %7691 = vst [vmem:[#allocation9_spill] sm:$0xff] %v5775_v8  ;;  %v5777_v46 = vpop.f32.mrb[53].mxu1  ;;  %v2131_v28 = vsel %vm698_vm2, %v1859_v47, 0.0  ;;  %v1984_v36 = vsel %vm698_vm2, %v1810_v44, 0.0 }
 0x229   :  { %7692 = vst [vmem:[#allocation10_spill] sm:$0xff] %v5777_v46  ;;  %1970 = vadd.xlane.f32.xlu0 %v1969_v12  ;;  %v1978_v18 = vsel %vm698_vm2, %v1808_v22, 0.0  ;;  %v1743_v12 = vmax.f32 %v1517_v61, 0.0  ;;  %v1809_v25 = vmul.f32 %v5421_v23, %v1690_v19  ;;  %v1522_v22 = vadd.f32 %v5414_v56, %v5601_v48 }
 0x22a   :  { %v1745_v47 = vmax.f32 %v1527_v16, 0.0  ;;  %v1277_v48 = vadd.f32 %v5625_v14, %v5414_v56  ;;  %v5845_v16 = vpop.permute.xlu0 %2908 }
 0x22b   :  { %v5787_v8 = vpop.f32.mrb[54].mxu1  ;;  %2129 = vadd.xlane.f32.xlu1 %v2128_v10  ;;  %v1742_v10 = vmax.f32 %v1512_v51, 0.0  ;;  %v1862_v4 = vmul.f32 %v5421_v23, %v1743_v12  ;;  %v1692_v51 = vmax.f32 %v1262_v5, 0.0  ;;  %v1744_v21 = vmax.f32 %v1522_v22, 0.0  ;;  %7694 = vst [vmem:[#allocation12_spill] sm:$0xff] %v5845_v16 }
 0x22c   :  { %v5789_v46 = vpop.f32.mrb[55].mxu1  ;;  %v1812_v12 = vmul.f32 %v5421_v23, %v1693_v52  ;;  %v1864_v29 = vmul.f32 %v5421_v23, %v1745_v47  ;;  %v1695_v5 = vmax.f32 %v1277_v48, 0.0  ;;  %v1287_v52 = vadd.f32 %v5641_v33, %v5414_v56 }
 0x22d   :  { %2126 = vadd.xlane.f32.xlu0 %v2125_v26  ;;  %v2134_v26 = vsel %vm698_vm2, %v1860_v43, 0.0  ;;  %v1861_v61 = vmul.f32 %v5421_v23, %v1742_v10  ;;  %v1981_v43 = vsel %vm698_vm2, %v1809_v25, 0.0  ;;  %v2140_v19 = vsel %vm698_vm2, %v1862_v4, 0.0 }
 0x22e   :  { %v1811_v10 = vmul.f32 %v5421_v23, %v1692_v51  ;;  %v1863_v14 = vmul.f32 %v5421_v23, %v1744_v21  ;;  %v1990_v44 = vsel %vm698_vm2, %v1812_v12, 0.0  ;;  %v1282_v51 = vadd.f32 %v5414_v56, %v5645_v57 }
 0x22f   :  { %v5799_v11 = vpop.f32.mrb[56].mxu1  ;;  %1979 = vadd.xlane.f32.xlu1 %v1978_v18  ;;  %v2137_v1 = vsel %vm698_vm2, %v1861_v61, 0.0  ;;  %v1272_v18 = vadd.f32 %v5414_v56, %v5629_v17  ;;  %v1547_v47 = vadd.f32 %v5631_v6, %v5414_v56  ;;  %v1542_v21 = vadd.f32 %v5414_v56, %v5633_v0 }
 0x230   :  { %v5801_v62 = vpop.f32.mrb[57].mxu1  ;;  %v1987_v25 = vsel %vm698_vm2, %v1811_v10, 0.0  ;;  %v2143_v61 = vsel %vm698_vm2, %v1863_v14, 0.0  ;;  %v1697_v48 = vmax.f32 %v1287_v52, 0.0  ;;  %v1696_v57 = vmax.f32 %v1282_v51, 0.0 }
 0x231   :  { %1976 = vadd.xlane.f32.xlu0 %v1975_v27  ;;  %v5833_v27 = vpop.permute.xlu1 %2912  ;;  %v1694_v17 = vmax.f32 %v1272_v18, 0.0  ;;  %v1749_v6 = vmax.f32 %v1547_v47, 0.0  ;;  %v1292_v14 = vadd.f32 %v5414_v56, %v5661_v42 }
 0x232   :  { %7693 = vst [vmem:[#allocation11_spill] sm:$0xff] %v5833_v27 }
 0x233   :  { %2135 = vadd.xlane.f32.xlu1 %v2134_v26  ;;  %v1537_v26 = vadd.f32 %v5615_v39, %v5414_v56 }
 0x235   :  { %2132 = vadd.xlane.f32.xlu0 %v2131_v28  ;;  %v1532_v28 = vadd.f32 %v5414_v56, %v5617_v24  ;;  %v5847_v22 = vpop.permute.xlu1 %2916  ;;  %v1747_v39 = vmax.f32 %v1537_v26, 0.0  ;;  %v2146_v24 = vsel %vm698_vm2, %v1864_v29, 0.0  ;;  %v1748_v26 = vmax.f32 %v1542_v21, 0.0 }
 0x236   :  { %v1297_v29 = vadd.f32 %v5657_v20, %v5414_v56  ;;  %v1868_v20 = vmul.f32 %v5421_v23, %v1749_v6  ;;  %v1567_v6 = vadd.f32 %v5663_v63, %v5414_v56 }
 0x237   :  { %1985 = vadd.xlane.f32.xlu1 %v1984_v36  ;;  %v1746_v4 = vmax.f32 %v1532_v28, 0.0  ;;  %v1814_v36 = vmul.f32 %v5421_v23, %v1695_v5  ;;  %v1816_v5 = vmul.f32 %v5421_v23, %v1697_v48  ;;  %v1867_v42 = vmul.f32 %v5421_v23, %v1748_v26 }
 0x238   :  { %v1562_v26 = vadd.f32 %v5414_v56, %v5665_v31  ;;  %v1753_v63 = vmax.f32 %v1567_v6, 0.0 }
 0x239   :  { %1982 = vadd.xlane.f32.xlu0 %v1981_v43  ;;  %v1813_v43 = vmul.f32 %v5421_v23, %v1694_v17  ;;  %v1865_v33 = vmul.f32 %v5421_v23, %v1746_v4  ;;  %v5865_v18 = vpop.permute.xlu1 %2924  ;;  %v1996_v12 = vsel %vm698_vm2, %v1814_v36, 0.0  ;;  %v1815_v17 = vmul.f32 %v5421_v23, %v1696_v57 }
 0x23a   :  { %v1552_v4 = vadd.f32 %v5414_v56, %v5649_v50  ;;  %v2002_v52 = vsel %vm698_vm2, %v1816_v5, 0.0  ;;  %v2158_v50 = vsel %vm698_vm2, %v1868_v20, 0.0  ;;  %v2155_v21 = vsel %vm698_vm2, %v1867_v42, 0.0  ;;  %v5931_v42 = vld [vmem:[%s7674_s7] ss:$0 sm:$0xff] }
 0x23b   :  { %2141 = vadd.xlane.f32.xlu1 %v2140_v19  ;;  %v5861_v19 = vpop.permute.xlu0 %2920  ;;  %v1993_v10 = vsel %vm698_vm2, %v1813_v43, 0.0  ;;  %v2149_v28 = vsel %vm698_vm2, %v1865_v33, 0.0  ;;  %v1999_v51 = vsel %vm698_vm2, %v1815_v17, 0.0  ;;  %v1302_v33 = vadd.f32 %v5414_v56, %v5677_v60 }
 0x23c   :  { %v1750_v47 = vmax.f32 %v1552_v4, 0.0 }
 0x23d   :  { %2138 = vadd.xlane.f32.xlu0 %v2137_v1  ;;  %v1866_v1 = vmul.f32 %v5421_v23, %v1747_v39  ;;  %v1557_v39 = vadd.f32 %v5647_v2, %v5414_v56 }
 0x23e   :  { %v1869_v60 = vmul.f32 %v5421_v23, %v1750_v47 }
 0x23f   :  { %1991 = vadd.xlane.f32.xlu1 %v1990_v44  ;;  %v2152_v0 = vsel %vm698_vm2, %v1866_v1, 0.0  ;;  %v5877_v44 = vpop.permute.xlu0 %2928  ;;  %v1751_v2 = vmax.f32 %v1557_v39, 0.0  ;;  %v1307_v1 = vadd.f32 %v5673_v41, %v5414_v56  ;;  %v1752_v39 = vmax.f32 %v1562_v26, 0.0 }
 0x240   :  { %v2161_v31 = vsel %vm698_vm2, %v1869_v60, 0.0 }
 0x241   :  { %1988 = vadd.xlane.f32.xlu0 %v1987_v25  ;;  %v5879_v25 = vpop.permute.xlu1 %2932  ;;  %v1870_v41 = vmul.f32 %v5421_v23, %v1751_v2  ;;  %v1872_v2 = vmul.f32 %v5931_v42, %v1753_v63  ;;  %v1871_v47 = vmul.f32 %v5931_v42, %v1752_v39 }
 0x243   :  { %2147 = vadd.xlane.f32.xlu1 %v2146_v24  ;;  %v1699_v24 = vmax.f32 %v1297_v29, 0.0  ;;  %v2164_v56 = vsel %vm698_vm2, %v1870_v41, 0.0  ;;  %v2167_v26 = vsel %vm698_vm2, %v1871_v47, 0.0 }
 0x245   :  { %2144 = vadd.xlane.f32.xlu0 %v2143_v61  ;;  %v1698_v61 = vmax.f32 %v1292_v14, 0.0  ;;  %v1818_v48 = vmul.f32 %v5421_v23, %v1699_v24 }
 0x247   :  { %1997 = vadd.xlane.f32.xlu1 %v1996_v12  ;;  %v1817_v57 = vmul.f32 %v5421_v23, %v1698_v61  ;;  %v2008_v29 = vsel %vm698_vm2, %v1818_v48, 0.0  ;;  %v5922_v23 = vld [vmem:[%s7673_s6] ss:$0 sm:$0xff] }
 0x248   :  { %v1317_v4 = vadd.f32 %v5922_v23, %v5689_v53  ;;  %v1312_v20 = vadd.f32 %v5922_v23, %v5693_v3  ;;  %v1577_v53 = vadd.f32 %v5922_v23, %v5679_v30  ;;  %v1572_v3 = vadd.f32 %v5922_v23, %v5681_v40 }
 0x249   :  { %1994 = vadd.xlane.f32.xlu0 %v1993_v10  ;;  %v2005_v14 = vsel %vm698_vm2, %v1817_v57, 0.0  ;;  %v2170_v40 = vsel %vm698_vm2, %v1872_v2, 0.0  ;;  %v1327_v41 = vadd.f32 %v5922_v23, %v5705_v55  ;;  %v1322_v60 = vadd.f32 %v5922_v23, %v5709_v35 }
 0x24a   :  { %v1755_v30 = vmax.f32 %v1577_v53, 0.0  ;;  %v1754_v6 = vmax.f32 %v1572_v3, 0.0  ;;  %v1587_v55 = vadd.f32 %v5922_v23, %v5695_v37  ;;  %v1582_v35 = vadd.f32 %v5922_v23, %v5697_v49 }
 0x24b   :  { %2153 = vadd.xlane.f32.xlu1 %v2152_v0  ;;  %v1701_v0 = vmax.f32 %v1307_v1, 0.0 }
 0x24c   :  { %v1874_v63 = vmul.f32 %v5931_v42, %v1755_v30  ;;  %v1873_v39 = vmul.f32 %v5931_v42, %v1754_v6  ;;  %v1757_v53 = vmax.f32 %v1587_v55, 0.0  ;;  %v1756_v3 = vmax.f32 %v1582_v35, 0.0 }
 0x24d   :  { %2150 = vadd.xlane.f32.xlu0 %v2149_v28  ;;  %v1700_v28 = vmax.f32 %v1302_v33, 0.0  ;;  %v1820_v24 = vmul.f32 %v5931_v42, %v1701_v0 }
 0x24e   :  { %v2176_v2 = vsel %vm698_vm2, %v1874_v63, 0.0  ;;  %v2173_v37 = vsel %vm698_vm2, %v1873_v39, 0.0  ;;  %v1876_v30 = vmul.f32 %v5931_v42, %v1757_v53  ;;  %v1875_v6 = vmul.f32 %v5931_v42, %v1756_v3 }
 0x24f   :  { %v5889_v36 = vpop.xlane.xlu0 %1895  ;;  %2003 = vadd.xlane.f32.xlu1 %v2002_v52  ;;  %v1819_v61 = vmul.f32 %v5931_v42, %v1700_v28  ;;  %v2014_v1 = vsel %vm698_vm2, %v1820_v24, 0.0 }
 0x250   :  { %v5891_v43 = vpop.xlane.xlu1 %1892  ;;  %v2182_v55 = vsel %vm698_vm2, %v1876_v30, 0.0 }
 0x251   :  { %2000 = vadd.xlane.f32.xlu0 %v1999_v51  ;;  %v2011_v33 = vsel %vm698_vm2, %v1819_v61, 0.0 }
 0x253   :  { %2159 = vadd.xlane.f32.xlu1 %v2158_v50  ;;  %v1703_v50 = vmax.f32 %v1317_v4, 0.0 }
 0x254   :  { %v5901_v12 = vpop.xlane.xlu0 %1898  ;;  %v5903_v10 = vpop.xlane.xlu1 %1901 }
 0x255   :  { %2156 = vadd.xlane.f32.xlu0 %v2155_v21  ;;  %v1702_v21 = vmax.f32 %v1312_v20, 0.0  ;;  %v1822_v0 = vmul.f32 %v5931_v42, %v1703_v50  ;;  %v1337_v50 = vadd.f32 %v5922_v23, %v5721_v54 }
 0x257   :  { %2009 = vadd.xlane.f32.xlu1 %v2008_v29  ;;  %v1821_v28 = vmul.f32 %v5931_v42, %v1702_v21  ;;  %v2020_v4 = vsel %vm698_vm2, %v1822_v0, 0.0  ;;  %v1332_v21 = vadd.f32 %v5922_v23, %v5725_v45  ;;  %v1707_v54 = vmax.f32 %v1337_v50, 0.0 }
 0x258   :  { %v5913_v5 = vpop.xlane.xlu1 %2057  ;;  %v5915_v17 = vpop.xlane.xlu0 %2054 }
 0x259   :  { %2006 = vadd.xlane.f32.xlu0 %v2005_v14  ;;  %v2017_v20 = vsel %vm698_vm2, %v1821_v28, 0.0 }
 0x25b   :  { %2165 = vadd.xlane.f32.xlu1 %v2164_v56  ;;  %v1705_v56 = vmax.f32 %v1327_v41, 0.0  ;;  %v1706_v41 = vmax.f32 %v1332_v21, 0.0 }
 0x25c   :  { %v5935_v52 = vpop.xlane.xlu1 %1907  ;;  %v5937_v51 = vpop.xlane.xlu0 %1904 }
 0x25d   :  { %2162 = vadd.xlane.f32.xlu0 %v2161_v31  ;;  %v1704_v31 = vmax.f32 %v1322_v60, 0.0  ;;  %v1824_v49 = vmul.f32 %v5931_v42, %v1705_v56  ;;  %v1825_v35 = vmul.f32 %v5931_v42, %v1706_v41  ;;  %v1347_v56 = vadd.f32 %v5922_v23, %v5737_v32 }
 0x25f   :  { %2015 = vadd.xlane.f32.xlu1 %v2014_v1  ;;  %v1823_v47 = vmul.f32 %v5931_v42, %v1704_v31  ;;  %v2026_v45 = vsel %vm698_vm2, %v1824_v49, 0.0  ;;  %v1342_v31 = vadd.f32 %v5922_v23, %v5741_v15  ;;  %v1709_v32 = vmax.f32 %v1347_v56, 0.0  ;;  %v7697_v56 = vld [vmem:[#allocation6_spill] sm:$0xff] }
 0x260   :  { %v5947_v48 = vpop.xlane.xlu1 %2063  ;;  %v5949_v57 = vpop.xlane.xlu0 %2060  ;;  %v2029_v50 = vsel %vm698_vm2, %v1825_v35, 0.0 }
 0x261   :  { %2012 = vadd.xlane.f32.xlu0 %v2011_v33  ;;  %v2023_v60 = vsel %vm698_vm2, %v1823_v47, 0.0  ;;  %v1708_v47 = vmax.f32 %v1342_v31, 0.0  ;;  %v1612_v31 = vadd.f32 %v5922_v23, %v7697_v56 }
 0x263   :  { %2171 = vadd.xlane.f32.xlu1 %v2170_v40  ;;  %v1597_v40 = vadd.f32 %v5922_v23, %v5711_v38  ;;  %v2179_v38 = vsel %vm698_vm2, %v1875_v6, 0.0  ;;  %v1827_v41 = vmul.f32 %v5931_v42, %v1708_v47 }
 0x264   :  { %v5959_v29 = vpop.xlane.xlu1 %1913  ;;  %v5961_v14 = vpop.xlane.xlu0 %1910 }
 0x265   :  { %2168 = vadd.xlane.f32.xlu0 %v2167_v26  ;;  %v1592_v26 = vadd.f32 %v5922_v23, %v5713_v58  ;;  %v1759_v63 = vmax.f32 %v1597_v40, 0.0  ;;  %v1826_v58 = vmul.f32 %v5931_v42, %v1707_v54  ;;  %v1828_v54 = vmul.f32 %v5931_v42, %v1709_v32 }
 0x266   :  { %v1762_v32 = vmax.f32 %v1612_v31, 0.0 }
 0x267   :  { %2021 = vadd.xlane.f32.xlu1 %v2020_v4  ;;  %v1758_v39 = vmax.f32 %v1592_v26, 0.0  ;;  %v1878_v53 = vmul.f32 %v5931_v42, %v1759_v63  ;;  %v2032_v15 = vsel %vm698_vm2, %v1826_v58, 0.0  ;;  %v7696_v58 = vld [vmem:[#allocation5_spill] sm:$0xff] }
 0x268   :  { %v5971_v24 = vpop.xlane.xlu1 %2069  ;;  %v5973_v61 = vpop.xlane.xlu0 %2066  ;;  %v1617_v35 = vadd.f32 %v5922_v23, %v7696_v58 }
 0x269   :  { %2018 = vadd.xlane.f32.xlu0 %v2017_v20  ;;  %v1877_v3 = vmul.f32 %v5931_v42, %v1758_v39  ;;  %v2188_v26 = vsel %vm698_vm2, %v1878_v53, 0.0 }
 0x26b   :  { %2177 = vadd.xlane.f32.xlu1 %v2176_v2  ;;  %v1607_v2 = vadd.f32 %v5922_v23, %v5727_v59  ;;  %v2185_v59 = vsel %vm698_vm2, %v1877_v3, 0.0  ;;  %v2035_v3 = vsel %vm698_vm2, %v1827_v41, 0.0 }
 0x26c   :  { %v5983_v1 = vpop.xlane.xlu1 %1919  ;;  %v5985_v33 = vpop.xlane.xlu0 %1916 }
 0x26d   :  { %2174 = vadd.xlane.f32.xlu0 %v2173_v37  ;;  %v7695_v37 = vld [vmem:[#allocation4_spill] sm:$0xff]  ;;  %v1761_v6 = vmax.f32 %v1607_v2, 0.0 }
 0x26e   :  { %v1602_v49 = vadd.f32 %v5922_v23, %v7695_v37 }
 0x26f   :  { %2027 = vadd.xlane.f32.xlu1 %v2026_v45  ;;  %v1357_v45 = vadd.f32 %v5922_v23, %v5753_v9 }
 0x270   :  { %v5995_v0 = vpop.xlane.xlu1 %2075  ;;  %v5997_v28 = vpop.xlane.xlu0 %2072  ;;  %v1760_v40 = vmax.f32 %v1602_v49, 0.0  ;;  %v1763_v49 = vmax.f32 %v1617_v35, 0.0 }
 0x271   :  { %2024 = vadd.xlane.f32.xlu0 %v2023_v60  ;;  %v1352_v60 = vadd.f32 %v5922_v23, %v5757_v34  ;;  %v1711_v9 = vmax.f32 %v1357_v45, 0.0  ;;  %v2038_v34 = vsel %vm698_vm2, %v1828_v54, 0.0  ;;  %v1881_v45 = vmul.f32 %v5931_v42, %v1762_v32 }
 0x272   :  { %v1882_v41 = vmul.f32 %v5931_v42, %v1763_v49 }
 0x273   :  { %2183 = vadd.xlane.f32.xlu1 %v2182_v55  ;;  %v1880_v55 = vmul.f32 %v5931_v42, %v1761_v6  ;;  %v1710_v53 = vmax.f32 %v1352_v60, 0.0  ;;  %v7698_v60 = vld [vmem:[#allocation7_spill] sm:$0xff] }
 0x274   :  { %v6007_v4 = vpop.xlane.xlu1 %1925  ;;  %v6009_v20 = vpop.xlane.xlu0 %1922  ;;  %v2200_v32 = vsel %vm698_vm2, %v1882_v41, 0.0 }
 0x275   :  { %2180 = vadd.xlane.f32.xlu0 %v2179_v38  ;;  %v1879_v38 = vmul.f32 %v5931_v42, %v1760_v40  ;;  %v2194_v47 = vsel %vm698_vm2, %v1880_v55, 0.0  ;;  %v1829_v6 = vmul.f32 %v5931_v42, %v1710_v53  ;;  %v1367_v40 = vadd.f32 %v5922_v23, %v5769_v13 }
 0x276   :  { %v1627_v55 = vadd.f32 %v5922_v23, %v7698_v60 }
 0x277   :  { %2033 = vadd.xlane.f32.xlu1 %v2032_v15  ;;  %v2191_v15 = vsel %vm698_vm2, %v1879_v38, 0.0  ;;  %v7699_v38 = vld [vmem:[#allocation8_spill] sm:$0xff]  ;;  %v1713_v13 = vmax.f32 %v1367_v40, 0.0  ;;  %v2041_v56 = vsel %vm698_vm2, %v1829_v6, 0.0  ;;  %v2197_v40 = vsel %vm698_vm2, %v1881_v45, 0.0 }
 0x278   :  { %v6019_v21 = vpop.xlane.xlu1 %2081  ;;  %v6021_v30 = vpop.xlane.xlu0 %2078  ;;  %v1622_v58 = vadd.f32 %v5922_v23, %v7699_v38  ;;  %v1765_v53 = vmax.f32 %v1627_v55, 0.0 }
 0x279   :  { %2030 = vadd.xlane.f32.xlu0 %v2029_v50  ;;  %v1830_v50 = vmul.f32 %v5931_v42, %v1711_v9 }
 0x27a   :  { %v1884_v55 = vmul.f32 %v5931_v42, %v1765_v53 }
 0x27b   :  { %2189 = vadd.xlane.f32.xlu1 %v2188_v26  ;;  %v1362_v26 = vadd.f32 %v5922_v23, %v5773_v7  ;;  %v2044_v7 = vsel %vm698_vm2, %v1830_v50, 0.0  ;;  %v7701_v50 = vld [vmem:[#allocation10_spill] sm:$0xff] }
 0x27c   :  { %v6031_v63 = vpop.xlane.xlu1 %1931  ;;  %v6033_v39 = vpop.xlane.xlu0 %1928  ;;  %v1632_v6 = vadd.f32 %v5922_v23, %v7701_v50  ;;  %v6106_v50 = vstv %s7675_s8 }
 0x27d   :  { %2186 = vadd.xlane.f32.xlu0 %v2185_v59  ;;  %v1712_v35 = vmax.f32 %v1362_v26, 0.0 }
 0x27f   :  { %2039 = vadd.xlane.f32.xlu1 %v2038_v34  ;;  %v1764_v34 = vmax.f32 %v1622_v58, 0.0  ;;  %v1647_v58 = vadd.f32 %v5922_v23, %v5787_v8  ;;  %v1657_v8 = vadd.f32 %v5922_v23, %v5799_v11 }
 0x280   :  { %v6043_v2 = vpop.xlane.xlu1 %2087  ;;  %v6045_v37 = vpop.xlane.xlu0 %2084 }
 0x281   :  { %2036 = vadd.xlane.f32.xlu0 %v2035_v3  ;;  %v7700_v3 = vld [vmem:[#allocation9_spill] sm:$0xff]  ;;  %v1883_v38 = vmul.f32 %v5931_v42, %v1764_v34  ;;  %v1769_v34 = vmax.f32 %v1647_v58, 0.0 }
 0x282   :  { %v1637_v49 = vadd.f32 %v5922_v23, %v7700_v3 }
 0x283   :  { %2195 = vadd.xlane.f32.xlu1 %v2194_v47  ;;  %v1832_v47 = vmul.f32 %v5931_v42, %v1713_v13  ;;  %v1766_v13 = vmax.f32 %v1632_v6, 0.0 }
 0x284   :  { %v6055_v59 = vpop.xlane.xlu1 %1937  ;;  %v6057_v54 = vpop.xlane.xlu0 %1934  ;;  %v1767_v41 = vmax.f32 %v1637_v49, 0.0  ;;  %v2206_v49 = vsel %vm698_vm2, %v1884_v55, 0.0  ;;  %v1771_v55 = vmax.f32 %v1657_v8, 0.0 }
 0x285   :  { %2192 = vadd.xlane.f32.xlu0 %v2191_v15  ;;  %v1831_v15 = vmul.f32 %v5931_v42, %v1712_v35  ;;  %v1642_v35 = vadd.f32 %v5922_v23, %v5789_v46  ;;  %v2050_v45 = vsel %vm698_vm2, %v1832_v47, 0.0  ;;  %v1885_v46 = vmul.f32 %v5931_v42, %v1766_v13 }
 0x286   :  { %v1886_v53 = vmul.f32 %v5931_v42, %v1767_v41  ;;  %v1652_v47 = vadd.f32 %v5922_v23, %v5801_v62 }
 0x287   :  { %2045 = vadd.xlane.f32.xlu1 %v2044_v7  ;;  %v2047_v7 = vsel %vm698_vm2, %v1831_v15, 0.0  ;;  %v2203_v15 = vsel %vm698_vm2, %v1883_v38, 0.0  ;;  %v2230_v38 = vadd.f32 %v6106_v50, %v5889_v36  ;;  %v2209_v58 = vsel %vm698_vm2, %v1885_v46, 0.0 }
 0x288   :  { %v6067_v31 = vpop.xlane.xlu1 %2093  ;;  %v6069_v9 = vpop.xlane.xlu0 %2090  ;;  %v2212_v41 = vsel %vm698_vm2, %v1886_v53, 0.0  ;;  %v1770_v23 = vmax.f32 %v1652_v47, 0.0  ;;  %v2232_v36 = vadd.f32 %v6106_v50, %v5903_v10  ;;  %v6142_v10 = vadd.f32 %v6106_v50, %v5901_v12 }
 0x289   :  { %2042 = vadd.xlane.f32.xlu0 %v2041_v56  ;;  %v2567_v8 = vmul.f32 1.442695, %v2230_v38  ;;  %v6156_v12 = vadd.f32 %v6106_v50, %v5915_v17  ;;  %vm2342_vm3 = vcmp.gt.f32.partialorder %v2230_v38, 0.0 }
 0x28a   :  { %vm2344_vm5 = vcmp.gt.f32.partialorder %v2232_v36, 0.0  ;;  %vm2343_vm6 = vcmp.gt.f32.partialorder %v6142_v10, 0.0 }
 0x28b   :  { %2201 = vadd.xlane.f32.xlu1 %v2200_v32  ;;  %v1768_v32 = vmax.f32 %v1642_v35, 0.0  ;;  %4532 = vpow2.f32 %v2567_v8  ;;  %v6170_v8 = vadd.f32 %v6106_v50, %v5937_v51  ;;  %v6184_v51 = vadd.f32 %v6106_v50, %v5949_v57 }
 0x28c   :  { %v6079_v26 = vpop.xlane.xlu1 %1943  ;;  %v6081_v60 = vpop.xlane.xlu0 %1940  ;;  %vm2395_vm8 = vcmp.gt.f32.partialorder %v6156_v12, 0.0 }
 0x28d   :  { %2198 = vadd.xlane.f32.xlu0 %v2197_v40  ;;  %v1888_v40 = vmul.f32 %v5931_v42, %v1769_v34  ;;  %v1887_v62 = vmul.f32 %v5931_v42, %v1768_v32  ;;  %v1889_v34 = vmul.f32 %v5931_v42, %v1770_v23  ;;  %v2569_v23 = vmul.f32 1.442695, %v6142_v10 }
 0x28e   :  { %vm2345_vm11 = vcmp.gt.f32.partialorder %v6170_v8, 0.0  ;;  %vm2397_vm13 = vcmp.gt.f32.partialorder %v6184_v51, 0.0 }
 0x28f   :  { %2051 = vadd.xlane.f32.xlu1 %v2050_v45  ;;  %v1890_v45 = vmul.f32 %v5931_v42, %v1771_v55  ;;  %v2218_v53 = vsel %vm698_vm2, %v1888_v40, 0.0  ;;  %v6137_v42 = vadd.f32 %v6106_v50, %v5913_v5  ;;  %v2221_v40 = vsel %vm698_vm2, %v1889_v34, 0.0 }
 0x290   :  { %v6091_v56 = vpop.xlane.xlu1 %2099  ;;  %v6093_v3 = vpop.xlane.xlu0 %2096  ;;  %v6151_v5 = vadd.f32 %v6106_v50, %v5935_v52  ;;  %v2673_v52 = vmul.f32 1.442695, %v6156_v12 }
 0x291   :  { %2048 = vadd.xlane.f32.xlu0 %v2047_v7  ;;  %v2229_v7 = vadd.f32 %v6106_v50, %v5891_v43  ;;  %v2571_v43 = vmul.f32 1.442695, %v2232_v36  ;;  %vm2396_vm7 = vcmp.gt.f32.partialorder %v6137_v42, 0.0 }
 0x292   :  { %v2575_v34 = vmul.f32 1.442695, %v6151_v5  ;;  %vm2346_vm9 = vcmp.gt.f32.partialorder %v6151_v5, 0.0 }
 0x293   :  { %2207 = vadd.xlane.f32.xlu1 %v2206_v49  ;;  %v2215_v49 = vsel %vm698_vm2, %v1887_v62, 0.0  ;;  %v2565_v47 = vmul.f32 1.442695, %v2229_v7  ;;  %v2675_v62 = vmul.f32 1.442695, %v6137_v42  ;;  %vm2341_vm4 = vcmp.gt.f32.partialorder %v2229_v7, 0.0 }
 0x294   :  { %v6108_v6 = vpop.xlane.xlu1 %1949  ;;  %v6110_v11 = vpop.xlane.xlu0 %1946 }
 0x295   :  { %2204 = vadd.xlane.f32.xlu0 %v2203_v15  ;;  %v2224_v15 = vsel %vm698_vm2, %v1890_v45, 0.0  ;;  %4534 = vpow2.f32 %v2565_v47  ;;  %v4533_v17 = vpop.eup %4532 }
 0x296   :  { %4536 = vpow2.f32 %v2571_v43 }
 0x297   :  { %2213 = vadd.xlane.f32.xlu1 %v2212_v41  ;;  %4538 = vpow2.f32 %v2675_v62  ;;  %v2573_v62 = vmul.f32 1.442695, %v6170_v8 }
 0x298   :  { %v6118_v13 = vpop.xlane.xlu1 %2105  ;;  %v6120_v35 = vpop.xlane.xlu0 %2102  ;;  %4540 = vpow2.f32 %v2569_v23 }
 0x299   :  { %2210 = vadd.xlane.f32.xlu0 %v2209_v58  ;;  %4542 = vpow2.f32 %v2575_v34  ;;  %v6193_v34 = vadd.f32 %v6106_v50, %v5971_v24 }
 0x29a   :  { %4544 = vpow2.f32 %v2673_v52 }
 0x29b   :  { %2219 = vadd.xlane.f32.xlu1 %v2218_v53  ;;  %v6164_v53 = vadd.f32 %v6106_v50, %v5947_v48  ;;  %v6179_v48 = vadd.f32 %v6106_v50, %v5959_v29  ;;  %v2456_v29 = vadd.f32 1.0, %v2232_v36  ;;  %v2508_v36 = vadd.f32 1.0, %v6137_v42 }
 0x29c   :  { %v6130_v46 = vpop.xlane.xlu1 %1955  ;;  %v6132_v32 = vpop.xlane.xlu0 %1952  ;;  %vm2400_vm14 = vcmp.gt.f32.partialorder %v6193_v34, 0.0 }
 0x29d   :  { %2216 = vadd.xlane.f32.xlu0 %v2215_v49  ;;  %v2679_v43 = vmul.f32 1.442695, %v6164_v53  ;;  %vm2398_vm10 = vcmp.gt.f32.partialorder %v6164_v53, 0.0  ;;  %vm2348_vm12 = vcmp.gt.f32.partialorder %v6179_v48, 0.0 }
 0x29f   :  { %2225 = vadd.xlane.f32.xlu1 %v2224_v15  ;;  %v2454_v15 = vadd.f32 1.0, %v2230_v38  ;;  %4546 = vpow2.f32 %v2679_v43  ;;  %v2579_v38 = vmul.f32 1.442695, %v6179_v48 }
 0x2a0   :  { %v6144_v55 = vpop.xlane.xlu1 %2111  ;;  %v6146_v41 = vpop.xlane.xlu0 %2108  ;;  %4548 = vpow2.f32 %v2573_v62 }
 0x2a1   :  { %2222 = vadd.xlane.f32.xlu0 %v2221_v40  ;;  %v4535_v40 = vpop.eup %4534  ;;  %v2790_v23 = vsel %vm2342_vm3, %v2454_v15, %v4533_v17  ;;  %v2677_v17 = vmul.f32 1.442695, %v6184_v51  ;;  %4550 = vpow2.f32 %v2579_v38 }
 0x2a2   :  { %v2942_v57 = vmul.f32 %v5833_v27, %v2790_v23 }
 0x2a3   :  { %4552 = vpow2.f32 %v2677_v17  ;;  %v2458_v17 = vadd.f32 1.0, %v6151_v5 }
 0x2a4   :  { %v6158_v58 = vpop.xlane.xlu1 %1961  ;;  %v6160_v45 = vpop.xlane.xlu0 %1958 }
 0x2a5   :  { %7702 = vst [vmem:[#allocation4_spill] sm:$0xff] %v6158_v58  ;;  %7703 = vst [vmem:[#allocation5_spill] sm:$0xff] %v6160_v45  ;;  %v4537_v45 = vpop.eup %4536 }
 0x2a6   :  { %v2792_v15 = vsel %vm2344_vm5, %v2456_v29, %v4537_v45  ;;  %v6219_v29 = vadd.f32 %v6106_v50, %v5973_v61  ;;  %v6232_v61 = vadd.f32 %v6106_v50, %v5985_v33  ;;  %v2457_v33 = vadd.f32 1.0, %v6170_v8 }
 0x2a7   :  { %v2944_v45 = vmul.f32 %v5861_v19, %v2792_v15  ;;  %v6275_v8 = vadd.f32 %v6106_v50, %v6009_v20  ;;  %v2512_v20 = vadd.f32 1.0, %v6193_v34 }
 0x2a8   :  { %v6172_v49 = vpop.xlane.xlu1 %2117  ;;  %v6174_v47 = vpop.xlane.xlu0 %2114  ;;  %vm2399_vm2 = vcmp.gt.f32.partialorder %v6219_v29, 0.0  ;;  %vm2349_vm3 = vcmp.gt.f32.partialorder %v6232_v61, 0.0 }
 0x2a9   :  { %7704 = vst [vmem:[#allocation6_spill] sm:$0xff] %v6172_v49  ;;  %7705 = vst [vmem:[#allocation7_spill] sm:$0xff] %v6174_v47  ;;  %v2453_v47 = vadd.f32 1.0, %v2229_v7  ;;  %v6199_v7 = vadd.f32 %v6106_v50, %v5961_v14  ;;  %v2455_v14 = vadd.f32 1.0, %v6142_v10 }
 0x2ab   :  { %v2789_v52 = vsel %vm2341_vm4, %v2453_v47, %v4535_v40  ;;  %v2683_v47 = vmul.f32 1.442695, %v6193_v34  ;;  %v6210_v40 = vadd.f32 %v6106_v50, %v5983_v1  ;;  %v2577_v23 = vmul.f32 1.442695, %v6199_v7 }
 0x2ac   :  { %v6186_v49 = vpop.xlane.xlu1 %1967  ;;  %v2941_v62 = vmul.f32 %v5845_v16, %v2789_v52  ;;  %vm2347_vm15 = vcmp.gt.f32.partialorder %v6199_v7, 0.0 }
 0x2ad   :  { %7706 = vst [vmem:[#allocation8_spill] sm:$0xff] %v6186_v49  ;;  %4554 = vpow2.f32 %v2683_v47  ;;  %v2583_v15 = vmul.f32 1.442695, %v6210_v40  ;;  %v2681_v47 = vmul.f32 1.442695, %v6219_v29  ;;  %vm2350_vm0 = vcmp.gt.f32.partialorder %v6210_v40, 0.0 }
 0x2ae   :  { %v6188_v58 = vpop.xlane.xlu0 %1964  ;;  %4556 = vpow2.f32 %v2577_v23  ;;  %v2581_v23 = vmul.f32 1.442695, %v6232_v61 }
 0x2af   :  { %7707 = vst [vmem:[#allocation9_spill] sm:$0xff] %v6188_v58  ;;  %v4539_v58 = vpop.eup %4538  ;;  %4558 = vpow2.f32 %v2583_v15  ;;  %v2509_v15 = vadd.f32 1.0, %v6184_v51  ;;  %v6295_v51 = vadd.f32 %v6106_v50, %v6021_v30  ;;  %v2462_v30 = vadd.f32 1.0, %v6210_v40 }
 0x2b0   :  { %v6202_v43 = vpop.xlane.xlu1 %2123  ;;  %3169 = vperm.xlu1 %4531, %v2942_v57   ;;  %v4541_v24 = vpop.eup %4540  ;;  %v2844_v38 = vsel %vm2396_vm7, %v2508_v36, %v4539_v58  ;;  %v2507_v58 = vadd.f32 1.0, %v6156_v12  ;;  %v6238_v36 = vadd.f32 %v6106_v50, %v5995_v0  ;;  %4560 = vpow2.f32 %v2681_v47 }
 0x2b1   :  { %v4543_v57 = vpop.eup %4542  ;;  %v2791_v42 = vsel %vm2343_vm6, %v2455_v14, %v4541_v24  ;;  %v2996_v10 = vmul.f32 %v5879_v25, %v2844_v38  ;;  %4562 = vpow2.f32 %v2581_v23  ;;  %v2459_v23 = vadd.f32 1.0, %v6199_v7 }
 0x2b2   :  { %v6204_v49 = vpop.xlane.xlu0 %2120  ;;  %v4545_v52 = vpop.eup %4544  ;;  %v2943_v14 = vmul.f32 %v5847_v22, %v2791_v42  ;;  %v2687_v42 = vmul.f32 1.442695, %v6238_v36  ;;  %v6322_v40 = vadd.f32 %v6106_v50, %v6033_v39  ;;  %vm2402_vm4 = vcmp.gt.f32.partialorder %v6238_v36, 0.0 }
 0x2b3   :  { %7708 = vst [vmem:[#allocation10_spill] sm:$0xff] %v6204_v49  ;;  %v4547_v24 = vpop.eup %4546  ;;  %v2843_v0 = vsel %vm2395_vm8, %v2507_v58, %v4545_v52  ;;  %vm2351_vm7 = vcmp.gt.f32.partialorder %v6275_v8, 0.0 }
 0x2b4   :  { %v6222_v1 = vpop.xlane.xlu1 %1973  ;;  %3175 = vperm.xlu1 %4531, %v2944_v45   ;;  %v2794_v45 = vsel %vm2346_vm9, %v2458_v17, %v4543_v57  ;;  %v4549_v38 = vpop.eup %4548  ;;  %v6255_v57 = vadd.f32 %v6106_v50, %v5997_v28  ;;  %v6260_v17 = vadd.f32 %v6106_v50, %v6007_v4  ;;  %v2460_v28 = vadd.f32 1.0, %v6179_v48 }
 0x2b5   :  { %v2946_v12 = vmul.f32 %v5877_v44, %v2794_v45  ;;  %v4551_v58 = vpop.eup %4550  ;;  %v2793_v4 = vsel %vm2345_vm11, %v2457_v33, %v4549_v38  ;;  %4564 = vpow2.f32 %v2687_v42  ;;  %vm2403_vm9 = vcmp.gt.f32.partialorder %v6295_v51, 0.0 }
 0x2b6   :  { %v6224_v49 = vpop.xlane.xlu0 %1970  ;;  %v4553_v45 = vpop.eup %4552  ;;  %v2587_v48 = vmul.f32 1.442695, %v6260_v17  ;;  %v2945_v38 = vmul.f32 %v5865_v18, %v2793_v4  ;;  %vm2401_vm5 = vcmp.gt.f32.partialorder %v6255_v57, 0.0  ;;  %vm2352_vm6 = vcmp.gt.f32.partialorder %v6260_v17, 0.0 }
 0x2b7   :  { %7709 = vst [vmem:[#allocation13_spill] sm:$0xff] %v6224_v49  ;;  %3166 = vperm.xlu0 %4530, %v2941_v62   ;;  %v2510_v62 = vadd.f32 1.0, %v6164_v53  ;;  %v2995_v53 = vmul.f32 %v5877_v44, %v2843_v0  ;;  %v2796_v0 = vsel %vm2348_vm12, %v2460_v28, %v4551_v58  ;;  %v4555_v33 = vpop.eup %4554  ;;  %v2585_v58 = vmul.f32 1.442695, %v6275_v8 }
 0x2b8   :  { %v6245_v49 = vpop.xlane.xlu1 %2129  ;;  %3331 = vperm.xlu1 %4531, %v2996_v10   ;;  %v6301_v28 = vadd.f32 %v6106_v50, %v6031_v63  ;;  %v2848_v4 = vsel %vm2400_vm14, %v2512_v20, %v4555_v33  ;;  %v2689_v63 = vmul.f32 1.442695, %v6295_v51  ;;  %v6317_v20 = vadd.f32 %v6106_v50, %v6043_v2 }
 0x2b9   :  { %v2846_v52 = vsel %vm2398_vm10, %v2510_v62, %v4547_v24  ;;  %v2685_v24 = vmul.f32 1.442695, %v6255_v57  ;;  %v6281_v62 = vadd.f32 %v6106_v50, %v6019_v21  ;;  %v4557_v21 = vpop.eup %4556  ;;  %v3000_v7 = vmul.f32 %v5861_v19, %v2848_v4 }
 0x2ba   :  { %v6247_v5 = vpop.xlane.xlu0 %2126  ;;  %v2998_v47 = vmul.f32 %v5833_v27, %v2846_v52  ;;  %v2845_v52 = vsel %vm2397_vm13, %v2509_v15, %v4553_v45  ;;  %v4559_v15 = vpop.eup %4558  ;;  %v2591_v33 = vmul.f32 1.442695, %v6301_v28  ;;  %v2695_v4 = vmul.f32 1.442695, %v6317_v20 }
 0x2bb   :  { %3172 = vperm.xlu0 %4530, %v2943_v14   ;;  %4566 = vpow2.f32 %v2685_v24  ;;  %v2691_v34 = vmul.f32 1.442695, %v6281_v62  ;;  %v2997_v45 = vmul.f32 %v5845_v16, %v2845_v52  ;;  %v2511_v24 = vadd.f32 1.0, %v6219_v29 }
 0x2bc   :  { %v6268_v10 = vpop.xlane.xlu1 %1979  ;;  %3181 = vperm.xlu1 %4531, %v2946_v12   ;;  %4568 = vpow2.f32 %v2587_v48  ;;  %v2795_v48 = vsel %vm2347_vm15, %v2459_v23, %v4557_v21  ;;  %v2798_v52 = vsel %vm2350_vm0, %v2462_v30, %v4559_v15  ;;  %v2514_v29 = vadd.f32 1.0, %v6238_v36 }
 0x2bd   :  { %4570 = vpow2.f32 %v2585_v58  ;;  %v2947_v23 = vmul.f32 %v5879_v25, %v2795_v48  ;;  %v2461_v58 = vadd.f32 1.0, %v6232_v61  ;;  %v2950_v39 = vmul.f32 %v5847_v22, %v2798_v52 }
 0x2be   :  { %v6270_v14 = vpop.xlane.xlu0 %1976  ;;  %4572 = vpow2.f32 %v2691_v34  ;;  %v6337_v61 = vadd.f32 %v6106_v50, %v6055_v59  ;;  %v2589_v30 = vmul.f32 1.442695, %v6322_v40  ;;  %vm2404_vm8 = vcmp.gt.f32.partialorder %v6281_v62, 0.0 }
 0x2bf   :  { %3328 = vperm.xlu0 %4530, %v2995_v53   ;;  %v2948_v53 = vmul.f32 %v5845_v16, %v2796_v0  ;;  %4574 = vpow2.f32 %v2689_v63  ;;  %v2513_v63 = vadd.f32 1.0, %v6255_v57  ;;  %v6378_v57 = vadd.f32 %v6106_v50, %v6079_v26 }
 0x2c0   :  { %v6288_v12 = vpop.xlane.xlu1 %2135  ;;  %3337 = vperm.xlu1 %4531, %v2998_v47   ;;  %4576 = vpow2.f32 %v2591_v33  ;;  %v2595_v52 = vmul.f32 1.442695, %v6337_v61  ;;  %vm2354_vm10 = vcmp.gt.f32.partialorder %v6301_v28, 0.0  ;;  %vm2353_vm11 = vcmp.gt.f32.partialorder %v6322_v40, 0.0 }
 0x2c1   :  { %4578 = vpow2.f32 %v2695_v4  ;;  %vm2406_vm12 = vcmp.gt.f32.partialorder %v6317_v20, 0.0  ;;  %vm2356_vm14 = vcmp.gt.f32.partialorder %v6337_v61, 0.0 }
 0x2c2   :  { %v6290_v42 = vpop.xlane.xlu0 %2132  ;;  %4580 = vpow2.f32 %v2589_v30 }
 0x2c3   :  { %3178 = vperm.xlu0 %4530, %v2945_v38   ;;  %v4561_v38 = vpop.eup %4560  ;;  %4582 = vpow2.f32 %v2595_v52 }
 0x2c4   :  { %v6307_v47 = vpop.xlane.xlu1 %1985  ;;  %3187 = vperm.xlu1 %4531, %v2948_v53   ;;  %v2847_v2 = vsel %vm2399_vm2, %v2511_v24, %v4561_v38  ;;  %v6342_v24 = vadd.f32 %v6106_v50, %v6045_v37  ;;  %v6355_v37 = vadd.f32 %v6106_v50, %v6067_v31  ;;  %vm2358_vm2 = vcmp.gt.f32.partialorder %v6378_v57, 0.0 }
 0x2c5   :  { %v2999_v36 = vmul.f32 %v5847_v22, %v2847_v2 }
 0x2c6   :  { %v6309_v0 = vpop.xlane.xlu0 %1982  ;;  %v2699_v30 = vmul.f32 1.442695, %v6355_v37  ;;  %vm2405_vm13 = vcmp.gt.f32.partialorder %v6342_v24, 0.0  ;;  %vm2408_vm15 = vcmp.gt.f32.partialorder %v6355_v37, 0.0 }
 0x2c7   :  { %7710 = vst [vmem:[#allocation14_spill] sm:$0xff] %v6309_v0  ;;  %3334 = vperm.xlu0 %4530, %v2997_v45   ;;  %v4563_v0 = vpop.eup %4562 }
 0x2c8   :  { %v4565_v21 = vpop.eup %4564  ;;  %v6327_v53 = vpop.xlane.xlu1 %2141  ;;  %3343 = vperm.xlu1 %4531, %v3000_v7   ;;  %v2797_v15 = vsel %vm2349_vm3, %v2461_v58, %v4563_v0  ;;  %v2464_v0 = vadd.f32 1.0, %v6260_v17  ;;  %v2693_v17 = vmul.f32 1.442695, %v6342_v24 }
 0x2c9   :  { %v4567_v45 = vpop.eup %4566  ;;  %v2850_v48 = vsel %vm2402_vm4, %v2514_v29, %v4565_v21  ;;  %v2949_v33 = vmul.f32 %v5833_v27, %v2797_v15 }
 0x2ca   :  { %v6329_v34 = vpop.xlane.xlu0 %2138  ;;  %v4569_v38 = vpop.eup %4568  ;;  %v3002_v21 = vmul.f32 %v5877_v44, %v2850_v48  ;;  %v2849_v31 = vsel %vm2401_vm5, %v2513_v63, %v4567_v45  ;;  %4584 = vpow2.f32 %v2693_v17  ;;  %v6385_v63 = vadd.f32 %v6106_v50, %v6069_v9 }
 0x2cb   :  { %3184 = vperm.xlu0 %4530, %v2947_v23   ;;  %v6361_v23 = vadd.f32 %v6106_v50, %v6057_v54  ;;  %v4571_v58 = vpop.eup %4570  ;;  %v2800_v2 = vsel %vm2352_vm6, %v2464_v0, %v4569_v38  ;;  %v2516_v54 = vadd.f32 1.0, %v6281_v62  ;;  %v3001_v48 = vmul.f32 %v5865_v18, %v2849_v31 }
 0x2cc   :  { %v6347_v7 = vpop.xlane.xlu1 %1991  ;;  %3193 = vperm.xlu1 %4531, %v2950_v39   ;;  %v4573_v29 = vpop.eup %4572  ;;  %v2463_v39 = vadd.f32 1.0, %v6275_v8  ;;  %v2466_v17 = vadd.f32 1.0, %v6301_v28  ;;  %4586 = vpow2.f32 %v2699_v30  ;;  %v2599_v9 = vmul.f32 1.442695, %v6378_v57 }
 0x2cd   :  { %v2593_v45 = vmul.f32 1.442695, %v6361_v23  ;;  %v4575_v38 = vpop.eup %4574  ;;  %v2852_v62 = vsel %vm2404_vm8, %v2516_v54, %v4573_v29  ;;  %v2697_v31 = vmul.f32 1.442695, %v6385_v63  ;;  %v6407_v29 = vadd.f32 %v6106_v50, %v6081_v60 }
 0x2ce   :  { %v6349_v59 = vpop.xlane.xlu0 %1988  ;;  %v2799_v0 = vsel %vm2351_vm7, %v2463_v39, %v4571_v58  ;;  %v4577_v26 = vpop.eup %4576  ;;  %v3004_v8 = vmul.f32 %v5845_v16, %v2852_v62  ;;  %v6420_v60 = vadd.f32 %v6106_v50, %v6108_v6  ;;  %vm2355_vm0 = vcmp.gt.f32.partialorder %v6361_v23, 0.0 }
 0x2cf   :  { %3340 = vperm.xlu0 %4530, %v2999_v36   ;;  %v2952_v36 = vmul.f32 %v5865_v18, %v2800_v2  ;;  %v6399_v2 = vadd.f32 %v6106_v50, %v6091_v56  ;;  %4588 = vpow2.f32 %v2593_v45  ;;  %v2951_v58 = vmul.f32 %v5861_v19, %v2799_v0  ;;  %v4579_v56 = vpop.eup %4578 }
 0x2d0   :  { %v6369_v4 = vpop.xlane.xlu1 %2147  ;;  %3349 = vperm.xlu1 %4531, %v3002_v21   ;;  %v2802_v39 = vsel %vm2354_vm10, %v2466_v17, %v4577_v26  ;;  %v4581_v45 = vpop.eup %4580  ;;  %4590 = vpow2.f32 %v2599_v9  ;;  %v2597_v0 = vmul.f32 1.442695, %v6407_v29  ;;  %v6429_v26 = vadd.f32 %v6106_v50, %v6093_v3 }
 0x2d1   :  { %4592 = vpow2.f32 %v2697_v31  ;;  %v4583_v17 = vpop.eup %4582  ;;  %v2603_v31 = vmul.f32 1.442695, %v6420_v60  ;;  %v6442_v3 = vadd.f32 %v6106_v50, %v6110_v11  ;;  %vm2407_vm3 = vcmp.gt.f32.partialorder %v6385_v63, 0.0 }
 0x2d2   :  { %v6371_v15 = vpop.xlane.xlu0 %2144  ;;  %vm2410_vm4 = vcmp.gt.f32.partialorder %v6399_v2, 0.0  ;;  %vm2357_vm5 = vcmp.gt.f32.partialorder %v6407_v29, 0.0  ;;  %vm2360_vm6 = vcmp.gt.f32.partialorder %v6420_v60, 0.0  ;;  %vm2409_vm7 = vcmp.gt.f32.partialorder %v6429_v26, 0.0 }
 0x2d3   :  { %3190 = vperm.xlu0 %4530, %v2949_v33   ;;  %v2515_v33 = vadd.f32 1.0, %v6295_v51  ;;  %v2465_v51 = vadd.f32 1.0, %v6322_v40  ;;  %vm2359_vm8 = vcmp.gt.f32.partialorder %v6442_v3, 0.0 }
 0x2d4   :  { %v6391_v52 = vpop.xlane.xlu1 %1997  ;;  %3199 = vperm.xlu1 %4531, %v2952_v36   ;;  %v2518_v36 = vadd.f32 1.0, %v6317_v20 }
 0x2d5   :  { %v2851_v54 = vsel %vm2403_vm9, %v2515_v33, %v4575_v38  ;;  %v2954_v38 = vmul.f32 %v5879_v25, %v2802_v39  ;;  %v2801_v20 = vsel %vm2353_vm11, %v2465_v51, %v4581_v45  ;;  %v2517_v39 = vadd.f32 1.0, %v6342_v24 }
 0x2d6   :  { %v6393_v21 = vpop.xlane.xlu0 %1994  ;;  %v3003_v62 = vmul.f32 %v5879_v25, %v2851_v54  ;;  %v2854_v33 = vsel %vm2406_vm12, %v2518_v36, %v4579_v56  ;;  %v6448_v54 = vadd.f32 %v6106_v50, %v6118_v13  ;;  %v2701_v45 = vmul.f32 1.442695, %v6429_v26 }
 0x2d7   :  { %3346 = vperm.xlu0 %4530, %v3001_v48   ;;  %v2703_v48 = vmul.f32 1.442695, %v6399_v2  ;;  %v3006_v40 = vmul.f32 %v5847_v22, %v2854_v33  ;;  %v2953_v36 = vmul.f32 %v5877_v44, %v2801_v20  ;;  %v2467_v51 = vadd.f32 1.0, %v6361_v23 }
 0x2d8   :  { %v6412_v30 = vpop.xlane.xlu1 %2153  ;;  %3355 = vperm.xlu1 %4531, %v3004_v8   ;;  %v4585_v8 = vpop.eup %4584  ;;  %v6465_v33 = vadd.f32 %v6106_v50, %v6120_v35  ;;  %v6470_v20 = vadd.f32 %v6106_v50, %v6130_v46  ;;  %v2470_v35 = vadd.f32 1.0, %v6378_v57  ;;  %v6485_v23 = vadd.f32 %v6106_v50, %v6132_v32 }
 0x2d9   :  { %4594 = vpow2.f32 %v2703_v48  ;;  %v4587_v56 = vpop.eup %4586  ;;  %v2853_v13 = vsel %vm2405_vm13, %v2517_v39, %v4585_v8  ;;  %v2522_v32 = vadd.f32 1.0, %v6399_v2  ;;  %vm2412_vm9 = vcmp.gt.f32.partialorder %v6448_v54, 0.0 }
 0x2da   :  { %v6414_v28 = vpop.xlane.xlu0 %2150  ;;  %4596 = vpow2.f32 %v2597_v0  ;;  %v4589_v11 = vpop.eup %4588  ;;  %v2601_v0 = vmul.f32 1.442695, %v6442_v3  ;;  %v2607_v57 = vmul.f32 1.442695, %v6470_v20  ;;  %vm2411_vm10 = vcmp.gt.f32.partialorder %v6465_v33, 0.0 }
 0x2db   :  { %3196 = vperm.xlu0 %4530, %v2951_v58   ;;  %v2468_v58 = vadd.f32 1.0, %v6337_v61  ;;  %4598 = vpow2.f32 %v2603_v31  ;;  %v4591_v8 = vpop.eup %4590  ;;  %v2519_v31 = vadd.f32 1.0, %v6385_v63  ;;  %v2803_v46 = vsel %vm2355_vm0, %v2467_v51, %v4589_v11 }
 0x2dc   :  { %v6432_v6 = vpop.xlane.xlu1 %2003  ;;  %3205 = vperm.xlu1 %4531, %v2954_v38   ;;  %v2520_v38 = vadd.f32 1.0, %v6355_v37  ;;  %4600 = vpow2.f32 %v2701_v45  ;;  %v3005_v37 = vmul.f32 %v5833_v27, %v2853_v13  ;;  %v2955_v51 = vmul.f32 %v5845_v16, %v2803_v46 }
 0x2dd   :  { %v2804_v48 = vsel %vm2356_vm14, %v2468_v58, %v4583_v17  ;;  %v2707_v17 = vmul.f32 1.442695, %v6448_v54  ;;  %4602 = vpow2.f32 %v2601_v0  ;;  %v2469_v13 = vadd.f32 1.0, %v6407_v29 }
 0x2de   :  { %v6434_v9 = vpop.xlane.xlu0 %2000  ;;  %v2956_v58 = vmul.f32 %v5833_v27, %v2804_v48  ;;  %v2856_v24 = vsel %vm2408_vm15, %v2520_v38, %v4587_v56  ;;  %v2705_v56 = vmul.f32 1.442695, %v6465_v33  ;;  %v6491_v48 = vadd.f32 %v6106_v50, %v6144_v55 }
 0x2df   :  { %3352 = vperm.xlu0 %4530, %v3003_v62   ;;  %v3008_v45 = vmul.f32 %v5865_v18, %v2856_v24  ;;  %4604 = vpow2.f32 %v2707_v17  ;;  %v2806_v38 = vsel %vm2358_vm2, %v2470_v35, %v4591_v8  ;;  %v2605_v24 = vmul.f32 1.442695, %v6485_v23 }
 0x2e0   :  { %v6455_v62 = vpop.xlane.xlu1 %2159  ;;  %3361 = vperm.xlu1 %4531, %v3006_v40   ;;  %4606 = vpow2.f32 %v2705_v56  ;;  %v6505_v63 = vadd.f32 %v6106_v50, %v6146_v41  ;;  %v2958_v8 = vmul.f32 %v5861_v19, %v2806_v38  ;;  %v2711_v2 = vmul.f32 1.442695, %v6491_v48 }
 0x2e1   :  { %4608 = vpow2.f32 %v2607_v57  ;;  %v2521_v56 = vadd.f32 1.0, %v6429_v26  ;;  %v2472_v41 = vadd.f32 1.0, %v6420_v60  ;;  %v2524_v26 = vadd.f32 1.0, %v6448_v54 }
 0x2e2   :  { %v6457_v61 = vpop.xlane.xlu0 %2156  ;;  %4610 = vpow2.f32 %v2605_v24  ;;  %vm2362_vm11 = vcmp.gt.f32.partialorder %v6470_v20, 0.0  ;;  %vm2361_vm12 = vcmp.gt.f32.partialorder %v6485_v23, 0.0  ;;  %vm2414_vm13 = vcmp.gt.f32.partialorder %v6491_v48, 0.0 }
 0x2e3   :  { %3202 = vperm.xlu0 %4530, %v2953_v36   ;;  %v4593_v36 = vpop.eup %4592  ;;  %4612 = vpow2.f32 %v2711_v2  ;;  %vm2413_vm14 = vcmp.gt.f32.partialorder %v6505_v63, 0.0 }
 0x2e4   :  { %v6478_v39 = vpop.xlane.xlu1 %2009  ;;  %3211 = vperm.xlu1 %4531, %v2956_v58   ;;  %v4595_v11 = vpop.eup %4594  ;;  %v2855_v58 = vsel %vm2407_vm3, %v2519_v31, %v4593_v36 }
 0x2e5   :  { %v4597_v55 = vpop.eup %4596  ;;  %v2858_v46 = vsel %vm2410_vm4, %v2522_v32, %v4595_v11  ;;  %v3007_v36 = vmul.f32 %v5861_v19, %v2855_v58  ;;  %v2709_v11 = vmul.f32 1.442695, %v6505_v63  ;;  %v7714_v58 = vld [vmem:[#allocation6_spill] sm:$0xff] }
 0x2e6   :  { %v6480_v40 = vpop.xlane.xlu0 %2006  ;;  %v4599_v31 = vpop.eup %4598  ;;  %v2805_v57 = vsel %vm2357_vm5, %v2469_v13, %v4597_v55  ;;  %v3010_v29 = vmul.f32 %v5879_v25, %v2858_v46  ;;  %v7715_v13 = vld [vmem:[#allocation5_spill] sm:$0xff] }
 0x2e7   :  { %3358 = vperm.xlu0 %4530, %v3005_v37   ;;  %v7712_v37 = vld [vmem:[#allocation4_spill] sm:$0xff]  ;;  %v6532_v60 = vadd.f32 %v6106_v50, %v7715_v13  ;;  %v2957_v55 = vmul.f32 %v5847_v22, %v2805_v57  ;;  %4614 = vpow2.f32 %v2709_v11 }
 0x2e8   :  { %v6498_v0 = vpop.xlane.xlu1 %2165  ;;  %3367 = vperm.xlu1 %4531, %v3008_v45   ;;  %v6511_v35 = vadd.f32 %v6106_v50, %v7712_v37  ;;  %v6527_v37 = vadd.f32 %v6106_v50, %v7714_v58  ;;  %v7717_v57 = vld [vmem:[#allocation8_spill] sm:$0xff] }
 0x2e9   :  { %vm2363_vm0 = vcmp.gt.f32.partialorder %v6532_v60, 0.0 }
 0x2ea   :  { %v6500_v17 = vpop.xlane.xlu0 %2162  ;;  %v2611_v32 = vmul.f32 1.442695, %v6511_v35  ;;  %vm2364_vm15 = vcmp.gt.f32.partialorder %v6511_v35, 0.0  ;;  %vm2416_vm2 = vcmp.gt.f32.partialorder %v6527_v37, 0.0 }
 0x2eb   :  { %7711 = vst [vmem:[#allocation15_spill] sm:$0xff] %v6500_v17  ;;  %3208 = vperm.xlu0 %4530, %v2955_v51   ;;  %v4601_v51 = vpop.eup %4600  ;;  %v2808_v17 = vsel %vm2360_vm6, %v2472_v41, %v4599_v31  ;;  %v2715_v41 = vmul.f32 1.442695, %v6527_v37 }
 0x2ec   :  { %v6517_v45 = vpop.xlane.xlu1 %2015  ;;  %3217 = vperm.xlu1 %4531, %v2958_v8   ;;  %v2471_v8 = vadd.f32 1.0, %v6442_v3  ;;  %v2857_v31 = vsel %vm2409_vm7, %v2521_v56, %v4601_v51  ;;  %4616 = vpow2.f32 %v2611_v32  ;;  %v6547_v3 = vadd.f32 %v6106_v50, %v7717_v57  ;;  %v7718_v56 = vld [vmem:[#allocation7_spill] sm:$0xff] }
 0x2ed   :  { %v6552_v51 = vadd.f32 %v6106_v50, %v7718_v56  ;;  %v3009_v54 = vmul.f32 %v5877_v44, %v2857_v31  ;;  %4618 = vpow2.f32 %v2715_v41  ;;  %v2473_v41 = vadd.f32 1.0, %v6485_v23 }
 0x2ee   :  { %v6519_v38 = vpop.xlane.xlu0 %2012  ;;  %v2615_v31 = vmul.f32 1.442695, %v6547_v3  ;;  %vm2366_vm4 = vcmp.gt.f32.partialorder %v6547_v3, 0.0 }
 0x2ef   :  { %7713 = vst [vmem:[#allocation4_spill] sm:$0xff] %v6519_v38  ;;  %3364 = vperm.xlu0 %4530, %v3007_v36   ;;  %v4603_v38 = vpop.eup %4602  ;;  %v2960_v36 = vmul.f32 %v5877_v44, %v2808_v17  ;;  %v2523_v17 = vadd.f32 1.0, %v6465_v33  ;;  %v6588_v33 = vadd.f32 %v6106_v50, %v6222_v1  ;;  %vm2415_vm3 = vcmp.gt.f32.partialorder %v6552_v51, 0.0 }
 0x2f0   :  { %v4605_v24 = vpop.eup %4604  ;;  %v6537_v2 = vpop.xlane.xlu1 %2171  ;;  %3373 = vperm.xlu1 %4531, %v3010_v29   ;;  %v2807_v58 = vsel %vm2359_vm8, %v2471_v8, %v4603_v38  ;;  %v2609_v29 = vmul.f32 1.442695, %v6532_v60  ;;  %v2474_v38 = vadd.f32 1.0, %v6470_v20  ;;  %v6565_v8 = vadd.f32 %v6106_v50, %v6202_v43 }
 0x2f1   :  { %7716 = vst [vmem:[#allocation6_spill] sm:$0xff] %v6537_v2  ;;  %v4607_v13 = vpop.eup %4606  ;;  %v2860_v11 = vsel %vm2412_vm9, %v2524_v26, %v4605_v24  ;;  %v2959_v24 = vmul.f32 %v5865_v18, %v2807_v58  ;;  %v7721_v26 = vld [vmem:[#allocation9_spill] sm:$0xff]  ;;  %v2713_v20 = vmul.f32 1.442695, %v6552_v51  ;;  %vm2368_vm8 = vcmp.gt.f32.partialorder %v6588_v33, 0.0 }
 0x2f2   :  { %v6539_v46 = vpop.xlane.xlu0 %2168  ;;  %v6571_v56 = vadd.f32 %v6106_v50, %v7721_v26  ;;  %4620 = vpow2.f32 %v2609_v29  ;;  %v2859_v43 = vsel %vm2411_vm10, %v2523_v17, %v4607_v13  ;;  %v2526_v29 = vadd.f32 1.0, %v6491_v48  ;;  %v7723_v26 = vld [vmem:[#allocation10_spill] sm:$0xff] }
 0x2f3   :  { %3214 = vperm.xlu0 %4530, %v2957_v55   ;;  %v4609_v55 = vpop.eup %4608  ;;  %4622 = vpow2.f32 %v2615_v31  ;;  %v3011_v17 = vmul.f32 %v5845_v16, %v2859_v43  ;;  %v2619_v43 = vmul.f32 1.442695, %v6588_v33  ;;  %vm2418_vm6 = vcmp.gt.f32.partialorder %v6565_v8, 0.0 }
 0x2f4   :  { %v6557_v32 = vpop.xlane.xlu1 %2021  ;;  %3223 = vperm.xlu1 %4531, %v2960_v36   ;;  %v3012_v36 = vmul.f32 %v5833_v27, %v2860_v11  ;;  %v2719_v11 = vmul.f32 1.442695, %v6565_v8  ;;  %v2613_v13 = vmul.f32 1.442695, %v6571_v56  ;;  %4624 = vpow2.f32 %v2713_v20 }
 0x2f5   :  { %7719 = vst [vmem:[#allocation5_spill] sm:$0xff] %v6557_v32  ;;  %v2810_v32 = vsel %vm2362_vm11, %v2474_v38, %v4609_v55  ;;  %v2476_v20 = vadd.f32 1.0, %v6511_v35  ;;  %vm2365_vm5 = vcmp.gt.f32.partialorder %v6571_v56, 0.0 }
 0x2f6   :  { %v6559_v57 = vpop.xlane.xlu0 %2018  ;;  %v2962_v55 = vmul.f32 %v5845_v16, %v2810_v32  ;;  %4626 = vpow2.f32 %v2719_v11 }
 0x2f7   :  { %7720 = vst [vmem:[#allocation8_spill] sm:$0xff] %v6559_v57  ;;  %3370 = vperm.xlu0 %4530, %v3009_v54   ;;  %v4611_v57 = vpop.eup %4610  ;;  %4628 = vpow2.f32 %v2613_v13 }
 0x2f8   :  { %v4613_v54 = vpop.eup %4612  ;;  %v6579_v58 = vpop.xlane.xlu1 %2177  ;;  %3379 = vperm.xlu1 %4531, %v3012_v36   ;;  %v6595_v36 = vadd.f32 %v6106_v50, %v7723_v26  ;;  %4630 = vpow2.f32 %v2619_v43  ;;  %v6639_v43 = vadd.f32 %v6106_v50, %v6247_v5 }
 0x2f9   :  { %v4615_v38 = vpop.eup %4614  ;;  %v2862_v48 = vsel %vm2414_vm13, %v2526_v29, %v4613_v54  ;;  %v6609_v54 = vadd.f32 %v6106_v50, %v6245_v49  ;;  %v7724_v29 = vld [vmem:[#allocation13_spill] sm:$0xff] }
 0x2fa   :  { %v6581_v2 = vpop.xlane.xlu0 %2174  ;;  %v4617_v1 = vpop.eup %4616  ;;  %v3014_v23 = vmul.f32 %v5861_v19, %v2862_v48  ;;  %vm2417_vm7 = vcmp.gt.f32.partialorder %v6595_v36, 0.0  ;;  %vm2419_vm11 = vcmp.gt.f32.partialorder %v6639_v43, 0.0 }
 0x2fb   :  { %7722 = vst [vmem:[#allocation7_spill] sm:$0xff] %v6581_v2  ;;  %3220 = vperm.xlu0 %4530, %v2959_v24   ;;  %v2809_v2 = vsel %vm2361_vm12, %v2473_v41, %v4611_v57  ;;  %v2525_v24 = vadd.f32 1.0, %v6505_v63  ;;  %v2717_v41 = vmul.f32 1.442695, %v6595_v36  ;;  %v2812_v11 = vsel %vm2364_vm15, %v2476_v20, %v4617_v1  ;;  %v4619_v49 = vpop.eup %4618 }
 0x2fc   :  { %v6601_v31 = vpop.xlane.xlu1 %2027  ;;  %3229 = vperm.xlu1 %4531, %v2962_v55   ;;  %v2961_v57 = vmul.f32 %v5879_v25, %v2809_v2  ;;  %v6617_v55 = vadd.f32 %v6106_v50, %v7724_v29  ;;  %v4621_v13 = vpop.eup %4620  ;;  %v2528_v2 = vadd.f32 1.0, %v6527_v37  ;;  %v2723_v48 = vmul.f32 1.442695, %v6609_v54 }
 0x2fd   :  { %v2861_v26 = vsel %vm2413_vm14, %v2525_v24, %v4615_v38  ;;  %v6630_v1 = vadd.f32 %v6106_v50, %v6268_v10  ;;  %v2475_v63 = vadd.f32 1.0, %v6532_v60  ;;  %v2964_v38 = vmul.f32 %v5847_v22, %v2812_v11  ;;  %v4623_v29 = vpop.eup %4622 }
 0x2fe   :  { %v6603_v32 = vpop.xlane.xlu0 %2024  ;;  %v3013_v24 = vmul.f32 %v5847_v22, %v2861_v26  ;;  %4632 = vpow2.f32 %v2717_v41  ;;  %v2617_v20 = vmul.f32 1.442695, %v6617_v55  ;;  %v7726_v10 = vlaneseq  ;;  %v4625_v11 = vpop.eup %4624 }
 0x2ff   :  { %3376 = vperm.xlu0 %4530, %v3011_v17   ;;  %v2811_v41 = vsel %vm2363_vm0, %v2475_v63, %v4621_v13  ;;  %v2478_v26 = vadd.f32 1.0, %v6547_v3  ;;  %4634 = vpow2.f32 %v2723_v48  ;;  %v2623_v5 = vmul.f32 1.442695, %v6630_v1 }
 0x300   :  { %v6622_v17 = vpop.xlane.xlu1 %2183  ;;  %3385 = vperm.xlu1 %4531, %v3014_v23   ;;  %v2864_v23 = vsel %vm2416_vm2, %v2528_v2, %v4619_v49  ;;  %v6655_v49 = vadd.f32 %v6106_v50, %v6270_v14  ;;  %v2527_v2 = vadd.f32 1.0, %v6552_v51  ;;  %v4627_v13 = vpop.eup %4626  ;;  %4636 = vpow2.f32 %v2617_v20 }
 0x301   :  { %v3016_v60 = vmul.f32 %v5877_v44, %v2864_v23  ;;  %v2721_v48 = vmul.f32 1.442695, %v6639_v43  ;;  %v2963_v63 = vmul.f32 %v5833_v27, %v2811_v41  ;;  %v4629_v14 = vpop.eup %4628  ;;  %v2530_v3 = vadd.f32 1.0, %v6565_v8 }
 0x302   :  { %v6624_v35 = vpop.xlane.xlu0 %2180  ;;  %v2863_v20 = vsel %vm2415_vm3, %v2527_v2, %v4625_v11  ;;  %4638 = vpow2.f32 %v2623_v5  ;;  %v2621_v23 = vmul.f32 1.442695, %v6655_v49  ;;  %v4631_v11 = vpop.eup %4630  ;;  %v2480_v2 = vadd.f32 1.0, %v6588_v33 }
 0x303   :  { %7725 = vst [vmem:[#allocation9_spill] sm:$0xff] %v6624_v35  ;;  %3226 = vperm.xlu0 %4530, %v2961_v57   ;;  %v6642_v35 = vand.u32 127, %v7726_v10  ;;  %v2814_v10 = vsel %vm2366_vm4, %v2478_v26, %v4623_v29  ;;  %v6679_v29 = vadd.f32 %v6106_v50, %v6288_v12  ;;  %v6684_v26 = vadd.f32 %v6106_v50, %v6327_v53 }
 0x304   :  { %v6645_v57 = vpop.xlane.xlu1 %2033  ;;  %3235 = vperm.xlu1 %4531, %v2964_v38   ;;  %v6661_v38 = vadd.f32 %v6106_v50, %v6307_v47  ;;  %v2866_v51 = vsel %vm2418_vm6, %v2530_v3, %v4627_v13  ;;  %4640 = vpow2.f32 %v2721_v48  ;;  %v3015_v8 = vmul.f32 %v5865_v18, %v2863_v20 }
 0x305   :  { %v3507_v5 = vadd.s32 4294967288, %v6642_v35  ;;  %v2529_v12 = vadd.f32 1.0, %v6595_v36  ;;  %4642 = vpow2.f32 %v2621_v23  ;;  %v2727_v48 = vmul.f32 1.442695, %v6679_v29  ;;  %v7730_v23 = vld [vmem:[#allocation3_spill] sm:$0xff] }
 0x306   :  { %v6647_v37 = vpop.xlane.xlu0 %2030  ;;  %v2627_v41 = vmul.f32 1.442695, %v6661_v38  ;;  %v6702_v3 = vadd.f32 %v6106_v50, %v6290_v42  ;;  %v3018_v20 = vmul.f32 %v5845_v16, %v2866_v51  ;;  %v2731_v33 = vmul.f32 1.442695, %v6684_v26 }
 0x307   :  { %7727 = vst [vmem:[#allocation10_spill] sm:$0xff] %v6647_v37  ;;  %3382 = vperm.xlu0 %4530, %v3013_v24   ;;  %v2477_v24 = vadd.f32 1.0, %v6571_v56  ;;  %v2816_v56 = vsel %vm2368_vm8, %v2480_v2, %v4631_v11  ;;  %vm2367_vm9 = vcmp.gt.f32.partialorder %v6617_v55, 0.0  ;;  %v3521_v42 = vadd.s32 4294967272, %v6642_v35 }
 0x308   :  { %v6669_v37 = vpop.xlane.xlu1 %2189  ;;  %3391 = vperm.xlu1 %4531, %v3016_v60   ;;  %v2966_v60 = vmul.f32 %v5865_v18, %v2814_v10  ;;  %v4633_v10 = vpop.eup %4632  ;;  %4644 = vpow2.f32 %v2627_v41  ;;  %v2479_v51 = vadd.f32 1.0, %v6617_v55  ;;  %vm2420_vm10 = vcmp.gt.f32.partialorder %v6609_v54, 0.0 }
 0x309   :  { %v2813_v13 = vsel %vm2365_vm5, %v2477_v24, %v4629_v14  ;;  %v4635_v14 = vpop.eup %4634  ;;  %v2532_v41 = vadd.f32 1.0, %v6609_v54  ;;  %v2865_v11 = vsel %vm2417_vm7, %v2529_v12, %v4633_v10  ;;  %4646 = vpow2.f32 %v2727_v48 }
 0x30a   :  { %v6671_v47 = vpop.xlane.xlu0 %2186  ;;  %v2965_v24 = vmul.f32 %v5861_v19, %v2813_v13  ;;  %v4637_v2 = vpop.eup %4636  ;;  %v7734_v13 = vld [vmem:[#allocation14_spill] sm:$0xff]  ;;  %4648 = vpow2.f32 %v2731_v33  ;;  %v3017_v10 = vmul.f32 %v5879_v25, %v2865_v11  ;;  %v6739_v48 = vsub.s32 %v3521_v42, %v7730_v23 }
 0x30b   :  { %3232 = vperm.xlu0 %4530, %v2963_v63   ;;  %v2868_v36 = vsel %vm2420_vm10, %v2532_v41, %v4635_v14  ;;  %v2531_v33 = vadd.f32 1.0, %v6639_v43  ;;  %v2815_v14 = vsel %vm2367_vm9, %v2479_v51, %v4637_v2  ;;  %v3542_v41 = vadd.s32 4294967248, %v6642_v35 }
 0x30c   :  { %v6693_v63 = vpop.xlane.xlu1 %2039  ;;  %3241 = vperm.xlu1 %4531, %v2966_v60   ;;  %v6708_v60 = vadd.f32 %v6106_v50, %v6329_v34  ;;  %v4639_v12 = vpop.eup %4638  ;;  %vm2370_vm12 = vcmp.gt.f32.partialorder %v6630_v1, 0.0  ;;  %vm2369_vm13 = vcmp.gt.f32.partialorder %v6655_v49, 0.0  ;;  %v2481_v2 = vadd.f32 1.0, %v6655_v49 }
 0x30d   :  { %7728 = vst [vmem:[#allocation13_spill] sm:$0xff] %v6693_v63  ;;  %v2968_v63 = vmul.f32 %v5879_v25, %v2816_v56  ;;  %v2482_v56 = vadd.f32 1.0, %v6630_v1  ;;  %v6766_v1 = vadd.f32 %v6106_v50, %v6349_v59  ;;  %vm2422_vm14 = vcmp.gt.f32.partialorder %v6679_v29, 0.0 }
 0x30e   :  { %v6695_v53 = vpop.xlane.xlu0 %2036  ;;  %v2729_v54 = vmul.f32 1.442695, %v6708_v60  ;;  %v4641_v42 = vpop.eup %4640  ;;  %vm2372_vm15 = vcmp.gt.f32.partialorder %v6661_v38, 0.0  ;;  %v2484_v59 = vadd.f32 1.0, %v6661_v38  ;;  %v6786_v43 = vadd.f32 %v6106_v50, %v6391_v52 }
 0x30f   :  { %7729 = vst [vmem:[#allocation16_spill] sm:$0xff] %v6695_v53  ;;  %3388 = vperm.xlu0 %4530, %v3015_v8   ;;  %v6713_v53 = vsub.s32 %v3507_v5, %v7730_v23  ;;  %v2725_v5 = vmul.f32 1.442695, %v6702_v3  ;;  %v2818_v55 = vsel %vm2370_vm12, %v2482_v56, %v4639_v12  ;;  %v4643_v51 = vpop.eup %4642  ;;  %v2867_v12 = vsel %vm2419_vm11, %v2531_v33, %v4641_v42 }
 0x310   :  { %v6719_v8 = vpop.xlane.xlu1 %2195  ;;  %3397 = vperm.xlu1 %4531, %v3018_v20   ;;  %v6734_v20 = vadd.f32 %v6106_v50, %v6347_v7  ;;  %v3514_v56 = vadd.s32 4294967280, %v6642_v35  ;;  %v2817_v33 = vsel %vm2369_vm13, %v2481_v2, %v4643_v51  ;;  %v2629_v42 = vmul.f32 1.442695, %v6766_v1 }
 0x311   :  { %7731 = vst [vmem:[#allocation3_spill] sm:$0xff] %v6713_v53  ;;  %7732 = vst [vmem:[#allocation17_spill] sm:$0xff] %v6719_v8  ;;  %v6728_v53 = vadd.f32 %v6106_v50, %v7734_v13  ;;  %4650 = vpow2.f32 %v2725_v5  ;;  %v2967_v5 = vmul.f32 %v5877_v44, %v2815_v14  ;;  %v2970_v14 = vmul.f32 %v5833_v27, %v2818_v55 }
 0x312   :  { %v6721_v34 = vpop.xlane.xlu0 %2192  ;;  %4652 = vpow2.f32 %v2729_v54  ;;  %v2631_v8 = vmul.f32 1.442695, %v6734_v20  ;;  %v6793_v38 = vadd.f32 %v6106_v50, %v6371_v15  ;;  %vm2421_vm0 = vcmp.gt.f32.partialorder %v6702_v3, 0.0 }
 0x313   :  { %7733 = vst [vmem:[#allocation18_spill] sm:$0xff] %v6721_v34  ;;  %3238 = vperm.xlu0 %4530, %v2965_v24   ;;  %v6743_v24 = vsub.s32 %v6642_v35, %v7730_v23  ;;  %v2625_v11 = vmul.f32 1.442695, %v6728_v53  ;;  %v3020_v34 = vmul.f32 %v5847_v22, %v2868_v36  ;;  %v4645_v36 = vpop.eup %4644  ;;  %v2533_v52 = vadd.f32 1.0, %v6702_v3 }
 0x314   :  { %v6747_v13 = vpop.xlane.xlu1 %2045  ;;  %3247 = vperm.xlu1 %4531, %v2968_v63   ;;  %v6760_v63 = vadd.f32 %v6106_v50, %v6369_v4  ;;  %v2820_v55 = vsel %vm2372_vm15, %v2484_v59, %v4645_v36  ;;  %v6804_v2 = vsub.s32 %v3514_v56, %v7730_v23  ;;  %vm2424_vm2 = vcmp.gt.f32.partialorder %v6684_v26, 0.0 }
 0x315   :  { %4654 = vpow2.f32 %v2625_v11  ;;  %v3019_v11 = vmul.f32 %v5833_v27, %v2867_v12  ;;  %v2536_v15 = vadd.f32 1.0, %v6684_v26  ;;  %v6810_v36 = vadd.f32 %v6106_v50, %v6412_v30 }
 0x316   :  { %v6749_v7 = vpop.xlane.xlu0 %2042  ;;  %4656 = vpow2.f32 %v2631_v8  ;;  %v2969_v12 = vmul.f32 %v5845_v16, %v2817_v33  ;;  %v2635_v59 = vmul.f32 1.442695, %v6786_v43  ;;  %v6820_v26 = vadd.f32 %v6106_v50, %v6393_v21 }
 0x317   :  { %7735 = vst [vmem:[#allocation14_spill] sm:$0xff] %v6749_v7  ;;  %3394 = vperm.xlu0 %4530, %v3017_v10   ;;  %v6777_v10 = vsub.s32 %v3542_v41, %v7730_v23  ;;  %v4647_v41 = vpop.eup %4646  ;;  %vm2371_vm3 = vcmp.gt.f32.partialorder %v6728_v53, 0.0  ;;  %vm2423_vm4 = vcmp.gt.f32.partialorder %v6708_v60, 0.0  ;;  %v2739_v21 = vmul.f32 1.442695, %v6810_v36 }
 0x318   :  { %v6770_v54 = vpop.xlane.xlu1 %2201  ;;  %3403 = vperm.xlu1 %4531, %v3020_v34   ;;  %v2735_v34 = vmul.f32 1.442695, %v6760_v63  ;;  %v4649_v8 = vpop.eup %4648  ;;  %v6844_v7 = vadd.f32 %v6106_v50, %v6434_v9  ;;  %vm2374_vm5 = vcmp.gt.f32.partialorder %v6734_v20, 0.0  ;;  %vm2373_vm6 = vcmp.gt.f32.partialorder %v6766_v1, 0.0 }
 0x319   :  { %v2872_v30 = vsel %vm2424_vm2, %v2536_v15, %v4649_v8  ;;  %v3528_v8 = vadd.s32 4294967264, %v6642_v35  ;;  %v2485_v9 = vadd.f32 1.0, %v6766_v1  ;;  %vm2426_vm7 = vcmp.gt.f32.partialorder %v6760_v63, 0.0 }
 0x31a   :  { %v6772_v4 = vpop.xlane.xlu0 %2198  ;;  %4658 = vpow2.f32 %v2735_v34  ;;  %v2483_v34 = vadd.f32 1.0, %v6728_v53  ;;  %vm2425_vm8 = vcmp.gt.f32.partialorder %v6793_v38, 0.0  ;;  %v2537_v53 = vadd.f32 1.0, %v6793_v38 }
 0x31b   :  { %7736 = vst [vmem:[#allocation19_spill] sm:$0xff] %v6772_v4  ;;  %3244 = vperm.xlu0 %4530, %v2967_v5   ;;  %v2534_v5 = vadd.f32 1.0, %v6679_v29  ;;  %4660 = vpow2.f32 %v2629_v42  ;;  %v2733_v4 = vmul.f32 1.442695, %v6793_v38  ;;  %v2535_v42 = vadd.f32 1.0, %v6708_v60 }
 0x31c   :  { %3253 = vperm.xlu1 %4531, %v2970_v14   ;;  %v6799_v49 = vpop.xlane.xlu1 %2051  ;;  %v2972_v14 = vmul.f32 %v5861_v19, %v2820_v55  ;;  %v6834_v55 = vadd.f32 %v6106_v50, %v6414_v28  ;;  %4662 = vpow2.f32 %v2635_v59  ;;  %vm2376_vm9 = vcmp.gt.f32.partialorder %v6786_v43, 0.0 }
 0x31d   :  { %v2870_v56 = vsel %vm2422_vm14, %v2534_v5, %v4647_v41  ;;  %v3535_v41 = vadd.s32 4294967256, %v6642_v35  ;;  %v3024_v5 = vmul.f32 %v5879_v25, %v2872_v30  ;;  %4664 = vpow2.f32 %v2733_v4 }
 0x31e   :  { %v6801_v51 = vpop.xlane.xlu0 %2048  ;;  %v3022_v15 = vmul.f32 %v5865_v18, %v2870_v56  ;;  %4666 = vpow2.f32 %v2739_v21  ;;  %v2737_v60 = vmul.f32 1.442695, %v6834_v55  ;;  %vm2375_vm10 = vcmp.gt.f32.partialorder %v6820_v26, 0.0 }
 0x31f   :  { %7737 = vst [vmem:[#allocation20_spill] sm:$0xff] %v6801_v51  ;;  %3400 = vperm.xlu0 %4530, %v3019_v11   ;;  %v4651_v51 = vpop.eup %4650  ;;  %vm2428_vm11 = vcmp.gt.f32.partialorder %v6810_v36, 0.0  ;;  %vm2427_vm12 = vcmp.gt.f32.partialorder %v6834_v55, 0.0  ;;  %v6926_v1 = vadd.f32 %v6106_v50, %v6517_v45  ;;  %vm2377_vm13 = vcmp.gt.f32.partialorder %v6844_v7, 0.0 }
 0x320   :  { %v4653_v11 = vpop.eup %4652  ;;  %3259 = vperm.xlu1 %4531, %v2972_v14   ;;  %v6825_v33 = vpop.xlane.xlu1 %2207  ;;  %v2869_v14 = vsel %vm2421_vm0, %v2533_v52, %v4651_v51  ;;  %v6856_v52 = vsub.s32 %v3535_v41, %v7730_v23  ;;  %v6862_v51 = vadd.f32 %v6106_v50, %v6432_v6  ;;  %v2637_v41 = vmul.f32 1.442695, %v6844_v7 }
 0x321   :  { %7738 = vst [vmem:[#allocation21_spill] sm:$0xff] %v6825_v33  ;;  %v2633_v33 = vmul.f32 1.442695, %v6820_v26  ;;  %v2871_v28 = vsel %vm2423_vm4, %v2535_v42, %v4653_v11  ;;  %v3021_v56 = vmul.f32 %v5861_v19, %v2869_v14  ;;  %v6869_v11 = vsub.s32 %v3528_v8, %v7730_v23 }
 0x322   :  { %v6827_v29 = vpop.xlane.xlu0 %2204  ;;  %v3023_v59 = vmul.f32 %v5877_v44, %v2871_v28  ;;  %v6874_v42 = vadd.f32 %v6106_v50, %v6455_v62  ;;  %v2639_v62 = vmul.f32 1.442695, %v6862_v51  ;;  %vm2378_vm14 = vcmp.gt.f32.partialorder %v6862_v51, 0.0 }
 0x323   :  { %7739 = vst [vmem:[#allocation22_spill] sm:$0xff] %v6827_v29  ;;  %3250 = vperm.xlu0 %4530, %v2969_v12   ;;  %v4655_v29 = vpop.eup %4654  ;;  %v2486_v12 = vadd.f32 1.0, %v6734_v20  ;;  %4668 = vpow2.f32 %v2633_v33  ;;  %v6888_v20 = vadd.f32 %v6106_v50, %v6478_v39  ;;  %v2488_v33 = vadd.f32 1.0, %v6786_v43 }
 0x324   :  { %v4657_v35 = vpop.eup %4656  ;;  %3415 = vperm.xlu1 %4531, %v3024_v5   ;;  %v6851_v3 = vpop.xlane.xlu1 %2213  ;;  %v2819_v30 = vsel %vm2371_vm3, %v2483_v34, %v4655_v29  ;;  %v2538_v5 = vadd.f32 1.0, %v6760_v63  ;;  %4670 = vpow2.f32 %v2737_v60  ;;  %v2487_v29 = vadd.f32 1.0, %v6820_v26 }
 0x325   :  { %7740 = vst [vmem:[#allocation23_spill] sm:$0xff] %v6851_v3  ;;  %v2822_v6 = vsel %vm2374_vm5, %v2486_v12, %v4657_v35  ;;  %v4659_v21 = vpop.eup %4658  ;;  %v2971_v14 = vmul.f32 %v5847_v22, %v2819_v30  ;;  %4672 = vpow2.f32 %v2637_v41  ;;  %v2743_v28 = vmul.f32 1.442695, %v6874_v42 }
 0x326   :  { %v6853_v4 = vpop.xlane.xlu0 %2210  ;;  %v4661_v34 = vpop.eup %4660  ;;  %v6900_v39 = vadd.f32 %v6106_v50, %v6457_v61  ;;  %v2874_v35 = vsel %vm2426_vm7, %v2538_v5, %v4659_v21  ;;  %v2540_v60 = vadd.f32 1.0, %v6810_v36  ;;  %4674 = vpow2.f32 %v2639_v62 }
 0x327   :  { %7741 = vst [vmem:[#allocation24_spill] sm:$0xff] %v6853_v4  ;;  %3409 = vperm.xlu0 %4530, %v3022_v15   ;;  %v2974_v15 = vmul.f32 %v5877_v44, %v2822_v6  ;;  %v4663_v12 = vpop.eup %4662  ;;  %v2821_v30 = vsel %vm2373_vm6, %v2485_v9, %v4661_v34  ;;  %v2643_v63 = vmul.f32 1.442695, %v6888_v20  ;;  %v6918_v41 = vadd.f32 %v6106_v50, %v6498_v0 }
 0x328   :  { %3412 = vperm.xlu1 %4531, %v3023_v59   ;;  %v6882_v23 = vpop.xlane.xlu1 %2219  ;;  %v6908_v59 = vadd.f32 %v6106_v50, %v6480_v40  ;;  %v4665_v61 = vpop.eup %4664  ;;  %v2539_v40 = vadd.f32 1.0, %v6834_v55  ;;  %v6922_v6 = vadd.f32 1.0, %v6862_v51  ;;  %v3026_v9 = vmul.f32 %v5833_v27, %v2874_v35 }
 0x329   :  { %7742 = vst [vmem:[#allocation25_spill] sm:$0xff] %v6882_v23  ;;  %v4667_v21 = vpop.eup %4666  ;;  %4676 = vpow2.f32 %v2743_v28  ;;  %v2741_v5 = vmul.f32 1.442695, %v6900_v39  ;;  %v2973_v34 = vmul.f32 %v5865_v18, %v2821_v30  ;;  %v2824_v0 = vsel %vm2376_vm9, %v2488_v33, %v4663_v12  ;;  %v7747_v12 = vld [vmem:[#allocation4_spill] sm:$0xff] }
 0x32a   :  { %v6892_v8 = vpop.xlane.xlu0 %2216  ;;  %v2641_v62 = vmul.f32 1.442695, %v6908_v59  ;;  %v2873_v28 = vsel %vm2425_vm8, %v2537_v53, %v4665_v61  ;;  %v2489_v43 = vadd.f32 1.0, %v6844_v7  ;;  %4678 = vpow2.f32 %v2643_v63 }
 0x32b   :  { %3406 = vperm.xlu0 %4530, %v3021_v56   ;;  %7743 = vst [vmem:[#allocation26_spill] sm:$0xff] %v6892_v8  ;;  %v2747_v33 = vmul.f32 1.442695, %v6918_v41  ;;  %v2976_v38 = vmul.f32 %v5845_v16, %v2824_v0  ;;  %v2876_v53 = vsel %vm2428_vm11, %v2540_v60, %v4667_v21  ;;  %vm2430_vm15 = vcmp.gt.f32.partialorder %v6874_v42, 0.0  ;;  %v7750_v8 = vld [vmem:[#allocation8_spill] sm:$0xff] }
 0x32c   :  { %3265 = vperm.xlu1 %4531, %v2974_v15   ;;  %v6910_v56 = vpop.xlane.xlu1 %2225  ;;  %v7745_v15 = vld [vmem:[#allocation15_spill] sm:$0xff]  ;;  %v2542_v63 = vadd.f32 1.0, %v6874_v42  ;;  %4680 = vpow2.f32 %v2741_v5  ;;  %v3025_v23 = vmul.f32 %v5845_v16, %v2873_v28  ;;  %vm2380_vm0 = vcmp.gt.f32.partialorder %v6888_v20, 0.0 }
 0x32d   :  { %7744 = vst [vmem:[#allocation27_spill] sm:$0xff] %v6910_v56  ;;  %v4669_v30 = vpop.eup %4668  ;;  %4682 = vpow2.f32 %v2641_v62  ;;  %v3028_v62 = vmul.f32 %v5861_v19, %v2876_v53  ;;  %v6987_v26 = vadd.f32 %v6106_v50, %v7750_v8  ;;  %vm2429_vm2 = vcmp.gt.f32.partialorder %v6900_v39, 0.0 }
 0x32e   :  { %v6939_v45 = vpop.xlane.xlu0 %2222  ;;  %v4671_v61 = vpop.eup %4670  ;;  %v2823_v21 = vsel %vm2375_vm10, %v2487_v29, %v4669_v30  ;;  %4684 = vpow2.f32 %v2747_v33  ;;  %v2492_v33 = vadd.f32 1.0, %v6888_v20  ;;  %vm2379_vm3 = vcmp.gt.f32.partialorder %v6908_v59, 0.0 }
 0x32f   :  { %3256 = vperm.xlu0 %4530, %v2971_v14   ;;  %v6937_v14 = vadd.f32 %v6106_v50, %v7745_v15  ;;  %7746 = vst [vmem:[#allocation15_spill] sm:$0xff] %v6939_v45  ;;  %v6950_v15 = vadd.f32 %v6106_v50, %v7747_v12  ;;  %v6955_v45 = vadd.f32 %v6106_v50, %v6539_v46  ;;  %v7748_v12 = vld [vmem:[#allocation6_spill] sm:$0xff]  ;;  %v6968_v46 = vadd.f32 1.0, %v6900_v39  ;;  %v4673_v5 = vpop.eup %4672 }
 0x330   :  { %3421 = vperm.xlu1 %4531, %v3026_v9   ;;  %v6941_v35 = vpop.permute.xlu1 %3169  ;;  %v2647_v9 = vmul.f32 1.442695, %v6926_v1  ;;  %v2875_v29 = vsel %vm2427_vm12, %v2539_v40, %v4671_v61  ;;  %v4675_v30 = vpop.eup %4674  ;;  %v2491_v8 = vadd.f32 1.0, %v6908_v59  ;;  %v2825_v53 = vsel %vm2377_vm13, %v2489_v43, %v4673_v5 }
 0x331   :  { %v2745_v0 = vmul.f32 1.442695, %v6937_v14  ;;  %v2645_v28 = vmul.f32 1.442695, %v6950_v15  ;;  %vm2432_vm4 = vcmp.gt.f32.partialorder %v6918_v41, 0.0  ;;  %v2826_v7 = vsel %vm2378_vm14, %v6922_v6, %v4675_v30 }
 0x332   :  { %4686 = vpow2.f32 %v2647_v9  ;;  %v2975_v9 = vmul.f32 %v5879_v25, %v2823_v21  ;;  %v3027_v21 = vmul.f32 %v5847_v22, %v2875_v29  ;;  %v2544_v29 = vadd.f32 1.0, %v6918_v41 }
 0x333   :  { %3262 = vperm.xlu0 %4530, %v2973_v34   ;;  %v6964_v34 = vadd.f32 %v6106_v50, %v7748_v12  ;;  %v7749_v12 = vld [vmem:[#allocation5_spill] sm:$0xff]  ;;  %4688 = vpow2.f32 %v2745_v0  ;;  %v4677_v61 = vpop.eup %4676  ;;  %v2649_v0 = vmul.f32 1.442695, %v6987_v26  ;;  %vm2431_vm5 = vcmp.gt.f32.partialorder %v6937_v14, 0.0 }
 0x334   :  { %3271 = vperm.xlu1 %4531, %v2976_v38   ;;  %v6971_v36 = vpop.permute.xlu1 %3175  ;;  %v6981_v56 = vadd.f32 %v6106_v50, %v7749_v12  ;;  %v2749_v38 = vmul.f32 1.442695, %v6955_v45  ;;  %4690 = vpow2.f32 %v2645_v28  ;;  %v4679_v43 = vpop.eup %4678  ;;  %v7021_v28 = vadd.f32 %v6106_v50, %v6601_v31 }
 0x335   :  { %v2751_v12 = vmul.f32 1.442695, %v6964_v34  ;;  %v2878_v6 = vsel %vm2430_vm15, %v2542_v63, %v4677_v61  ;;  %vm2382_vm6 = vcmp.gt.f32.partialorder %v6926_v1, 0.0  ;;  %v2494_v31 = vadd.f32 1.0, %v6926_v1 }
 0x336   :  { %v6973_v60 = vpop.permute.xlu0 %3166  ;;  %4692 = vpow2.f32 %v2749_v38  ;;  %v2977_v38 = vmul.f32 %v5833_v27, %v2825_v53  ;;  %v4681_v30 = vpop.eup %4680  ;;  %v7039_v4 = vadd.f32 %v6106_v50, %v6603_v32  ;;  %v2828_v42 = vsel %vm2380_vm0, %v2492_v33, %v4679_v43 }
 0x337   :  { %3418 = vperm.xlu0 %4530, %v3025_v23   ;;  %v6996_v23 = vadd.f32 %v6106_v50, %v6579_v58  ;;  %v2651_v58 = vmul.f32 1.442695, %v6981_v56  ;;  %4694 = vpow2.f32 %v2751_v12  ;;  %v2978_v12 = vmul.f32 %v5847_v22, %v2826_v7  ;;  %v4683_v53 = vpop.eup %4682 }
 0x338   :  { %3427 = vperm.xlu1 %4531, %v3028_v62   ;;  %v7001_v55 = vpop.permute.xlu1 %3331  ;;  %v7752_v62 = vld [vmem:[#allocation7_spill] sm:$0xff]  ;;  %v4685_v63 = vpop.eup %4684  ;;  %vm2381_vm7 = vcmp.gt.f32.partialorder %v6950_v15, 0.0  ;;  %v2655_v61 = vmul.f32 1.442695, %v7021_v28  ;;  %vm2434_vm8 = vcmp.gt.f32.partialorder %v6964_v34, 0.0  ;;  %v2877_v33 = vsel %vm2429_vm2, %v6968_v46, %v4681_v30 }
 0x339   :  { %7751 = vst [vmem:[#allocation4_spill] sm:$0xff] %v7001_v55  ;;  %v7013_v55 = vadd.f32 %v6106_v50, %v7752_v62  ;;  %v2755_v5 = vmul.f32 1.442695, %v6996_v23  ;;  %4696 = vpow2.f32 %v2651_v58  ;;  %v3030_v58 = vmul.f32 %v5877_v44, %v2878_v6 }
 0x33a   :  { %v7003_v40 = vpop.permute.xlu0 %3172  ;;  %4698 = vpow2.f32 %v2649_v0  ;;  %v2493_v0 = vadd.f32 1.0, %v6950_v15  ;;  %vm2433_vm9 = vcmp.gt.f32.partialorder %v6955_v45, 0.0  ;;  %v2545_v43 = vadd.f32 1.0, %v6955_v45 }
 0x33b   :  { %3268 = vperm.xlu0 %4530, %v2975_v9   ;;  %v2543_v9 = vadd.f32 1.0, %v6937_v14  ;;  %4700 = vpow2.f32 %v2755_v5  ;;  %v2980_v5 = vmul.f32 %v5865_v18, %v2828_v42  ;;  %v2827_v6 = vsel %vm2379_vm3, %v2491_v8, %v4683_v53 }
 0x33c   :  { %3424 = vperm.xlu1 %4531, %v3027_v21   ;;  %v7027_v62 = vpop.permute.xlu1 %3181  ;;  %v2753_v21 = vmul.f32 1.442695, %v7013_v55  ;;  %v4687_v7 = vpop.eup %4686  ;;  %v7064_v3 = vadd.f32 %v6106_v50, %v6622_v17  ;;  %v2880_v39 = vsel %vm2432_vm4, %v2544_v29, %v4685_v63  ;;  %vm2384_vm10 = vcmp.gt.f32.partialorder %v6981_v56, 0.0  ;;  %v7755_v63 = vld [vmem:[#allocation9_spill] sm:$0xff] }
 0x33d   :  { %7753 = vst [vmem:[#allocation6_spill] sm:$0xff] %v7027_v62  ;;  %v3029_v30 = vmul.f32 %v5865_v18, %v2877_v33  ;;  %v2830_v59 = vsel %vm2382_vm6, %v2494_v31, %v4687_v7  ;;  %v2496_v53 = vadd.f32 1.0, %v6981_v56  ;;  %vm2383_vm11 = vcmp.gt.f32.partialorder %v6987_v26, 0.0 }
 0x33e   :  { %v7029_v51 = vpop.permute.xlu0 %3328  ;;  %4702 = vpow2.f32 %v2753_v21  ;;  %v2495_v17 = vadd.f32 1.0, %v6987_v26  ;;  %v2979_v29 = vmul.f32 %v5861_v19, %v2827_v6  ;;  %vm2436_vm12 = vcmp.gt.f32.partialorder %v6996_v23, 0.0 }
 0x33f   :  { %7754 = vst [vmem:[#allocation5_spill] sm:$0xff] %v7029_v51  ;;  %3274 = vperm.xlu0 %4530, %v2977_v38   ;;  %v2546_v38 = vadd.f32 1.0, %v6964_v34  ;;  %v4689_v51 = vpop.eup %4688  ;;  %4704 = vpow2.f32 %v2655_v61  ;;  %v7083_v1 = vadd.f32 %v6106_v50, %v7755_v63  ;;  %v3032_v31 = vmul.f32 %v5845_v16, %v2880_v39 }
 0x340   :  { %3277 = vperm.xlu1 %4531, %v2978_v12   ;;  %v7049_v32 = vpop.permute.xlu1 %3337  ;;  %v2653_v12 = vmul.f32 1.442695, %v7039_v4  ;;  %v4691_v46 = vpop.eup %4690  ;;  %v2879_v61 = vsel %vm2431_vm5, %v2543_v9, %v4689_v51  ;;  %v2759_v7 = vmul.f32 1.442695, %v7064_v3  ;;  %v2982_v33 = vmul.f32 %v5879_v25, %v2830_v59 }
 0x341   :  { %v4693_v8 = vpop.eup %4692  ;;  %vm2435_vm13 = vcmp.gt.f32.partialorder %v7013_v55, 0.0  ;;  %v2547_v6 = vadd.f32 1.0, %v7013_v55  ;;  %vm2386_vm14 = vcmp.gt.f32.partialorder %v7021_v28, 0.0  ;;  %v3031_v39 = vmul.f32 %v5879_v25, %v2879_v61 }
 0x342   :  { %v7051_v20 = vpop.permute.xlu0 %3178  ;;  %v4695_v42 = vpop.eup %4694  ;;  %4706 = vpow2.f32 %v2653_v12  ;;  %v2881_v14 = vsel %vm2433_vm9, %v2545_v43, %v4693_v8  ;;  %v2829_v59 = vsel %vm2381_vm7, %v2493_v0, %v4691_v46  ;;  %v2498_v45 = vadd.f32 1.0, %v7021_v28 }
 0x343   :  { %3433 = vperm.xlu0 %4530, %v3030_v58   ;;  %v2548_v58 = vadd.f32 1.0, %v6996_v23  ;;  %v7111_v43 = vadd.f32 1.0, %v7039_v4  ;;  %v2757_v8 = vmul.f32 1.442695, %v7083_v1  ;;  %vm3512_vm15 = vcmask 130112  }
 0x344   :  { %3283 = vperm.xlu1 %4531, %v2980_v5   ;;  %v7075_v21 = vpop.permute.xlu1 %3187  ;;  %v4697_v5 = vpop.eup %4696  ;;  %vm2385_vm0 = vcmp.gt.f32.partialorder %v7039_v4, 0.0  ;;  %4708 = vpow2.f32 %v2759_v7  ;;  %v7121_v15 = vadd.f32 %v6106_v50, %v6669_v37  ;;  %vm3519_vm2 = vcmask 195712  }
 0x345   :  { %v4699_v9 = vpop.eup %4698  ;;  %v3033_v34 = vmul.f32 %v5833_v27, %v2881_v14  ;;  %v2832_v0 = vsel %vm2384_vm10, %v2496_v53, %v4697_v5  ;;  %v7128_v46 = vmul.f32 %v5877_v44, %v2829_v59  ;;  %v7136_v37 = vadd.f32 1.0, %v7064_v3 }
 0x346   :  { %v7077_v41 = vpop.permute.xlu0 %3334  ;;  %v4701_v63 = vpop.eup %4700  ;;  %v7139_v7 = vadd.f32 1.0, %v7083_v1  ;;  %v7143_v56 = vadd.f32 %v6106_v50, %v6671_v47  ;;  %4710 = vpow2.f32 %v2757_v8  ;;  %vm3526_vm3 = vcmask 261312  }
 0x347   :  { %3430 = vperm.xlu0 %4530, %v3029_v30   ;;  %v7095_v30 = vadd.f32 %v6106_v50, %v6645_v57  ;;  %v2882_v57 = vsel %vm2434_vm8, %v2546_v38, %v4695_v42  ;;  %v2831_v42 = vsel %vm2383_vm11, %v2495_v17, %v4699_v9  ;;  %v2884_v14 = vsel %vm2436_vm12, %v2548_v58, %v4701_v63 }
 0x348   :  { %3289 = vperm.xlu1 %4531, %v2982_v33   ;;  %v7100_v51 = vpop.permute.xlu1 %3343  ;;  %v7756_v33 = vld [vmem:[#allocation10_spill] sm:$0xff]  ;;  %v4703_v61 = vpop.eup %4702  ;;  %v2984_v59 = vmul.f32 %v5833_v27, %v2832_v0  ;;  %vm2438_vm4 = vcmp.gt.f32.partialorder %v7064_v3, 0.0  ;;  %vm3533_vm5 = vcmask 326912   ;;  %v3790_v23 = vrot.slane %v7077_v41, %v6743_v24  ;;  %v7757_v0 = vld [vmem:[#allocation13_spill] sm:$0xff]  ;;  %v7758_v41 = vld [vmem:[#allocation3_spill] sm:$0xff] }
 0x349   :  { %v7116_v62 = vadd.f32 %v6106_v50, %v7756_v33  ;;  %v2659_v38 = vmul.f32 1.442695, %v7095_v30  ;;  %v4705_v26 = vpop.eup %4704  ;;  %v7150_v17 = vadd.f32 1.0, %v7095_v30  ;;  %v7162_v58 = vmul.f32 %v5845_v16, %v2831_v42 }
 0x34a   :  { %v7102_v12 = vpop.permute.xlu0 %3184  ;;  %vm3540_vm6 = vcmask 392512   ;;  %v3036_v63 = vmul.f32 %v5865_v18, %v2884_v14  ;;  %v2883_v8 = vsel %vm2435_vm13, %v2547_v6, %v4703_v61  ;;  %v7171_v27 = vadd.f32 %v6106_v50, %v7757_v0  ;;  %v7759_v6 = vld [vmem:[#allocation16_spill] sm:$0xff] }
 0x34b   :  { %3280 = vperm.xlu0 %4530, %v2979_v29   ;;  %v7131_v29 = vmul.f32 %v5847_v22, %v2882_v57  ;;  %v2657_v9 = vmul.f32 1.442695, %v7116_v62  ;;  %v7156_v47 = vadd.f32 1.0, %v7116_v62  ;;  %v2763_v57 = vmul.f32 1.442695, %v7121_v15 }
 0x34c   :  { %3442 = vperm.xlu1 %4531, %v3033_v34   ;;  %v7145_v53 = vpop.permute.xlu1 %3193  ;;  %4712 = vpow2.f32 %v2659_v38  ;;  %v4707_v33 = vpop.eup %4706  ;;  %v2761_v34 = vmul.f32 1.442695, %v7143_v56  ;;  %v3794_v42 = vrot.slane %v7049_v32, %v7758_v41  ;;  %vm2437_vm7 = vcmp.gt.f32.partialorder %v7083_v1, 0.0 }
 0x34d   :  { %4714 = vpow2.f32 %v2657_v9  ;;  %v7179_v55 = vadd.f32 1.0, %v7121_v15  ;;  %v7183_v61 = vadd.f32 %v6106_v50, %v7759_v6  ;;  %v7187_v32 = vadd.f32 1.0, %v7143_v56 }
 0x34e   :  { %v3341_v5 = vpop.permute.xlu0 %3340  ;;  %4716 = vpow2.f32 %v2763_v57  ;;  %v3795_v28 = vsel %vm3512_vm15, %v3794_v42, %v3790_v23  ;;  %v2833_v0 = vsel %vm2385_vm0, %v7111_v43, %v4707_v33  ;;  %v2663_v57 = vmul.f32 1.442695, %v7171_v27 }
 0x34f   :  { %3439 = vperm.xlu0 %4530, %v3032_v31   ;;  %v3799_v31 = vrot.slane %v3341_v5, %v6804_v2  ;;  %v2834_v5 = vsel %vm2386_vm14, %v2498_v45, %v4705_v26  ;;  %v3035_v45 = vmul.f32 %v5861_v19, %v2883_v8  ;;  %4718 = vpow2.f32 %v2761_v34 }
 0x350   :  { %3295 = vperm.xlu1 %4531, %v2984_v59   ;;  %v3350_v38 = vpop.permute.xlu1 %3349  ;;  %v2986_v59 = vmul.f32 %v5861_v19, %v2834_v5  ;;  %v3804_v23 = vrot.slane %v7100_v51, %v6739_v48  ;;  %v3552_v4 = vrot.slane %v7075_v21, %v6743_v24  ;;  %vm2388_vm8 = vcmp.gt.f32.partialorder %v7095_v30, 0.0 }
 0x351   :  { %v3814_v14 = vrot.slane %v3350_v38, %v6856_v52  ;;  %v3800_v26 = vsel %vm3519_vm2, %v3799_v31, %v3795_v28  ;;  %v4709_v38 = vpop.eup %4708  ;;  %v2661_v34 = vmul.f32 1.442695, %v7183_v61  ;;  %v7215_v51 = vadd.f32 %v6106_v50, %v6747_v13  ;;  %v7760_v13 = vld [vmem:[#allocation17_spill] sm:$0xff] }
 0x352   :  { %v3191_v16 = vpop.permute.xlu0 %3190  ;;  %vm3547_vm9 = vcmask 458112   ;;  %v7219_v42 = vmul.f32 %v5847_v22, %v2833_v0  ;;  %v4711_v21 = vpop.eup %4710  ;;  %v3506_v5 = vrot.slane %v6973_v60, %v6743_v24  ;;  %v2886_v28 = vsel %vm2438_vm4, %v7136_v37, %v4709_v38 }
 0x353   :  { %3436 = vperm.xlu0 %4530, %v3031_v39   ;;  %v3556_v9 = vrot.slane %v3191_v16, %v7758_v41  ;;  %v7198_v39 = vadd.f32 1.0, %v7171_v27  ;;  %v7204_v16 = vadd.f32 1.0, %v7183_v61  ;;  %v3561_v0 = vrot.slane %v7145_v53, %v6804_v2 }
 0x354   :  { %3451 = vperm.xlu1 %4531, %v3036_v63   ;;  %v3200_v31 = vpop.permute.xlu1 %3199  ;;  %v3805_v63 = vsel %vm3526_vm3, %v3804_v23, %v3800_v26  ;;  %v3518_v26 = vrot.slane %v7003_v40, %v6804_v2  ;;  %4720 = vpow2.f32 %v2663_v57  ;;  %v3511_v3 = vrot.slane %v6941_v35, %v7758_v41 }
 0x355   :  { %v3571_v43 = vrot.slane %v3200_v31, %v6869_v11  ;;  %v7230_v31 = vadd.f32 %v6106_v50, %v7760_v13  ;;  %vm2439_vm10 = vcmp.gt.f32.partialorder %v7143_v56, 0.0  ;;  %v2667_v40 = vmul.f32 1.442695, %v7215_v51 }
 0x356   :  { %v3347_v8 = vpop.permute.xlu0 %3346  ;;  %v7249_v53 = vadd.f32 %v6106_v50, %v6770_v54  ;;  %v2885_v35 = vsel %vm2437_vm7, %v7139_v7, %v4711_v21  ;;  %vm4059_vm11 = vcmask 1041409   ;;  %vm2387_vm12 = vcmp.gt.f32.partialorder %v7116_v62, 0.0  ;;  %v7767_v62 = vld [vmem:[#allocation12_spill] sm:$0xff] }
 0x357   :  { %v3809_v33 = vrot.slane %v3347_v8, %v6869_v11  ;;  %3286 = vperm.xlu0 %4530, %v7128_v46   ;;  %v3557_v46 = vsel %vm3512_vm15, %v3556_v9, %v3552_v4  ;;  %v4713_v8 = vpop.eup %4712  ;;  %4722 = vpow2.f32 %v2661_v34  ;;  %v3513_v4 = vsel %vm3512_vm15, %v3511_v3, %v3506_v5 }
 0x358   :  { %3448 = vperm.xlu1 %4531, %v3035_v45   ;;  %v7236_v60 = vpop.permute.xlu1 %3355  ;;  %v4715_v45 = vpop.eup %4714  ;;  %v3520_v1 = vsel %vm3519_vm2, %v3518_v26, %v3513_v4  ;;  %v3532_v7 = vrot.slane %v7051_v20, %v6869_v11  ;;  %vm2390_vm13 = vcmp.gt.f32.partialorder %v7171_v27, 0.0  ;;  %4724 = vpow2.f32 %v2667_v40 }
 0x359   :  { %v3810_v6 = vsel %vm3533_vm5, %v3809_v33, %v3805_v63  ;;  %v3824_v37 = vrot.slane %v7236_v60, %v6743_v24  ;;  %v7262_v33 = vpop.eup %4716  ;;  %v2767_v63 = vmul.f32 1.442695, %v7230_v31  ;;  %v2771_v20 = vmul.f32 1.442695, %v7249_v53 }
 0x35a   :  { %v3197_v9 = vpop.permute.xlu0 %3196  ;;  %v3815_v23 = vsel %vm3540_vm6, %v3814_v14, %v3810_v6  ;;  %v3562_v14 = vsel %vm3519_vm2, %v3561_v0, %v3557_v46  ;;  %v3525_v6 = vrot.slane %v6971_v36, %v6739_v48  ;;  %v3037_v0 = vmul.f32 %v5877_v44, %v2885_v35  ;;  %v4719_v26 = vpop.eup %4718  ;;  %v7762_v35 = vld [vmem:[#allocation14_spill] sm:$0xff] }
 0x35b   :  { %v3566_v38 = vrot.slane %v3197_v9, %v6739_v48  ;;  %3445 = vperm.xlu0 %4530, %v7131_v29   ;;  %v7761_v29 = vld [vmem:[#allocation18_spill] sm:$0xff]  ;;  %v3038_v36 = vmul.f32 %v5879_v25, %v2886_v28  ;;  %vm2440_vm14 = vcmp.gt.f32.partialorder %v7121_v15, 0.0  ;;  %v2836_v3 = vsel %vm2388_vm8, %v7150_v17, %v4713_v8  ;;  %v7769_v15 = vld [vmem:[#allocation20_spill] sm:$0xff] }
 0x35c   :  { %v7258_v57 = vadd.f32 %v6106_v50, %v7761_v29  ;;  %3301 = vperm.xlu1 %4531, %v2986_v59   ;;  %v3206_v21 = vpop.permute.xlu1 %3205  ;;  %v7279_v59 = vadd.f32 %v6106_v50, %v6799_v49  ;;  %4726 = vpow2.f32 %v2767_v63  ;;  %v3546_v28 = vrot.slane %v7102_v12, %v6777_v10  ;;  %v7763_v29 = vld [vmem:[#allocation6_spill] sm:$0xff]  ;;  %v7764_v12 = vld [vmem:[#allocation21_spill] sm:$0xff] }
 0x35d   :  { %v3567_v54 = vsel %vm3526_vm3, %v3566_v38, %v3562_v14  ;;  %v3581_v5 = vrot.slane %v3206_v21, %v6777_v10  ;;  %v7292_v38 = vadd.f32 1.0, %v7230_v31  ;;  %v3539_v30 = vrot.slane %v7763_v29, %v6856_v52 }
 0x35e   :  { %v3353_v34 = vpop.permute.xlu0 %3352  ;;  %v3572_v46 = vsel %vm3533_vm5, %v3571_v43, %v3567_v54  ;;  %v2765_v43 = vmul.f32 1.442695, %v7258_v57  ;;  %4728 = vpow2.f32 %v2771_v20  ;;  %v2671_v4 = vmul.f32 1.442695, %v7279_v59 }
 0x35f   :  { %v3819_v13 = vrot.slane %v3353_v34, %v6777_v10  ;;  %3292 = vperm.xlu0 %4530, %v7162_v58   ;;  %v3527_v58 = vsel %vm3526_vm3, %v3525_v6, %v3520_v1  ;;  %v7309_v54 = vadd.f32 %v6106_v50, %v7764_v12  ;;  %v2988_v63 = vmul.f32 %v5877_v44, %v2836_v3  ;;  %v4721_v1 = vpop.eup %4720  ;;  %v7765_v34 = vld [vmem:[#allocation19_spill] sm:$0xff] }
 0x360   :  { %v3534_v49 = vsel %vm3533_vm5, %v3532_v7, %v3527_v58  ;;  %3454 = vperm.xlu1 %4531, %v3037_v0   ;;  %v3362_v40 = vpop.permute.xlu1 %3361  ;;  %vm2389_vm0 = vcmp.gt.f32.partialorder %v7183_v61, 0.0  ;;  %4730 = vpow2.f32 %v2765_v43  ;;  %vm2442_vm4 = vcmp.gt.f32.partialorder %v7230_v31, 0.0 }
 0x361   :  { %v7286_v9 = vsel %vm3547_vm9, %v3819_v13, %v3815_v23  ;;  %v7299_v23 = vadd.f32 %v6106_v50, %v7762_v35  ;;  %v3833_v17 = vrot.slane %v3362_v40, %v6804_v2  ;;  %v3541_v7 = vsel %vm3540_vm6, %v3539_v30, %v3534_v49  ;;  %v4723_v58 = vpop.eup %4722  ;;  %v7766_v49 = vld [vmem:[#allocation22_spill] sm:$0xff] }
 0x362   :  { %v3203_v14 = vpop.permute.xlu0 %3202  ;;  %v7321_v6 = vadd.f32 %v6106_v50, %v7765_v34  ;;  %v3548_v13 = vsel %vm3547_vm9, %v3546_v28, %v3541_v7  ;;  %4732 = vpow2.f32 %v2671_v4  ;;  %v7337_v28 = vadd.f32 %v6106_v50, %v7766_v49  ;;  %v4725_v35 = vpop.eup %4724 }
 0x363   :  { %v3576_v8 = vrot.slane %v3203_v14, %v6856_v52  ;;  %3298 = vperm.xlu0 %4530, %v7219_v42   ;;  %v2887_v42 = vsel %vm2439_vm10, %v7187_v32, %v4719_v26  ;;  %v2665_v56 = vmul.f32 1.442695, %v7299_v23  ;;  %v2838_v14 = vsel %vm2390_vm13, %v7198_v39, %v4721_v1  ;;  %v7768_v1 = vld [vmem:[#allocation23_spill] sm:$0xff] }
 0x364   :  { %3307 = vperm.xlu1 %4531, %v2988_v63   ;;  %v3212_v20 = vpop.permute.xlu1 %3211  ;;  %vm2441_vm7 = vcmp.gt.f32.partialorder %v7258_v57, 0.0  ;;  %vm2392_vm8 = vcmp.gt.f32.partialorder %v7215_v51, 0.0  ;;  %v2769_v29 = vmul.f32 1.442695, %v7321_v6  ;;  %v2504_v27 = vadd.f32 1.0, %v7215_v51 }
 0x365   :  { %v3577_v21 = vsel %vm3540_vm6, %v3576_v8, %v3572_v46  ;;  %v2835_v46 = vsel %vm2387_vm12, %v7156_v47, %v4715_v45  ;;  %v3590_v32 = vrot.slane %v3212_v20, %v7758_v41  ;;  %v3039_v47 = vmul.f32 %v7767_v62, %v2887_v42 }
 0x366   :  { %v3582_v0 = vsel %vm3547_vm9, %v3581_v5, %v3577_v21  ;;  %v3359_v43 = vpop.permute.xlu0 %3358  ;;  %v2775_v5 = vmul.f32 1.442695, %v7309_v54  ;;  %v7341_v45 = vadd.f32 1.0, %v7258_v57  ;;  %v2987_v40 = vmul.f32 %v5865_v18, %v2835_v46  ;;  %v4727_v12 = vpop.eup %4726  ;;  %v7770_v21 = vld [vmem:[#allocation11_spill] sm:$0xff] }
 0x367   :  { %v3828_v26 = vrot.slane %v3359_v43, %v7758_v41  ;;  %3457 = vperm.xlu0 %4530, %v3038_v36   ;;  %v7332_v3 = vsel %vm4059_vm11, %v3582_v0, %v3548_v13  ;;  %4734 = vpow2.f32 %v2665_v56  ;;  %v2773_v63 = vmul.f32 1.442695, %v7337_v28 }
 0x368   :  { %3460 = vperm.xlu1 %4531, %v3039_v47   ;;  %v3368_v30 = vpop.permute.xlu1 %3367  ;;  %4736 = vpow2.f32 %v2775_v5  ;;  %v2990_v7 = vmul.f32 %v7767_v62, %v2838_v14  ;;  %v2840_v34 = vsel %vm2392_vm8, %v2504_v27, %v4725_v35  ;;  %v4729_v13 = vpop.eup %4728  ;;  %vm2444_vm10 = vcmp.gt.f32.partialorder %v7249_v53, 0.0 }
 0x369   :  { %v3829_v36 = vsel %vm3512_vm15, %v3828_v26, %v3824_v37  ;;  %v2888_v37 = vsel %vm2440_vm14, %v7179_v55, %v7262_v33  ;;  %v3843_v39 = vrot.slane %v3368_v30, %v6869_v11  ;;  %v7370_v55 = vadd.f32 %v6106_v50, %v7769_v15  ;;  %v7774_v15 = vld [vmem:[#allocation25_spill] sm:$0xff] }
 0x36a   :  { %v3209_v8 = vpop.permute.xlu0 %3208  ;;  %v3834_v60 = vsel %vm3519_vm2, %v3833_v17, %v3829_v36  ;;  %v7365_v17 = vadd.f32 %v6106_v50, %v7768_v1  ;;  %v3040_v42 = vmul.f32 %v7770_v21, %v2888_v37  ;;  %v2556_v0 = vadd.f32 1.0, %v7249_v53  ;;  %v4731_v56 = vpop.eup %4730 }
 0x36b   :  { %v3586_v4 = vrot.slane %v3209_v8, %v6743_v24  ;;  %3304 = vperm.xlu0 %4530, %v2987_v40   ;;  %4738 = vpow2.f32 %v2769_v29  ;;  %v2837_v46 = vsel %vm2389_vm0, %v7204_v16, %v4723_v58  ;;  %vm2391_vm12 = vcmp.gt.f32.partialorder %v7299_v23, 0.0  ;;  %v7772_v16 = vld [vmem:[#allocation26_spill] sm:$0xff] }
 0x36c   :  { %3313 = vperm.xlu1 %4531, %v2990_v7   ;;  %v3218_v20 = vpop.permute.xlu1 %3217  ;;  %v2890_v49 = vsel %vm2442_vm4, %v7292_v38, %v4727_v12  ;;  %4740 = vpow2.f32 %v2773_v63  ;;  %v2779_v61 = vmul.f32 1.442695, %v7365_v17  ;;  %v7394_v58 = vadd.f32 %v6106_v50, %v7772_v16  ;;  %v4733_v31 = vpop.eup %4732  ;;  %v7773_v63 = vld [vmem:[#allocation27_spill] sm:$0xff] }
 0x36d   :  { %v3591_v33 = vsel %vm3512_vm15, %v3590_v32, %v3586_v4  ;;  %v7771_v32 = vld [vmem:[#allocation24_spill] sm:$0xff]  ;;  %v3600_v26 = vrot.slane %v3218_v20, %v6739_v48  ;;  %v2992_v47 = vmul.f32 %v5847_v22, %v2840_v34  ;;  %v2669_v36 = vmul.f32 1.442695, %v7370_v55 }
 0x36e   :  { %v3365_v43 = vpop.permute.xlu0 %3364  ;;  %v7384_v51 = vadd.f32 %v6106_v50, %v7771_v32  ;;  %v2989_v14 = vmul.f32 %v5879_v25, %v2837_v46  ;;  %v2892_v35 = vsel %vm2444_vm10, %v2556_v0, %v4729_v13  ;;  %vm2394_vm13 = vcmp.gt.f32.partialorder %v7279_v59, 0.0 }
 0x36f   :  { %v3838_v5 = vrot.slane %v3365_v43, %v6739_v48  ;;  %3463 = vperm.xlu0 %4530, %v3040_v42   ;;  %v2506_v38 = vadd.f32 1.0, %v7279_v59  ;;  %v3042_v37 = vmul.f32 %v5861_v19, %v2890_v49  ;;  %v2889_v53 = vsel %vm2441_vm7, %v7341_v45, %v4731_v56 }
 0x370   :  { %3319 = vperm.xlu1 %4531, %v2992_v47   ;;  %v3374_v29 = vpop.permute.xlu1 %3373  ;;  %v2777_v27 = vmul.f32 1.442695, %v7384_v51  ;;  %4742 = vpow2.f32 %v2779_v61  ;;  %v2781_v12 = vmul.f32 1.442695, %v7394_v58  ;;  %v7415_v1 = vadd.f32 %v6106_v50, %v7773_v63 }
 0x371   :  { %v3839_v40 = vsel %vm3526_vm3, %v3838_v5, %v3834_v60  ;;  %v3853_v60 = vrot.slane %v3374_v29, %v6777_v10  ;;  %v4735_v7 = vpop.eup %4734  ;;  %4744 = vpow2.f32 %v2669_v36  ;;  %v7420_v42 = vadd.f32 %v6106_v50, %v7774_v15 }
 0x372   :  { %v3215_v30 = vpop.permute.xlu0 %3214  ;;  %v3844_v8 = vsel %vm3533_vm5, %v3843_v39, %v3839_v40  ;;  %v3044_v39 = vmul.f32 %v5877_v44, %v2892_v35  ;;  %v2842_v57 = vsel %vm2394_vm13, %v2506_v38, %v4733_v31  ;;  %v4737_v45 = vpop.eup %4736  ;;  %v2503_v13 = vadd.f32 1.0, %v7299_v23 }
 0x373   :  { %v3595_v4 = vrot.slane %v3215_v30, %v6804_v2  ;;  %3310 = vperm.xlu0 %4530, %v2989_v14   ;;  %vm2446_vm14 = vcmp.gt.f32.partialorder %v7309_v54, 0.0  ;;  %v2558_v0 = vadd.f32 1.0, %v7309_v54  ;;  %4746 = vpow2.f32 %v2777_v27 }
 0x374   :  { %3475 = vperm.xlu1 %4531, %v3044_v39   ;;  %v3224_v20 = vpop.permute.xlu1 %3223  ;;  %v3041_v59 = vmul.f32 %v5847_v22, %v2889_v53  ;;  %4748 = vpow2.f32 %v2781_v12  ;;  %v2787_v5 = vmul.f32 1.442695, %v7415_v1  ;;  %v2994_v49 = vmul.f32 %v5865_v18, %v2842_v57 }
 0x375   :  { %v3596_v34 = vsel %vm3519_vm2, %v3595_v4, %v3591_v33  ;;  %v3610_v56 = vrot.slane %v3224_v20, %v6856_v52  ;;  %v4739_v32 = vpop.eup %4738  ;;  %v2839_v61 = vsel %vm2391_vm12, %v2503_v13, %v4735_v7  ;;  %v2783_v16 = vmul.f32 1.442695, %v7420_v42 }
 0x376   :  { %v3371_v43 = vpop.permute.xlu0 %3370  ;;  %v3601_v46 = vsel %vm3526_vm3, %v3600_v26, %v3596_v34  ;;  %v7775_v26 = vld [vmem:[#allocation15_spill] sm:$0xff]  ;;  %v2894_v40 = vsel %vm2446_vm14, %v2558_v0, %v4737_v45  ;;  %v4741_v14 = vpop.eup %4740  ;;  %vm2443_vm0 = vcmp.gt.f32.partialorder %v7321_v6, 0.0  ;;  %v2555_v35 = vadd.f32 1.0, %v7321_v6 }
 0x377   :  { %v3848_v33 = vrot.slane %v3371_v43, %v6856_v52  ;;  %3469 = vperm.xlu0 %4530, %v3042_v37   ;;  %v7439_v47 = vadd.f32 %v6106_v50, %v7775_v26  ;;  %v2557_v29 = vadd.f32 1.0, %v7337_v28  ;;  %vm2445_vm4 = vcmp.gt.f32.partialorder %v7337_v28, 0.0 }
 0x378   :  { %3325 = vperm.xlu1 %4531, %v2994_v49   ;;  %v3380_v23 = vpop.permute.xlu1 %3379  ;;  %4750 = vpow2.f32 %v2787_v5  ;;  %v2991_v37 = vmul.f32 %v7770_v21, %v2839_v61  ;;  %v2891_v28 = vsel %vm2443_vm0, %v2555_v35, %v4739_v32  ;;  %v2505_v34 = vadd.f32 1.0, %v7370_v55 }
 0x379   :  { %v3849_v36 = vsel %vm3540_vm6, %v3848_v33, %v3844_v8  ;;  %v3862_v50 = vrot.slane %v3380_v23, %v7758_v41  ;;  %v3046_v8 = vmul.f32 %v7767_v62, %v2894_v40  ;;  %4752 = vpow2.f32 %v2783_v16 }
 0x37a   :  { %v3854_v31 = vsel %vm3547_vm9, %v3853_v60, %v3849_v36  ;;  %v3221_v38 = vpop.permute.xlu0 %3220  ;;  %v2785_v27 = vmul.f32 1.442695, %v7439_v47  ;;  %v2893_v4 = vsel %vm2445_vm4, %v2557_v29, %v4741_v14  ;;  %v4743_v53 = vpop.eup %4742  ;;  %v2560_v62 = vadd.f32 1.0, %v7365_v17 }
 0x37b   :  { %v3605_v30 = vrot.slane %v3221_v38, %v6869_v11  ;;  %3466 = vperm.xlu0 %4530, %v3041_v59   ;;  %v7452_v54 = vsel %vm4059_vm11, %v3854_v31, %v7286_v9  ;;  %v4745_v39 = vpop.eup %4744  ;;  %vm2393_vm11 = vcmp.gt.f32.partialorder %v7370_v55, 0.0  ;;  %vm2448_vm7 = vcmp.gt.f32.partialorder %v7365_v17, 0.0 }
 0x37c   :  { %3481 = vperm.xlu1 %4531, %v3046_v8   ;;  %v7459_v12 = vpop.permute.xlu1 %3229  ;;  %v3045_v57 = vmul.f32 %v5879_v25, %v2893_v4  ;;  %4754 = vpow2.f32 %v2785_v27  ;;  %v3043_v13 = vmul.f32 %v5865_v18, %v2891_v28  ;;  %v2896_v0 = vsel %vm2448_vm7, %v2560_v62, %v4743_v53 }
 0x37d   :  { %v3606_v60 = vsel %vm3533_vm5, %v3605_v30, %v3601_v46  ;;  %v3620_v7 = vrot.slane %v7459_v12, %v6743_v24  ;;  %v4747_v45 = vpop.eup %4746  ;;  %v2561_v33 = vadd.f32 1.0, %v7394_v58  ;;  %vm4061_vm8 = vcmask 1042434  }
 0x37e   :  { %v3377_v63 = vpop.permute.xlu0 %3376  ;;  %v3611_v9 = vsel %vm3540_vm6, %v3610_v56, %v3606_v60  ;;  %v4749_v20 = vpop.eup %4748  ;;  %v2841_v56 = vsel %vm2393_vm11, %v2505_v34, %v4745_v39  ;;  %v2559_v59 = vadd.f32 1.0, %v7384_v51  ;;  %vm2449_vm10 = vcmp.gt.f32.partialorder %v7394_v58, 0.0 }
 0x37f   :  { %v3858_v15 = vrot.slane %v3377_v63, %v6743_v24  ;;  %3316 = vperm.xlu0 %4530, %v2991_v37   ;;  %v3048_v32 = vmul.f32 %v5847_v22, %v2896_v0  ;;  %vm2447_vm12 = vcmp.gt.f32.partialorder %v7384_v51, 0.0  ;;  %v2993_v49 = vmul.f32 %v5861_v19, %v2841_v56 }
 0x380   :  { %v3386_v43 = vpop.permute.xlu1 %3385  ;;  %3478 = vperm.xlu1 %4531, %v3045_v57   ;;  %v2897_v61 = vsel %vm2449_vm10, %v2561_v33, %v4749_v20  ;;  %v2895_v14 = vsel %vm2447_vm12, %v2559_v59, %v4747_v45  ;;  %v2564_v58 = vadd.f32 1.0, %v7415_v1  ;;  %v2562_v31 = vadd.f32 1.0, %v7420_v42 }
 0x381   :  { %v3863_v6 = vsel %vm3512_vm15, %v3862_v50, %v3858_v15  ;;  %v3872_v55 = vrot.slane %v3386_v43, %v6739_v48  ;;  %vm2452_vm13 = vcmp.gt.f32.partialorder %v7415_v1, 0.0  ;;  %v3049_v23 = vmul.f32 %v5861_v19, %v2897_v61 }
 0x382   :  { %v3227_v46 = vpop.permute.xlu0 %3226  ;;  %v4751_v16 = vpop.eup %4750  ;;  %vm2450_vm14 = vcmp.gt.f32.partialorder %v7420_v42, 0.0  ;;  %v3047_v38 = vmul.f32 %v7770_v21, %v2895_v14  ;;  %v2563_v19 = vadd.f32 1.0, %v7439_v47  ;;  %vm2451_vm0 = vcmp.gt.f32.partialorder %v7439_v47, 0.0 }
 0x383   :  { %v3615_v17 = vrot.slane %v3227_v46, %v6777_v10  ;;  %3472 = vperm.xlu0 %4530, %v3043_v13   ;;  %v4753_v35 = vpop.eup %4752  ;;  %v2900_v29 = vsel %vm2452_vm13, %v2564_v58, %v4751_v16  ;;  %vm4063_vm4 = vcmask 1043459   ;;  %vm4065_vm11 = vcmask 1044484  }
 0x384   :  { %v3236_v36 = vpop.permute.xlu1 %3235  ;;  %3487 = vperm.xlu1 %4531, %v3048_v32   ;;  %v2898_v37 = vsel %vm2450_vm14, %v2562_v31, %v4753_v35  ;;  %v3052_v42 = vmul.f32 %v5879_v25, %v2900_v29  ;;  %vm4067_vm7 = vcmask 1045509   ;;  %vm4071_vm10 = vcmask 1047559  }
 0x385   :  { %v3616_v5 = vsel %vm3547_vm9, %v3615_v17, %v3611_v9  ;;  %v3629_v22 = vrot.slane %v3236_v36, %v6804_v2  ;;  %v3050_v4 = vmul.f32 %v5865_v18, %v2898_v37  ;;  %vm4082_vm12 = vcmask 457728  }
 0x386   :  { %v7485_v26 = vsel %vm4061_vm8, %v3616_v5, %v7332_v3  ;;  %v3383_v40 = vpop.permute.xlu0 %3382  ;;  %v4755_v27 = vpop.eup %4754 }
 0x387   :  { %v3867_v51 = vrot.slane %v3383_v40, %v6804_v2  ;;  %3322 = vperm.xlu0 %4530, %v2993_v49   ;;  %v2899_v9 = vsel %vm2451_vm0, %v2563_v19, %v4755_v27 }
 0x388   :  { %v3392_v50 = vpop.permute.xlu1 %3391  ;;  %3490 = vperm.xlu1 %4531, %v3049_v23   ;;  %v3051_v25 = vmul.f32 %v5877_v44, %v2899_v9 }
 0x389   :  { %v3868_v3 = vsel %vm3519_vm2, %v3867_v51, %v3863_v6  ;;  %v3882_v60 = vrot.slane %v3392_v50, %v6856_v52 }
 0x38a   :  { %v3233_v30 = vpop.permute.xlu0 %3232  ;;  %v3873_v8 = vsel %vm3526_vm3, %v3872_v55, %v3868_v3 }
 0x38b   :  { %v3624_v1 = vrot.slane %v3233_v30, %v7758_v41  ;;  %3484 = vperm.xlu0 %4530, %v3047_v38  }
 0x38c   :  { %v3242_v53 = vpop.permute.xlu1 %3241  ;;  %3499 = vperm.xlu1 %4531, %v3052_v42  }
 0x38d   :  { %v3625_v21 = vsel %vm3512_vm15, %v3624_v1, %v3620_v7  ;;  %v3639_v28 = vrot.slane %v3242_v53, %v6869_v11 }
 0x38e   :  { %v3389_v12 = vpop.permute.xlu0 %3388  ;;  %v3630_v63 = vsel %vm3519_vm2, %v3629_v22, %v3625_v21 }
 0x38f   :  { %v3877_v39 = vrot.slane %v3389_v12, %v6869_v11  ;;  %3493 = vperm.xlu0 %4530, %v3050_v4  }
 0x390   :  { %v3398_v47 = vpop.permute.xlu1 %3397 }
 0x391   :  { %v3878_v62 = vsel %vm3533_vm5, %v3877_v39, %v3873_v8  ;;  %v3892_v18 = vrot.slane %v3398_v47, %v6743_v24 }
 0x392   :  { %v3239_v15 = vpop.permute.xlu0 %3238  ;;  %v3883_v7 = vsel %vm3540_vm6, %v3882_v60, %v3878_v62 }
 0x393   :  { %v3634_v34 = vrot.slane %v3239_v15, %v6739_v48  ;;  %3496 = vperm.xlu0 %4530, %v3051_v25  }
 0x394   :  { %v3248_v45 = vpop.permute.xlu1 %3247 }
 0x395   :  { %v3635_v57 = vsel %vm3526_vm3, %v3634_v34, %v3630_v63  ;;  %v3649_v0 = vrot.slane %v3248_v45, %v6777_v10 }
 0x396   :  { %v3395_v6 = vpop.permute.xlu0 %3394  ;;  %v3640_v13 = vsel %vm3533_vm5, %v3639_v28, %v3635_v57 }
 0x397   :  { %v3887_v20 = vrot.slane %v3395_v6, %v6777_v10 }
 0x398   :  { %v3404_v46 = vpop.permute.xlu1 %3403 }
 0x399   :  { %v3888_v44 = vsel %vm3547_vm9, %v3887_v20, %v3883_v7  ;;  %v3901_v33 = vrot.slane %v3404_v46, %v6804_v2 }
 0x39a   :  { %v4074_v43 = vsel %vm4061_vm8, %v3888_v44, %v7452_v54  ;;  %v3245_v56 = vpop.permute.xlu0 %3244  ;;  %vm4069_vm8 = vcmask 1046534  }
 0x39b   :  { %v3644_v55 = vrot.slane %v3245_v56, %v6856_v52 }
 0x39c   :  { %v3254_v32 = vpop.permute.xlu1 %3253 }
 0x39d   :  { %v3645_v17 = vsel %vm3540_vm6, %v3644_v55, %v3640_v13  ;;  %v3658_v49 = vrot.slane %v3254_v32, %v7758_v41 }
 0x39e   :  { %v3650_v59 = vsel %vm3547_vm9, %v3649_v0, %v3645_v17  ;;  %v3401_v5 = vpop.permute.xlu0 %3400 }
 0x39f   :  { %v3896_v61 = vrot.slane %v3401_v5, %v7758_v41  ;;  %v4064_v54 = vsel %vm4063_vm4, %v3650_v59, %v7485_v26 }
 0x3a0   :  { %v3260_v36 = vpop.permute.xlu1 %3259 }
 0x3a1   :  { %v3897_v16 = vsel %vm3512_vm15, %v3896_v61, %v3892_v18  ;;  %v3668_v35 = vrot.slane %v3260_v36, %v6739_v48 }
 0x3a2   :  { %v3251_v40 = vpop.permute.xlu0 %3250  ;;  %v3902_v14 = vsel %vm3519_vm2, %v3901_v33, %v3897_v16 }
 0x3a3   :  { %v3654_v58 = vrot.slane %v3251_v40, %v6743_v24 }
 0x3a4   :  { %v3416_v51 = vpop.permute.xlu1 %3415 }
 0x3a5   :  { %v3659_v22 = vsel %vm3512_vm15, %v3658_v49, %v3654_v58  ;;  %v3921_v23 = vrot.slane %v3416_v51, %v6777_v10 }
 0x3a6   :  { %v3410_v31 = vpop.permute.xlu0 %3409 }
 0x3a7   :  { %v3911_v3 = vrot.slane %v3410_v31, %v6869_v11 }
 0x3a8   :  { %v3413_v38 = vpop.permute.xlu1 %3412 }
 0x3a9   :  { %v3916_v29 = vrot.slane %v3413_v38, %v6856_v52 }
 0x3aa   :  { %v3407_v26 = vpop.permute.xlu0 %3406 }
 0x3ab   :  { %v3906_v50 = vrot.slane %v3407_v26, %v6739_v48 }
 0x3ac   :  { %v3266_v37 = vpop.permute.xlu1 %3265 }
 0x3ad   :  { %v3907_v30 = vsel %vm3526_vm3, %v3906_v50, %v3902_v14  ;;  %v3678_v1 = vrot.slane %v3266_v37, %v6856_v52 }
 0x3ae   :  { %v3912_v8 = vsel %vm3533_vm5, %v3911_v3, %v3907_v30  ;;  %v3257_v27 = vpop.permute.xlu0 %3256 }
 0x3af   :  { %v3917_v60 = vsel %vm3540_vm6, %v3916_v29, %v3912_v8  ;;  %v3663_v19 = vrot.slane %v3257_v27, %v6804_v2 }
 0x3b0   :  { %v3922_v42 = vsel %vm3547_vm9, %v3921_v23, %v3917_v60  ;;  %v3422_v53 = vpop.permute.xlu1 %3421 }
 0x3b1   :  { %v3664_v21 = vsel %vm3519_vm2, %v3663_v19, %v3659_v22  ;;  %v4075_v4 = vsel %vm4063_vm4, %v3922_v42, %v4074_v43  ;;  %v3930_v9 = vrot.slane %v3422_v53, %v7758_v41 }
 0x3b2   :  { %v3669_v12 = vsel %vm3526_vm3, %v3668_v35, %v3664_v21  ;;  %v3263_v63 = vpop.permute.xlu0 %3262 }
 0x3b3   :  { %v3673_v28 = vrot.slane %v3263_v63, %v6869_v11 }
 0x3b4   :  { %v3272_v62 = vpop.permute.xlu1 %3271 }
 0x3b5   :  { %v3674_v39 = vsel %vm3533_vm5, %v3673_v28, %v3669_v12  ;;  %v3688_v15 = vrot.slane %v3272_v62, %v6743_v24 }
 0x3b6   :  { %v3419_v25 = vpop.permute.xlu0 %3418  ;;  %v3679_v47 = vsel %vm3540_vm6, %v3678_v1, %v3674_v39 }
 0x3b7   :  { %v3926_v7 = vrot.slane %v3419_v25, %v6743_v24 }
 0x3b8   :  { %v3428_v34 = vpop.permute.xlu1 %3427 }
 0x3b9   :  { %v3931_v18 = vsel %vm3512_vm15, %v3930_v9, %v3926_v7  ;;  %v3940_v45 = vrot.slane %v3428_v34, %v6739_v48 }
 0x3ba   :  { %v3269_v57 = vpop.permute.xlu0 %3268 }
 0x3bb   :  { %v3683_v6 = vrot.slane %v3269_v57, %v6777_v10 }
 0x3bc   :  { %v3425_v20 = vpop.permute.xlu1 %3424 }
 0x3bd   :  { %v3684_v13 = vsel %vm3547_vm9, %v3683_v6, %v3679_v47  ;;  %v3935_v43 = vrot.slane %v3425_v20, %v6804_v2 }
 0x3be   :  { %v4066_v0 = vsel %vm4065_vm11, %v3684_v13, %v4064_v54  ;;  %v3275_v44 = vpop.permute.xlu0 %3274 }
 0x3bf   :  { %v3692_v46 = vrot.slane %v3275_v44, %v7758_v41  ;;  %v3936_v56 = vsel %vm3519_vm2, %v3935_v43, %v3931_v18 }
 0x3c0   :  { %v3278_v55 = vpop.permute.xlu1 %3277  ;;  %v3941_v59 = vsel %vm3526_vm3, %v3940_v45, %v3936_v56 }
 0x3c1   :  { %v3693_v33 = vsel %vm3512_vm15, %v3692_v46, %v3688_v15  ;;  %v3697_v32 = vrot.slane %v3278_v55, %v6804_v2 }
 0x3c2   :  { %v3434_v17 = vpop.permute.xlu0 %3433 }
 0x3c3   :  { %v3950_v5 = vrot.slane %v3434_v17, %v6856_v52  ;;  %v3698_v49 = vsel %vm3519_vm2, %v3697_v32, %v3693_v33 }
 0x3c4   :  { %v3284_v61 = vpop.permute.xlu1 %3283 }
 0x3c5   :  { %v3707_v22 = vrot.slane %v3284_v61, %v6869_v11 }
 0x3c6   :  { %v3431_v54 = vpop.permute.xlu0 %3430 }
 0x3c7   :  { %v3945_v16 = vrot.slane %v3431_v54, %v6869_v11 }
 0x3c8   :  { %v3290_v40 = vpop.permute.xlu1 %3289 }
 0x3c9   :  { %v3946_v36 = vsel %vm3533_vm5, %v3945_v16, %v3941_v59  ;;  %v3717_v60 = vrot.slane %v3290_v40, %v6777_v10 }
 0x3ca   :  { %v3281_v14 = vpop.permute.xlu0 %3280  ;;  %v3951_v35 = vsel %vm3540_vm6, %v3950_v5, %v3946_v36 }
 0x3cb   :  { %v3702_v58 = vrot.slane %v3281_v14, %v6739_v48 }
 0x3cc   :  { %v3443_v31 = vpop.permute.xlu1 %3442 }
 0x3cd   :  { %v3703_v51 = vsel %vm3526_vm3, %v3702_v58, %v3698_v49  ;;  %v3964_v12 = vrot.slane %v3443_v31, %v7758_v41 }
 0x3ce   :  { %v3440_v23 = vpop.permute.xlu0 %3439  ;;  %v3708_v3 = vsel %vm3533_vm5, %v3707_v22, %v3703_v51 }
 0x3cf   :  { %v3960_v63 = vrot.slane %v3440_v23, %v6743_v24 }
 0x3d0   :  { %v3296_v38 = vpop.permute.xlu1 %3295 }
 0x3d1   :  { %v3965_v39 = vsel %vm3512_vm15, %v3964_v12, %v3960_v63  ;;  %v3726_v46 = vrot.slane %v3296_v38, %v7758_v41 }
 0x3d2   :  { %v3437_v26 = vpop.permute.xlu0 %3436 }
 0x3d3   :  { %v3955_v29 = vrot.slane %v3437_v26, %v6777_v10 }
 0x3d4   :  { %v3452_v8 = vpop.permute.xlu1 %3451 }
 0x3d5   :  { %v3956_v50 = vsel %vm3547_vm9, %v3955_v29, %v3951_v35  ;;  %v3979_v34 = vrot.slane %v3452_v8, %v6869_v11 }
 0x3d6   :  { %v4076_v30 = vsel %vm4065_vm11, %v3956_v50, %v4075_v4  ;;  %v3287_v37 = vpop.permute.xlu0 %3286 }
 0x3d7   :  { %v3712_v27 = vrot.slane %v3287_v37, %v6856_v52 }
 0x3d8   :  { %v3449_v42 = vpop.permute.xlu1 %3448 }
 0x3d9   :  { %v3713_v1 = vsel %vm3540_vm6, %v3712_v27, %v3708_v3  ;;  %v3974_v62 = vrot.slane %v3449_v42, %v6739_v48 }
 0x3da   :  { %v3718_v19 = vsel %vm3547_vm9, %v3717_v60, %v3713_v1  ;;  %v3446_v21 = vpop.permute.xlu0 %3445 }
 0x3db   :  { %v4068_v53 = vsel %vm4067_vm7, %v3718_v19, %v4066_v0  ;;  %v3969_v4 = vrot.slane %v3446_v21, %v6804_v2 }
 0x3dc   :  { %v3302_v9 = vpop.permute.xlu1 %3301 }
 0x3dd   :  { %v3970_v25 = vsel %vm3519_vm2, %v3969_v4, %v3965_v39  ;;  %v3736_v5 = vrot.slane %v3302_v9, %v6739_v48 }
 0x3de   :  { %v3293_v28 = vpop.permute.xlu0 %3292  ;;  %v3975_v7 = vsel %vm3526_vm3, %v3974_v62, %v3970_v25 }
 0x3df   :  { %v3980_v6 = vsel %vm3533_vm5, %v3979_v34, %v3975_v7  ;;  %v3722_v0 = vrot.slane %v3293_v28, %v6743_v24 }
 0x3e0   :  { %v3455_v47 = vpop.permute.xlu1 %3454 }
 0x3e1   :  { %v3984_v18 = vrot.slane %v3455_v47, %v6856_v52  ;;  %v3727_v17 = vsel %vm3512_vm15, %v3726_v46, %v3722_v0  ;;  %v7777_v0 = vld [vmem:[#allocation4_spill] sm:$0xff] }
 0x3e2   :  { %v3299_v15 = vpop.permute.xlu0 %3298 }
 0x3e3   :  { %v3985_v20 = vsel %vm3540_vm6, %v3984_v18, %v3980_v6  ;;  %v3731_v44 = vrot.slane %v3299_v15, %v6804_v2 }
 0x3e4   :  { %v3308_v57 = vpop.permute.xlu1 %3307 }
 0x3e5   :  { %v3732_v59 = vsel %vm3519_vm2, %v3731_v44, %v3727_v17  ;;  %v3746_v36 = vrot.slane %v3308_v57, %v6856_v52 }
 0x3e6   :  { %v3458_v45 = vpop.permute.xlu0 %3457  ;;  %v3737_v54 = vsel %vm3526_vm3, %v3736_v5, %v3732_v59 }
 0x3e7   :  { %v3989_v13 = vrot.slane %v3458_v45, %v6777_v10  ;;  %v7776_v45 = vld [vmem:[#allocation5_spill] sm:$0xff] }
 0x3e8   :  { %v3461_v56 = vpop.permute.xlu1 %3460  ;;  %v3780_v6 = vrot.slane %v7776_v45, %v6856_v52 }
 0x3e9   :  { %v3990_v43 = vsel %vm3547_vm9, %v3989_v13, %v3985_v20  ;;  %v3994_v50 = vrot.slane %v3461_v56, %v6743_v24  ;;  %v3785_v20 = vrot.slane %v7777_v0, %v6777_v10 }
 0x3ea   :  { %v3305_v33 = vpop.permute.xlu0 %3304  ;;  %v4077_v55 = vsel %vm4067_vm7, %v3990_v43, %v4076_v30 }
 0x3eb   :  { %v3741_v32 = vrot.slane %v3305_v33, %v6869_v11 }
 0x3ec   :  { %v3314_v49 = vpop.permute.xlu1 %3313 }
 0x3ed   :  { %v3742_v16 = vsel %vm3533_vm5, %v3741_v32, %v3737_v54  ;;  %v3756_v21 = vrot.slane %v3314_v49, %v6743_v24 }
 0x3ee   :  { %v3464_v61 = vpop.permute.xlu0 %3463  ;;  %v3747_v58 = vsel %vm3540_vm6, %v3746_v36, %v3742_v16 }
 0x3ef   :  { %v3998_v26 = vrot.slane %v3464_v61, %v7758_v41 }
 0x3f0   :  { %v3320_v40 = vpop.permute.xlu1 %3319 }
 0x3f1   :  { %v3999_v37 = vsel %vm3512_vm15, %v3998_v26, %v3994_v50  ;;  %v3765_v39 = vrot.slane %v3320_v40, %v6804_v2 }
 0x3f2   :  { %v3311_v14 = vpop.permute.xlu0 %3310 }
 0x3f3   :  { %v3751_v35 = vrot.slane %v3311_v14, %v6777_v10 }
 0x3f4   :  { %v3476_v51 = vpop.permute.xlu1 %3475 }
 0x3f5   :  { %v3752_v22 = vsel %vm3547_vm9, %v3751_v35, %v3747_v58  ;;  %v4018_v12 = vrot.slane %v3476_v51, %v6856_v52 }
 0x3f6   :  { %v3470_v31 = vpop.permute.xlu0 %3469  ;;  %v4070_v23 = vsel %vm4069_vm8, %v3752_v22, %v4068_v53 }
 0x3f7   :  { %v4008_v1 = vrot.slane %v3470_v31, %v6739_v48  ;;  %v4758_v31 = vld [vmem:[%s7668_s0] sm:$0xff] }
 0x3f8   :  { %v3326_v3 = vpop.permute.xlu1 %3325 }
 0x3f9   :  { %v3775_v18 = vrot.slane %v3326_v3, %v6869_v11 }
 0x3fa   :  { %v3467_v38 = vpop.permute.xlu0 %3466 }
 0x3fb   :  { %v4003_v29 = vrot.slane %v3467_v38, %v6804_v2 }
 0x3fc   :  { %v3482_v30 = vpop.permute.xlu1 %3481 }
 0x3fd   :  { %v4004_v27 = vsel %vm3519_vm2, %v4003_v29, %v3999_v37  ;;  %v4028_v46 = vrot.slane %v3482_v30, %v6743_v24 }
 0x3fe   :  { %v3317_v8 = vpop.permute.xlu0 %3316  ;;  %v4009_v63 = vsel %vm3526_vm3, %v4008_v1, %v4004_v27 }
 0x3ff   :  { %v3760_v60 = vrot.slane %v3317_v8, %v7758_v41 }
 0x400   :  { %v3479_v19 = vpop.permute.xlu1 %3478 }
 0x401   :  { %v3761_v4 = vsel %vm3512_vm15, %v3760_v60, %v3756_v21  ;;  %v4023_v9 = vrot.slane %v3479_v19, %v6777_v10 }
 0x402   :  { %v3473_v42 = vpop.permute.xlu0 %3472  ;;  %v3766_v34 = vsel %vm3519_vm2, %v3765_v39, %v3761_v4 }
 0x403   :  { %v4013_v53 = vrot.slane %v3473_v42, %v6869_v11 }
 0x404   :  { %v3488_v25 = vpop.permute.xlu1 %3487 }
 0x405   :  { %v4014_v28 = vsel %vm3533_vm5, %v4013_v53, %v4009_v63 }
 0x406   :  { %v4019_v62 = vsel %vm3540_vm6, %v4018_v12, %v4014_v28  ;;  %v3323_v47 = vpop.permute.xlu0 %3322 }
 0x407   :  { %v3770_v15 = vrot.slane %v3323_v47, %v6739_v48  ;;  %v4024_v7 = vsel %vm3547_vm9, %v4023_v9, %v4019_v62 }
 0x408   :  { %v4078_v57 = vsel %vm4069_vm8, %v4024_v7, %v4077_v55  ;;  %v3491_v56 = vpop.permute.xlu1 %3490  ;;  %v4037_v55 = vrot.slane %v3488_v25, %v6804_v2 }
 0x409   :  { %v3771_v13 = vsel %vm3526_vm3, %v3770_v15, %v3766_v34  ;;  %v4042_v24 = vrot.slane %v3491_v56, %v6739_v48 }
 0x40a   :  { %v3776_v44 = vsel %vm3533_vm5, %v3775_v18, %v3771_v13  ;;  %v3485_v43 = vpop.permute.xlu0 %3484 }
 0x40b   :  { %v4032_v33 = vrot.slane %v3485_v43, %v7758_v41  ;;  %v3781_v17 = vsel %vm3540_vm6, %v3780_v6, %v3776_v44 }
 0x40c   :  { %v3786_v59 = vsel %vm3547_vm9, %v3785_v20, %v3781_v17  ;;  %v3500_v16 = vpop.permute.xlu1 %3499 }
 0x40d   :  { %v4033_v32 = vsel %vm3512_vm15, %v4032_v33, %v4028_v46  ;;  %v4072_v5 = vsel %vm4071_vm10, %v3786_v59, %v4070_v23  ;;  %v4057_v14 = vrot.slane %v3500_v16, %v6777_v10 }
 0x40e   :  { %v4038_v49 = vsel %vm3519_vm2, %v4037_v55, %v4033_v32  ;;  %v3494_v61 = vpop.permute.xlu0 %3493  ;;  %v4083_v54 = vsel %vm4082_vm12, %v4072_v5, 0.0 }
 0x40f   :  { %4084 = vadd.xlane.f32.xlu0 %v4083_v54  ;;  %v4047_v41 = vrot.slane %v3494_v61, %v6869_v11  ;;  %v4043_v36 = vsel %vm3526_vm3, %v4042_v24, %v4038_v49 }
 0x411   :  { %v4048_v35 = vsel %vm3533_vm5, %v4047_v41, %v4043_v36 }
 0x412   :  { %v3497_v2 = vpop.permute.xlu0 %3496 }
 0x413   :  { %v4052_v40 = vrot.slane %v3497_v2, %v6856_v52  ;;  %v4759_v52 = vld [vmem:[%s7668_s0 + $0x8] sm:$0xff] }
 0x415   :  { %v4053_v58 = vsel %vm3540_vm6, %v4052_v40, %v4048_v35 }
 0x416   :  { %v4058_v22 = vsel %vm3547_vm9, %v4057_v14, %v4053_v58 }
 0x417   :  { %v4079_v51 = vsel %vm4071_vm10, %v4058_v22, %v4078_v57 }
 0x418   :  { %v4086_v48 = vsel %vm4082_vm12, %v4079_v51, 0.0 }
 0x419   :  { %4087 = vadd.xlane.f32.xlu1 %v4086_v48 }
 0x49c   :  { %v4085_v11 = vpop.xlane.xlu0 %4084 }
 0x49d   :  { %v4089_v23 = vmul.f32 %v4758_v31, %v4085_v11 }
 0x49f   :  { %4091 = vst.msk [vmem:[%s7676_s9] sm:$0xff] %vm36_vm1, %v4089_v23 }
 0x4a6   :  { %v4088_v10 = vpop.xlane.xlu1 %4087 }
 0x4a7   :  { %v4090_v3 = vmul.f32 %v4759_v52, %v4088_v10 }
 0x4a9   :  { %4092 = vst.msk [vmem:[%s7676_s9 + $0x8] sm:$0xff] %vm36_vm1, %v4090_v3 }

</bundles_post_ra>
